<compile_context>
chip_gen: v5e
topology: v5e:2x2
jax: 0.10.0
libtpu: 0.0.40
codegen_flags: <defaults>
</compile_context>

<pallas_src>
import functools

import jax
import jax.numpy as jnp
from jax import lax
from jax.experimental import pallas as pl
from jax.experimental.pallas import tpu as pltpu


def basenet_kernel(x_ref, hw_ref, w1_ref, b1_ref, w2_ref, b2_ref, w3_ref,
                   b3_ref, out_ref, *, H, W, bn):
    HW = H * W
    L = bn * HW

    # Per-position (h, w) coordinates (periodic per example); only used to
    # build the 1-wide "same"-padding halo masks via vector compares.
    h_idx = hw_ref[0:1, :]                       # (1, L) int32
    w_idx = hw_ref[1:2, :]                       # (1, L) int32
    hmask = {-1: h_idx > 0, 0: None, 1: h_idx < H - 1}
    wmask = {-1: w_idx > 0, 0: None, 1: w_idx < W - 1}

    def conv3x3(x, w_ref, b_ref):
        # x: (Cin, L) lane-dense; w_ref: (9, Cout, Cin); b_ref: (Cout, 1).
        # output position P needs x[P + oy*W + ox]; roll shift = -(oy*W+ox).
        # Positions whose roll wrapped (example/row boundaries) are exactly
        # the ones zeroed by the halo masks.
        acc = None
        for oy in (-1, 0, 1):
            base = x if oy == 0 else pltpu.roll(x, shift=(-oy * W) % L, axis=1)
            if hmask[oy] is not None:
                base = jnp.where(hmask[oy], base, 0.0)
            for ox in (-1, 0, 1):
                xs = base if ox == 0 else pltpu.roll(base, shift=(-ox) % L,
                                                     axis=1)
                if wmask[ox] is not None:
                    xs = jnp.where(wmask[ox], xs, 0.0)
                tap = (oy + 1) * 3 + (ox + 1)
                y = jnp.dot(w_ref[tap], xs,
                            preferred_element_type=jnp.float32)
                acc = y if acc is None else acc + y
        return acc + b_ref[...]

    x = x_ref[0]                                               # (Cin, L)
    h1 = jnp.maximum(conv3x3(x, w1_ref, b1_ref), 0.0)          # (16, L)
    h2 = jnp.maximum(conv3x3(h1, w2_ref, b2_ref), 0.0)         # (32, L)
    h3 = conv3x3(h2, w3_ref, b3_ref)                           # (64, L)

    # PyTorch: x.max(3).values.max(2).values == global max over H and W.
    # Each example owns one lane-aligned HW segment of the minor axis.
    for i in range(bn):
        out_ref[0, :, i:i + 1] = jnp.max(
            h3[:, i * HW:(i + 1) * HW], axis=1, keepdims=True)


@functools.partial(jax.jit, static_argnames=("block_n",))
def basenet_forward(x_nchw, params, *, block_n=8):
    """x_nchw: (N, d, c, H, W) float32 -> (N, 64) float32."""
    w1, b1, w2, b2, w3, b3 = params            # w: (3,3,Ci,Co) HWIO, b: (1,Co)
    N, d, c, H, W = x_nchw.shape
    cin = d * c
    HW = H * W

    bn = max(1, min(block_n, N))
    if N > 1:
        bn = min(bn, pl.cdiv(N, 2))            # grid length >= 2 (v7x megacore)
    n_pad = pl.cdiv(N, bn) * bn
    nb = n_pad // bn
    L = bn * HW

    # flatten(1,2), then repack to channel-major blocks (nb, cin, bn*HW):
    # spatial*batch lands on the lane axis (lane-dense DMA + matmul RHS).
    x = x_nchw.reshape(N, cin, HW)
    if n_pad != N:
        x = jnp.concatenate([x, jnp.zeros((n_pad - N, cin, HW), x.dtype)], 0)
    xk = x.reshape(nb, bn, cin, HW).transpose(0, 2, 1, 3).reshape(nb, cin, L)

    def wt(w):  # (3,3,Ci,Co) -> (9, Co, Ci): per-tap transposed weights
        return jnp.transpose(w, (0, 1, 3, 2)).reshape(9, w.shape[3], w.shape[2])
    w1k, w2k, w3k = wt(w1), wt(w2), wt(w3)
    b1k, b2k, b3k = b1.T, b2.T, b3.T           # (Co, 1)

    # (h, w) coordinate of every minor-axis position (same for every block).
    pidx = jnp.arange(L, dtype=jnp.int32) % HW
    hw_ids = jnp.stack([pidx // W, pidx % W], axis=0).astype(jnp.int32)  # (2,L)

    full = lambda a: pl.BlockSpec(a.shape, lambda g, _a=a: (0,) * _a.ndim)
    kernel = functools.partial(basenet_kernel, H=H, W=W, bn=bn)

    out = pl.pallas_call(
        kernel,
        out_shape=jax.ShapeDtypeStruct((nb, 64, bn), jnp.float32),
        grid_spec=pltpu.PrefetchScalarGridSpec(
            num_scalar_prefetch=0,
            grid=(nb,),
            in_specs=[
                pl.BlockSpec((1, cin, L), lambda g: (g, 0, 0)),
                full(hw_ids),
                full(w1k), full(b1k),
                full(w2k), full(b2k),
                full(w3k), full(b3k),
            ],
            out_specs=pl.BlockSpec((1, 64, bn), lambda g: (g, 0, 0)),
        ),
        compiler_params=pltpu.CompilerParams(
            dimension_semantics=("parallel",),
            vmem_limit_bytes=32 * 1024 * 1024,
        ),
    )(xk, hw_ids, w1k, b1k, w2k, b2k, w3k, b3k)

    # (nb, 64, bn) -> (n_pad, 64) -> (N, 64)
    out = jnp.transpose(out, (0, 2, 1)).reshape(n_pad, 64)
    return out[:N]


def init_params(key, cin):
    """Deterministic synthetic init (scaled normal stand-in for orthogonal)."""
    ks = jax.random.split(key, 6)

    def conv_w(k, ci, co):
        return jax.random.normal(k, (3, 3, ci, co), jnp.float32) / jnp.sqrt(ci * 9.0)

    w1 = conv_w(ks[0], cin, 16)
    b1 = jax.random.normal(ks[1], (1, 16), jnp.float32) * 0.01
    w2 = conv_w(ks[2], 16, 32)
    b2 = jax.random.normal(ks[3], (1, 32), jnp.float32) * 0.01
    w3 = conv_w(ks[4], 32, 64)
    b3 = jax.random.normal(ks[5], (1, 64), jnp.float32) * 0.01
    return (w1, b1, w2, b2, w3, b3)


def basenet_reference(x_nchw, params):
    """Plain-JAX reference of the PyTorch forward (for verification)."""
    w1, b1, w2, b2, w3, b3 = params
    N, d, c, H, W = x_nchw.shape
    x = x_nchw.reshape(N, d * c, H, W)

    def conv(x_, w_hwio, b):
        y = lax.conv_general_dilated(
            x_, w_hwio, window_strides=(1, 1), padding="SAME",
            dimension_numbers=("NCHW", "HWIO", "NCHW"))
        return y + b[0][None, :, None, None]

    x = jnp.maximum(conv(x, w1, b1), 0.0)
    x = jnp.maximum(conv(x, w2, b2), 0.0)
    x = conv(x, w3, b3)
    return jnp.max(x, axis=(2, 3))  # (N, 64)


if __name__ == "__main__":
    key = jax.random.PRNGKey(0)
    k_x, k_p = jax.random.split(key)

    # obs_shape = (d, c, w, h) with stacked_frames d = 1
    N, d, c, H, W = 2, 1, 4, 16, 16
    x = jax.random.normal(k_x, (N, d, c, H, W), jnp.float32)
    params = init_params(k_p, d * c)

    out = jax.block_until_ready(basenet_forward(x, params))
    ref = basenet_reference(x, params)

    assert out.shape == (N, 64), out.shape
    err = jnp.max(jnp.abs(out - ref))
    assert jnp.allclose(out, ref, atol=2e-4, rtol=2e-4), f"max abs err {err}"

    print("KERNEL_OK")
</pallas_src>

<mosaic_0001>
module attributes {stable_mosaic.version = 11 : i64} {
  func.func @basenet_kernel(%arg0: i32, %arg1: memref<1x4x256xf32, #tpu.memory_space<vmem>>, %arg2: memref<2x256xi32, #tpu.memory_space<vmem>>, %arg3: memref<9x16x4xf32, #tpu.memory_space<vmem>>, %arg4: memref<16x1xf32, #tpu.memory_space<vmem>>, %arg5: memref<9x32x16xf32, #tpu.memory_space<vmem>>, %arg6: memref<32x1xf32, #tpu.memory_space<vmem>>, %arg7: memref<9x64x32xf32, #tpu.memory_space<vmem>>, %arg8: memref<64x1xf32, #tpu.memory_space<vmem>>, %arg9: memref<1x64x1xf32, #tpu.memory_space<vmem>>) attributes {dimension_semantics = [#tpu.dimension_semantics<parallel>], iteration_bounds = array<i64: 2>, scalar_prefetch = 0 : i64, scratch_operands = 0 : i64, tpu.core_type = #tpu.core_type<tc>, window_params = [{transform_indices = @transform_0, window_bounds = array<i64: 1, 4, 256>}, {pipeline_mode = #tpu.pipeline_mode<synchronous>, transform_indices = @transform_1, window_bounds = array<i64: 2, 256>}, {pipeline_mode = #tpu.pipeline_mode<synchronous>, transform_indices = @transform_2, window_bounds = array<i64: 9, 16, 4>}, {pipeline_mode = #tpu.pipeline_mode<synchronous>, transform_indices = @transform_3, window_bounds = array<i64: 16, 1>}, {pipeline_mode = #tpu.pipeline_mode<synchronous>, transform_indices = @transform_4, window_bounds = array<i64: 9, 32, 16>}, {pipeline_mode = #tpu.pipeline_mode<synchronous>, transform_indices = @transform_5, window_bounds = array<i64: 32, 1>}, {pipeline_mode = #tpu.pipeline_mode<synchronous>, transform_indices = @transform_6, window_bounds = array<i64: 9, 64, 32>}, {pipeline_mode = #tpu.pipeline_mode<synchronous>, transform_indices = @transform_7, window_bounds = array<i64: 64, 1>}, {transform_indices = @transform_8, window_bounds = array<i64: 1, 64, 1>}]} {
    %c0 = arith.constant 0 : index
    %c0_0 = arith.constant 0 : index
    %0 = vector.load %arg2[%c0, %c0_0] : memref<2x256xi32, #tpu.memory_space<vmem>>, vector<1x256xi32>
    %c1 = arith.constant 1 : index
    %c0_1 = arith.constant 0 : index
    %1 = vector.load %arg2[%c1, %c0_1] : memref<2x256xi32, #tpu.memory_space<vmem>>, vector<1x256xi32>
    %c0_i32 = arith.constant 0 : i32
    %2 = vector.broadcast %c0_i32 : i32 to vector<1x256xi32>
    %3 = arith.cmpi sgt, %0, %2 : vector<1x256xi32>
    %c15_i32 = arith.constant 15 : i32
    %4 = vector.broadcast %c15_i32 : i32 to vector<1x256xi32>
    %5 = arith.cmpi slt, %0, %4 : vector<1x256xi32>
    %c0_i32_2 = arith.constant 0 : i32
    %6 = vector.broadcast %c0_i32_2 : i32 to vector<1x256xi32>
    %7 = arith.cmpi sgt, %1, %6 : vector<1x256xi32>
    %c15_i32_3 = arith.constant 15 : i32
    %8 = vector.broadcast %c15_i32_3 : i32 to vector<1x256xi32>
    %9 = arith.cmpi slt, %1, %8 : vector<1x256xi32>
    %c0_4 = arith.constant 0 : index
    %c0_5 = arith.constant 0 : index
    %c0_6 = arith.constant 0 : index
    %10 = vector.load %arg1[%c0_4, %c0_5, %c0_6] : memref<1x4x256xf32, #tpu.memory_space<vmem>>, vector<1x4x256xf32>
    %11 = vector.shape_cast %10 : vector<1x4x256xf32> to vector<4x256xf32>
    %c16_i32 = arith.constant 16 : i32
    %12 = tpu.dynamic_rotate %11 by %c16_i32 dim 1 : vector<4x256xf32>, i32 -> vector<4x256xf32>
    %cst = arith.constant 0.000000e+00 : f32
    %13 = vector.shape_cast %3 : vector<1x256xi1> to vector<1x256xi1>
    %14 = vector.broadcast %13 : vector<1x256xi1> to vector<4x256xi1>
    %15 = vector.broadcast %cst : f32 to vector<4x256xf32>
    %16 = arith.select %14, %12, %15 : vector<4x256xi1>, vector<4x256xf32>
    %c1_i32 = arith.constant 1 : i32
    %17 = tpu.dynamic_rotate %16 by %c1_i32 dim 1 : vector<4x256xf32>, i32 -> vector<4x256xf32>
    %cst_7 = arith.constant 0.000000e+00 : f32
    %18 = vector.shape_cast %7 : vector<1x256xi1> to vector<1x256xi1>
    %19 = vector.broadcast %18 : vector<1x256xi1> to vector<4x256xi1>
    %20 = vector.broadcast %cst_7 : f32 to vector<4x256xf32>
    %21 = arith.select %19, %17, %20 : vector<4x256xi1>, vector<4x256xf32>
    %c0_8 = arith.constant 0 : index
    %c0_9 = arith.constant 0 : index
    %c0_10 = arith.constant 0 : index
    %22 = vector.load %arg3[%c0_8, %c0_9, %c0_10] : memref<9x16x4xf32, #tpu.memory_space<vmem>>, vector<1x16x4xf32>
    %23 = vector.shape_cast %22 : vector<1x16x4xf32> to vector<16x4xf32>
    %cst_11 = arith.constant dense<0.000000e+00> : vector<16x256xf32>
    %24 = tpu.matmul %23, %21, %cst_11 {dimension_numbers = #tpu.dot_dimension_numbers<[1], [0], [0], [1], [0, 0, 1, 1], [], []>} : vector<16x4xf32>, vector<4x256xf32>, vector<16x256xf32> -> vector<16x256xf32>
    %c1_12 = arith.constant 1 : index
    %c0_13 = arith.constant 0 : index
    %c0_14 = arith.constant 0 : index
    %25 = vector.load %arg3[%c1_12, %c0_13, %c0_14] : memref<9x16x4xf32, #tpu.memory_space<vmem>>, vector<1x16x4xf32>
    %26 = vector.shape_cast %25 : vector<1x16x4xf32> to vector<16x4xf32>
    %cst_15 = arith.constant dense<0.000000e+00> : vector<16x256xf32>
    %27 = tpu.matmul %26, %16, %cst_15 {dimension_numbers = #tpu.dot_dimension_numbers<[1], [0], [0], [1], [0, 0, 1, 1], [], []>} : vector<16x4xf32>, vector<4x256xf32>, vector<16x256xf32> -> vector<16x256xf32>
    %28 = arith.addf %24, %27 : vector<16x256xf32>
    %c255_i32 = arith.constant 255 : i32
    %29 = tpu.dynamic_rotate %16 by %c255_i32 dim 1 : vector<4x256xf32>, i32 -> vector<4x256xf32>
    %cst_16 = arith.constant 0.000000e+00 : f32
    %30 = vector.shape_cast %9 : vector<1x256xi1> to vector<1x256xi1>
    %31 = vector.broadcast %30 : vector<1x256xi1> to vector<4x256xi1>
    %32 = vector.broadcast %cst_16 : f32 to vector<4x256xf32>
    %33 = arith.select %31, %29, %32 : vector<4x256xi1>, vector<4x256xf32>
    %c2 = arith.constant 2 : index
    %c0_17 = arith.constant 0 : index
    %c0_18 = arith.constant 0 : index
    %34 = vector.load %arg3[%c2, %c0_17, %c0_18] : memref<9x16x4xf32, #tpu.memory_space<vmem>>, vector<1x16x4xf32>
    %35 = vector.shape_cast %34 : vector<1x16x4xf32> to vector<16x4xf32>
    %cst_19 = arith.constant dense<0.000000e+00> : vector<16x256xf32>
    %36 = tpu.matmul %35, %33, %cst_19 {dimension_numbers = #tpu.dot_dimension_numbers<[1], [0], [0], [1], [0, 0, 1, 1], [], []>} : vector<16x4xf32>, vector<4x256xf32>, vector<16x256xf32> -> vector<16x256xf32>
    %37 = arith.addf %28, %36 : vector<16x256xf32>
    %c1_i32_20 = arith.constant 1 : i32
    %38 = tpu.dynamic_rotate %11 by %c1_i32_20 dim 1 : vector<4x256xf32>, i32 -> vector<4x256xf32>
    %cst_21 = arith.constant 0.000000e+00 : f32
    %39 = vector.shape_cast %7 : vector<1x256xi1> to vector<1x256xi1>
    %40 = vector.broadcast %39 : vector<1x256xi1> to vector<4x256xi1>
    %41 = vector.broadcast %cst_21 : f32 to vector<4x256xf32>
    %42 = arith.select %40, %38, %41 : vector<4x256xi1>, vector<4x256xf32>
    %c3 = arith.constant 3 : index
    %c0_22 = arith.constant 0 : index
    %c0_23 = arith.constant 0 : index
    %43 = vector.load %arg3[%c3, %c0_22, %c0_23] : memref<9x16x4xf32, #tpu.memory_space<vmem>>, vector<1x16x4xf32>
    %44 = vector.shape_cast %43 : vector<1x16x4xf32> to vector<16x4xf32>
    %cst_24 = arith.constant dense<0.000000e+00> : vector<16x256xf32>
    %45 = tpu.matmul %44, %42, %cst_24 {dimension_numbers = #tpu.dot_dimension_numbers<[1], [0], [0], [1], [0, 0, 1, 1], [], []>} : vector<16x4xf32>, vector<4x256xf32>, vector<16x256xf32> -> vector<16x256xf32>
    %46 = arith.addf %37, %45 : vector<16x256xf32>
    %c4 = arith.constant 4 : index
    %c0_25 = arith.constant 0 : index
    %c0_26 = arith.constant 0 : index
    %47 = vector.load %arg3[%c4, %c0_25, %c0_26] : memref<9x16x4xf32, #tpu.memory_space<vmem>>, vector<1x16x4xf32>
    %48 = vector.shape_cast %47 : vector<1x16x4xf32> to vector<16x4xf32>
    %cst_27 = arith.constant dense<0.000000e+00> : vector<16x256xf32>
    %49 = tpu.matmul %48, %11, %cst_27 {dimension_numbers = #tpu.dot_dimension_numbers<[1], [0], [0], [1], [0, 0, 1, 1], [], []>} : vector<16x4xf32>, vector<4x256xf32>, vector<16x256xf32> -> vector<16x256xf32>
    %50 = arith.addf %46, %49 : vector<16x256xf32>
    %c255_i32_28 = arith.constant 255 : i32
    %51 = tpu.dynamic_rotate %11 by %c255_i32_28 dim 1 : vector<4x256xf32>, i32 -> vector<4x256xf32>
    %cst_29 = arith.constant 0.000000e+00 : f32
    %52 = vector.shape_cast %9 : vector<1x256xi1> to vector<1x256xi1>
    %53 = vector.broadcast %52 : vector<1x256xi1> to vector<4x256xi1>
    %54 = vector.broadcast %cst_29 : f32 to vector<4x256xf32>
    %55 = arith.select %53, %51, %54 : vector<4x256xi1>, vector<4x256xf32>
    %c5 = arith.constant 5 : index
    %c0_30 = arith.constant 0 : index
    %c0_31 = arith.constant 0 : index
    %56 = vector.load %arg3[%c5, %c0_30, %c0_31] : memref<9x16x4xf32, #tpu.memory_space<vmem>>, vector<1x16x4xf32>
    %57 = vector.shape_cast %56 : vector<1x16x4xf32> to vector<16x4xf32>
    %cst_32 = arith.constant dense<0.000000e+00> : vector<16x256xf32>
    %58 = tpu.matmul %57, %55, %cst_32 {dimension_numbers = #tpu.dot_dimension_numbers<[1], [0], [0], [1], [0, 0, 1, 1], [], []>} : vector<16x4xf32>, vector<4x256xf32>, vector<16x256xf32> -> vector<16x256xf32>
    %59 = arith.addf %50, %58 : vector<16x256xf32>
    %c240_i32 = arith.constant 240 : i32
    %60 = tpu.dynamic_rotate %11 by %c240_i32 dim 1 : vector<4x256xf32>, i32 -> vector<4x256xf32>
    %cst_33 = arith.constant 0.000000e+00 : f32
    %61 = vector.shape_cast %5 : vector<1x256xi1> to vector<1x256xi1>
    %62 = vector.broadcast %61 : vector<1x256xi1> to vector<4x256xi1>
    %63 = vector.broadcast %cst_33 : f32 to vector<4x256xf32>
    %64 = arith.select %62, %60, %63 : vector<4x256xi1>, vector<4x256xf32>
    %c1_i32_34 = arith.constant 1 : i32
    %65 = tpu.dynamic_rotate %64 by %c1_i32_34 dim 1 : vector<4x256xf32>, i32 -> vector<4x256xf32>
    %cst_35 = arith.constant 0.000000e+00 : f32
    %66 = vector.shape_cast %7 : vector<1x256xi1> to vector<1x256xi1>
    %67 = vector.broadcast %66 : vector<1x256xi1> to vector<4x256xi1>
    %68 = vector.broadcast %cst_35 : f32 to vector<4x256xf32>
    %69 = arith.select %67, %65, %68 : vector<4x256xi1>, vector<4x256xf32>
    %c6 = arith.constant 6 : index
    %c0_36 = arith.constant 0 : index
    %c0_37 = arith.constant 0 : index
    %70 = vector.load %arg3[%c6, %c0_36, %c0_37] : memref<9x16x4xf32, #tpu.memory_space<vmem>>, vector<1x16x4xf32>
    %71 = vector.shape_cast %70 : vector<1x16x4xf32> to vector<16x4xf32>
    %cst_38 = arith.constant dense<0.000000e+00> : vector<16x256xf32>
    %72 = tpu.matmul %71, %69, %cst_38 {dimension_numbers = #tpu.dot_dimension_numbers<[1], [0], [0], [1], [0, 0, 1, 1], [], []>} : vector<16x4xf32>, vector<4x256xf32>, vector<16x256xf32> -> vector<16x256xf32>
    %73 = arith.addf %59, %72 : vector<16x256xf32>
    %c7 = arith.constant 7 : index
    %c0_39 = arith.constant 0 : index
    %c0_40 = arith.constant 0 : index
    %74 = vector.load %arg3[%c7, %c0_39, %c0_40] : memref<9x16x4xf32, #tpu.memory_space<vmem>>, vector<1x16x4xf32>
    %75 = vector.shape_cast %74 : vector<1x16x4xf32> to vector<16x4xf32>
    %cst_41 = arith.constant dense<0.000000e+00> : vector<16x256xf32>
    %76 = tpu.matmul %75, %64, %cst_41 {dimension_numbers = #tpu.dot_dimension_numbers<[1], [0], [0], [1], [0, 0, 1, 1], [], []>} : vector<16x4xf32>, vector<4x256xf32>, vector<16x256xf32> -> vector<16x256xf32>
    %77 = arith.addf %73, %76 : vector<16x256xf32>
    %c255_i32_42 = arith.constant 255 : i32
    %78 = tpu.dynamic_rotate %64 by %c255_i32_42 dim 1 : vector<4x256xf32>, i32 -> vector<4x256xf32>
    %cst_43 = arith.constant 0.000000e+00 : f32
    %79 = vector.shape_cast %9 : vector<1x256xi1> to vector<1x256xi1>
    %80 = vector.broadcast %79 : vector<1x256xi1> to vector<4x256xi1>
    %81 = vector.broadcast %cst_43 : f32 to vector<4x256xf32>
    %82 = arith.select %80, %78, %81 : vector<4x256xi1>, vector<4x256xf32>
    %c8 = arith.constant 8 : index
    %c0_44 = arith.constant 0 : index
    %c0_45 = arith.constant 0 : index
    %83 = vector.load %arg3[%c8, %c0_44, %c0_45] : memref<9x16x4xf32, #tpu.memory_space<vmem>>, vector<1x16x4xf32>
    %84 = vector.shape_cast %83 : vector<1x16x4xf32> to vector<16x4xf32>
    %cst_46 = arith.constant dense<0.000000e+00> : vector<16x256xf32>
    %85 = tpu.matmul %84, %82, %cst_46 {dimension_numbers = #tpu.dot_dimension_numbers<[1], [0], [0], [1], [0, 0, 1, 1], [], []>} : vector<16x4xf32>, vector<4x256xf32>, vector<16x256xf32> -> vector<16x256xf32>
    %86 = arith.addf %77, %85 : vector<16x256xf32>
    %c0_47 = arith.constant 0 : index
    %c0_48 = arith.constant 0 : index
    %87 = vector.load %arg4[%c0_47, %c0_48] : memref<16x1xf32, #tpu.memory_space<vmem>>, vector<16x1xf32>
    %88 = vector.broadcast %87 : vector<16x1xf32> to vector<16x256xf32>
    %89 = arith.addf %86, %88 : vector<16x256xf32>
    %cst_49 = arith.constant 0.000000e+00 : f32
    %90 = vector.broadcast %cst_49 : f32 to vector<16x256xf32>
    %91 = arith.maximumf %89, %90 : vector<16x256xf32>
    %c16_i32_50 = arith.constant 16 : i32
    %92 = tpu.dynamic_rotate %91 by %c16_i32_50 dim 1 : vector<16x256xf32>, i32 -> vector<16x256xf32>
    %cst_51 = arith.constant 0.000000e+00 : f32
    %93 = vector.shape_cast %3 : vector<1x256xi1> to vector<1x256xi1>
    %94 = vector.broadcast %93 : vector<1x256xi1> to vector<16x256xi1>
    %95 = vector.broadcast %cst_51 : f32 to vector<16x256xf32>
    %96 = arith.select %94, %92, %95 : vector<16x256xi1>, vector<16x256xf32>
    %c1_i32_52 = arith.constant 1 : i32
    %97 = tpu.dynamic_rotate %96 by %c1_i32_52 dim 1 : vector<16x256xf32>, i32 -> vector<16x256xf32>
    %cst_53 = arith.constant 0.000000e+00 : f32
    %98 = vector.shape_cast %7 : vector<1x256xi1> to vector<1x256xi1>
    %99 = vector.broadcast %98 : vector<1x256xi1> to vector<16x256xi1>
    %100 = vector.broadcast %cst_53 : f32 to vector<16x256xf32>
    %101 = arith.select %99, %97, %100 : vector<16x256xi1>, vector<16x256xf32>
    %c0_54 = arith.constant 0 : index
    %c0_55 = arith.constant 0 : index
    %c0_56 = arith.constant 0 : index
    %102 = vector.load %arg5[%c0_54, %c0_55, %c0_56] : memref<9x32x16xf32, #tpu.memory_space<vmem>>, vector<1x32x16xf32>
    %103 = vector.shape_cast %102 : vector<1x32x16xf32> to vector<32x16xf32>
    %cst_57 = arith.constant dense<0.000000e+00> : vector<32x256xf32>
    %104 = tpu.matmul %103, %101, %cst_57 {dimension_numbers = #tpu.dot_dimension_numbers<[1], [0], [0], [1], [0, 0, 1, 1], [], []>} : vector<32x16xf32>, vector<16x256xf32>, vector<32x256xf32> -> vector<32x256xf32>
    %c1_58 = arith.constant 1 : index
    %c0_59 = arith.constant 0 : index
    %c0_60 = arith.constant 0 : index
    %105 = vector.load %arg5[%c1_58, %c0_59, %c0_60] : memref<9x32x16xf32, #tpu.memory_space<vmem>>, vector<1x32x16xf32>
    %106 = vector.shape_cast %105 : vector<1x32x16xf32> to vector<32x16xf32>
    %cst_61 = arith.constant dense<0.000000e+00> : vector<32x256xf32>
    %107 = tpu.matmul %106, %96, %cst_61 {dimension_numbers = #tpu.dot_dimension_numbers<[1], [0], [0], [1], [0, 0, 1, 1], [], []>} : vector<32x16xf32>, vector<16x256xf32>, vector<32x256xf32> -> vector<32x256xf32>
    %108 = arith.addf %104, %107 : vector<32x256xf32>
    %c255_i32_62 = arith.constant 255 : i32
    %109 = tpu.dynamic_rotate %96 by %c255_i32_62 dim 1 : vector<16x256xf32>, i32 -> vector<16x256xf32>
    %cst_63 = arith.constant 0.000000e+00 : f32
    %110 = vector.shape_cast %9 : vector<1x256xi1> to vector<1x256xi1>
    %111 = vector.broadcast %110 : vector<1x256xi1> to vector<16x256xi1>
    %112 = vector.broadcast %cst_63 : f32 to vector<16x256xf32>
    %113 = arith.select %111, %109, %112 : vector<16x256xi1>, vector<16x256xf32>
    %c2_64 = arith.constant 2 : index
    %c0_65 = arith.constant 0 : index
    %c0_66 = arith.constant 0 : index
    %114 = vector.load %arg5[%c2_64, %c0_65, %c0_66] : memref<9x32x16xf32, #tpu.memory_space<vmem>>, vector<1x32x16xf32>
    %115 = vector.shape_cast %114 : vector<1x32x16xf32> to vector<32x16xf32>
    %cst_67 = arith.constant dense<0.000000e+00> : vector<32x256xf32>
    %116 = tpu.matmul %115, %113, %cst_67 {dimension_numbers = #tpu.dot_dimension_numbers<[1], [0], [0], [1], [0, 0, 1, 1], [], []>} : vector<32x16xf32>, vector<16x256xf32>, vector<32x256xf32> -> vector<32x256xf32>
    %117 = arith.addf %108, %116 : vector<32x256xf32>
    %c1_i32_68 = arith.constant 1 : i32
    %118 = tpu.dynamic_rotate %91 by %c1_i32_68 dim 1 : vector<16x256xf32>, i32 -> vector<16x256xf32>
    %cst_69 = arith.constant 0.000000e+00 : f32
    %119 = vector.shape_cast %7 : vector<1x256xi1> to vector<1x256xi1>
    %120 = vector.broadcast %119 : vector<1x256xi1> to vector<16x256xi1>
    %121 = vector.broadcast %cst_69 : f32 to vector<16x256xf32>
    %122 = arith.select %120, %118, %121 : vector<16x256xi1>, vector<16x256xf32>
    %c3_70 = arith.constant 3 : index
    %c0_71 = arith.constant 0 : index
    %c0_72 = arith.constant 0 : index
    %123 = vector.load %arg5[%c3_70, %c0_71, %c0_72] : memref<9x32x16xf32, #tpu.memory_space<vmem>>, vector<1x32x16xf32>
    %124 = vector.shape_cast %123 : vector<1x32x16xf32> to vector<32x16xf32>
    %cst_73 = arith.constant dense<0.000000e+00> : vector<32x256xf32>
    %125 = tpu.matmul %124, %122, %cst_73 {dimension_numbers = #tpu.dot_dimension_numbers<[1], [0], [0], [1], [0, 0, 1, 1], [], []>} : vector<32x16xf32>, vector<16x256xf32>, vector<32x256xf32> -> vector<32x256xf32>
    %126 = arith.addf %117, %125 : vector<32x256xf32>
    %c4_74 = arith.constant 4 : index
    %c0_75 = arith.constant 0 : index
    %c0_76 = arith.constant 0 : index
    %127 = vector.load %arg5[%c4_74, %c0_75, %c0_76] : memref<9x32x16xf32, #tpu.memory_space<vmem>>, vector<1x32x16xf32>
    %128 = vector.shape_cast %127 : vector<1x32x16xf32> to vector<32x16xf32>
    %cst_77 = arith.constant dense<0.000000e+00> : vector<32x256xf32>
    %129 = tpu.matmul %128, %91, %cst_77 {dimension_numbers = #tpu.dot_dimension_numbers<[1], [0], [0], [1], [0, 0, 1, 1], [], []>} : vector<32x16xf32>, vector<16x256xf32>, vector<32x256xf32> -> vector<32x256xf32>
    %130 = arith.addf %126, %129 : vector<32x256xf32>
    %c255_i32_78 = arith.constant 255 : i32
    %131 = tpu.dynamic_rotate %91 by %c255_i32_78 dim 1 : vector<16x256xf32>, i32 -> vector<16x256xf32>
    %cst_79 = arith.constant 0.000000e+00 : f32
    %132 = vector.shape_cast %9 : vector<1x256xi1> to vector<1x256xi1>
    %133 = vector.broadcast %132 : vector<1x256xi1> to vector<16x256xi1>
    %134 = vector.broadcast %cst_79 : f32 to vector<16x256xf32>
    %135 = arith.select %133, %131, %134 : vector<16x256xi1>, vector<16x256xf32>
    %c5_80 = arith.constant 5 : index
    %c0_81 = arith.constant 0 : index
    %c0_82 = arith.constant 0 : index
    %136 = vector.load %arg5[%c5_80, %c0_81, %c0_82] : memref<9x32x16xf32, #tpu.memory_space<vmem>>, vector<1x32x16xf32>
    %137 = vector.shape_cast %136 : vector<1x32x16xf32> to vector<32x16xf32>
    %cst_83 = arith.constant dense<0.000000e+00> : vector<32x256xf32>
    %138 = tpu.matmul %137, %135, %cst_83 {dimension_numbers = #tpu.dot_dimension_numbers<[1], [0], [0], [1], [0, 0, 1, 1], [], []>} : vector<32x16xf32>, vector<16x256xf32>, vector<32x256xf32> -> vector<32x256xf32>
    %139 = arith.addf %130, %138 : vector<32x256xf32>
    %c240_i32_84 = arith.constant 240 : i32
    %140 = tpu.dynamic_rotate %91 by %c240_i32_84 dim 1 : vector<16x256xf32>, i32 -> vector<16x256xf32>
    %cst_85 = arith.constant 0.000000e+00 : f32
    %141 = vector.shape_cast %5 : vector<1x256xi1> to vector<1x256xi1>
    %142 = vector.broadcast %141 : vector<1x256xi1> to vector<16x256xi1>
    %143 = vector.broadcast %cst_85 : f32 to vector<16x256xf32>
    %144 = arith.select %142, %140, %143 : vector<16x256xi1>, vector<16x256xf32>
    %c1_i32_86 = arith.constant 1 : i32
    %145 = tpu.dynamic_rotate %144 by %c1_i32_86 dim 1 : vector<16x256xf32>, i32 -> vector<16x256xf32>
    %cst_87 = arith.constant 0.000000e+00 : f32
    %146 = vector.shape_cast %7 : vector<1x256xi1> to vector<1x256xi1>
    %147 = vector.broadcast %146 : vector<1x256xi1> to vector<16x256xi1>
    %148 = vector.broadcast %cst_87 : f32 to vector<16x256xf32>
    %149 = arith.select %147, %145, %148 : vector<16x256xi1>, vector<16x256xf32>
    %c6_88 = arith.constant 6 : index
    %c0_89 = arith.constant 0 : index
    %c0_90 = arith.constant 0 : index
    %150 = vector.load %arg5[%c6_88, %c0_89, %c0_90] : memref<9x32x16xf32, #tpu.memory_space<vmem>>, vector<1x32x16xf32>
    %151 = vector.shape_cast %150 : vector<1x32x16xf32> to vector<32x16xf32>
    %cst_91 = arith.constant dense<0.000000e+00> : vector<32x256xf32>
    %152 = tpu.matmul %151, %149, %cst_91 {dimension_numbers = #tpu.dot_dimension_numbers<[1], [0], [0], [1], [0, 0, 1, 1], [], []>} : vector<32x16xf32>, vector<16x256xf32>, vector<32x256xf32> -> vector<32x256xf32>
    %153 = arith.addf %139, %152 : vector<32x256xf32>
    %c7_92 = arith.constant 7 : index
    %c0_93 = arith.constant 0 : index
    %c0_94 = arith.constant 0 : index
    %154 = vector.load %arg5[%c7_92, %c0_93, %c0_94] : memref<9x32x16xf32, #tpu.memory_space<vmem>>, vector<1x32x16xf32>
    %155 = vector.shape_cast %154 : vector<1x32x16xf32> to vector<32x16xf32>
    %cst_95 = arith.constant dense<0.000000e+00> : vector<32x256xf32>
    %156 = tpu.matmul %155, %144, %cst_95 {dimension_numbers = #tpu.dot_dimension_numbers<[1], [0], [0], [1], [0, 0, 1, 1], [], []>} : vector<32x16xf32>, vector<16x256xf32>, vector<32x256xf32> -> vector<32x256xf32>
    %157 = arith.addf %153, %156 : vector<32x256xf32>
    %c255_i32_96 = arith.constant 255 : i32
    %158 = tpu.dynamic_rotate %144 by %c255_i32_96 dim 1 : vector<16x256xf32>, i32 -> vector<16x256xf32>
    %cst_97 = arith.constant 0.000000e+00 : f32
    %159 = vector.shape_cast %9 : vector<1x256xi1> to vector<1x256xi1>
    %160 = vector.broadcast %159 : vector<1x256xi1> to vector<16x256xi1>
    %161 = vector.broadcast %cst_97 : f32 to vector<16x256xf32>
    %162 = arith.select %160, %158, %161 : vector<16x256xi1>, vector<16x256xf32>
    %c8_98 = arith.constant 8 : index
    %c0_99 = arith.constant 0 : index
    %c0_100 = arith.constant 0 : index
    %163 = vector.load %arg5[%c8_98, %c0_99, %c0_100] : memref<9x32x16xf32, #tpu.memory_space<vmem>>, vector<1x32x16xf32>
    %164 = vector.shape_cast %163 : vector<1x32x16xf32> to vector<32x16xf32>
    %cst_101 = arith.constant dense<0.000000e+00> : vector<32x256xf32>
    %165 = tpu.matmul %164, %162, %cst_101 {dimension_numbers = #tpu.dot_dimension_numbers<[1], [0], [0], [1], [0, 0, 1, 1], [], []>} : vector<32x16xf32>, vector<16x256xf32>, vector<32x256xf32> -> vector<32x256xf32>
    %166 = arith.addf %157, %165 : vector<32x256xf32>
    %c0_102 = arith.constant 0 : index
    %c0_103 = arith.constant 0 : index
    %167 = vector.load %arg6[%c0_102, %c0_103] : memref<32x1xf32, #tpu.memory_space<vmem>>, vector<32x1xf32>
    %168 = vector.broadcast %167 : vector<32x1xf32> to vector<32x256xf32>
    %169 = arith.addf %166, %168 : vector<32x256xf32>
    %cst_104 = arith.constant 0.000000e+00 : f32
    %170 = vector.broadcast %cst_104 : f32 to vector<32x256xf32>
    %171 = arith.maximumf %169, %170 : vector<32x256xf32>
    %c16_i32_105 = arith.constant 16 : i32
    %172 = tpu.dynamic_rotate %171 by %c16_i32_105 dim 1 : vector<32x256xf32>, i32 -> vector<32x256xf32>
    %cst_106 = arith.constant 0.000000e+00 : f32
    %173 = vector.shape_cast %3 : vector<1x256xi1> to vector<1x256xi1>
    %174 = vector.broadcast %173 : vector<1x256xi1> to vector<32x256xi1>
    %175 = vector.broadcast %cst_106 : f32 to vector<32x256xf32>
    %176 = arith.select %174, %172, %175 : vector<32x256xi1>, vector<32x256xf32>
    %c1_i32_107 = arith.constant 1 : i32
    %177 = tpu.dynamic_rotate %176 by %c1_i32_107 dim 1 : vector<32x256xf32>, i32 -> vector<32x256xf32>
    %cst_108 = arith.constant 0.000000e+00 : f32
    %178 = vector.shape_cast %7 : vector<1x256xi1> to vector<1x256xi1>
    %179 = vector.broadcast %178 : vector<1x256xi1> to vector<32x256xi1>
    %180 = vector.broadcast %cst_108 : f32 to vector<32x256xf32>
    %181 = arith.select %179, %177, %180 : vector<32x256xi1>, vector<32x256xf32>
    %c0_109 = arith.constant 0 : index
    %c0_110 = arith.constant 0 : index
    %c0_111 = arith.constant 0 : index
    %182 = vector.load %arg7[%c0_109, %c0_110, %c0_111] : memref<9x64x32xf32, #tpu.memory_space<vmem>>, vector<1x64x32xf32>
    %183 = vector.shape_cast %182 : vector<1x64x32xf32> to vector<64x32xf32>
    %cst_112 = arith.constant dense<0.000000e+00> : vector<64x256xf32>
    %184 = tpu.matmul %183, %181, %cst_112 {dimension_numbers = #tpu.dot_dimension_numbers<[1], [0], [0], [1], [0, 0, 1, 1], [], []>} : vector<64x32xf32>, vector<32x256xf32>, vector<64x256xf32> -> vector<64x256xf32>
    %c1_113 = arith.constant 1 : index
    %c0_114 = arith.constant 0 : index
    %c0_115 = arith.constant 0 : index
    %185 = vector.load %arg7[%c1_113, %c0_114, %c0_115] : memref<9x64x32xf32, #tpu.memory_space<vmem>>, vector<1x64x32xf32>
    %186 = vector.shape_cast %185 : vector<1x64x32xf32> to vector<64x32xf32>
    %cst_116 = arith.constant dense<0.000000e+00> : vector<64x256xf32>
    %187 = tpu.matmul %186, %176, %cst_116 {dimension_numbers = #tpu.dot_dimension_numbers<[1], [0], [0], [1], [0, 0, 1, 1], [], []>} : vector<64x32xf32>, vector<32x256xf32>, vector<64x256xf32> -> vector<64x256xf32>
    %188 = arith.addf %184, %187 : vector<64x256xf32>
    %c255_i32_117 = arith.constant 255 : i32
    %189 = tpu.dynamic_rotate %176 by %c255_i32_117 dim 1 : vector<32x256xf32>, i32 -> vector<32x256xf32>
    %cst_118 = arith.constant 0.000000e+00 : f32
    %190 = vector.shape_cast %9 : vector<1x256xi1> to vector<1x256xi1>
    %191 = vector.broadcast %190 : vector<1x256xi1> to vector<32x256xi1>
    %192 = vector.broadcast %cst_118 : f32 to vector<32x256xf32>
    %193 = arith.select %191, %189, %192 : vector<32x256xi1>, vector<32x256xf32>
    %c2_119 = arith.constant 2 : index
    %c0_120 = arith.constant 0 : index
    %c0_121 = arith.constant 0 : index
    %194 = vector.load %arg7[%c2_119, %c0_120, %c0_121] : memref<9x64x32xf32, #tpu.memory_space<vmem>>, vector<1x64x32xf32>
    %195 = vector.shape_cast %194 : vector<1x64x32xf32> to vector<64x32xf32>
    %cst_122 = arith.constant dense<0.000000e+00> : vector<64x256xf32>
    %196 = tpu.matmul %195, %193, %cst_122 {dimension_numbers = #tpu.dot_dimension_numbers<[1], [0], [0], [1], [0, 0, 1, 1], [], []>} : vector<64x32xf32>, vector<32x256xf32>, vector<64x256xf32> -> vector<64x256xf32>
    %197 = arith.addf %188, %196 : vector<64x256xf32>
    %c1_i32_123 = arith.constant 1 : i32
    %198 = tpu.dynamic_rotate %171 by %c1_i32_123 dim 1 : vector<32x256xf32>, i32 -> vector<32x256xf32>
    %cst_124 = arith.constant 0.000000e+00 : f32
    %199 = vector.shape_cast %7 : vector<1x256xi1> to vector<1x256xi1>
    %200 = vector.broadcast %199 : vector<1x256xi1> to vector<32x256xi1>
    %201 = vector.broadcast %cst_124 : f32 to vector<32x256xf32>
    %202 = arith.select %200, %198, %201 : vector<32x256xi1>, vector<32x256xf32>
    %c3_125 = arith.constant 3 : index
    %c0_126 = arith.constant 0 : index
    %c0_127 = arith.constant 0 : index
    %203 = vector.load %arg7[%c3_125, %c0_126, %c0_127] : memref<9x64x32xf32, #tpu.memory_space<vmem>>, vector<1x64x32xf32>
    %204 = vector.shape_cast %203 : vector<1x64x32xf32> to vector<64x32xf32>
    %cst_128 = arith.constant dense<0.000000e+00> : vector<64x256xf32>
    %205 = tpu.matmul %204, %202, %cst_128 {dimension_numbers = #tpu.dot_dimension_numbers<[1], [0], [0], [1], [0, 0, 1, 1], [], []>} : vector<64x32xf32>, vector<32x256xf32>, vector<64x256xf32> -> vector<64x256xf32>
    %206 = arith.addf %197, %205 : vector<64x256xf32>
    %c4_129 = arith.constant 4 : index
    %c0_130 = arith.constant 0 : index
    %c0_131 = arith.constant 0 : index
    %207 = vector.load %arg7[%c4_129, %c0_130, %c0_131] : memref<9x64x32xf32, #tpu.memory_space<vmem>>, vector<1x64x32xf32>
    %208 = vector.shape_cast %207 : vector<1x64x32xf32> to vector<64x32xf32>
    %cst_132 = arith.constant dense<0.000000e+00> : vector<64x256xf32>
    %209 = tpu.matmul %208, %171, %cst_132 {dimension_numbers = #tpu.dot_dimension_numbers<[1], [0], [0], [1], [0, 0, 1, 1], [], []>} : vector<64x32xf32>, vector<32x256xf32>, vector<64x256xf32> -> vector<64x256xf32>
    %210 = arith.addf %206, %209 : vector<64x256xf32>
    %c255_i32_133 = arith.constant 255 : i32
    %211 = tpu.dynamic_rotate %171 by %c255_i32_133 dim 1 : vector<32x256xf32>, i32 -> vector<32x256xf32>
    %cst_134 = arith.constant 0.000000e+00 : f32
    %212 = vector.shape_cast %9 : vector<1x256xi1> to vector<1x256xi1>
    %213 = vector.broadcast %212 : vector<1x256xi1> to vector<32x256xi1>
    %214 = vector.broadcast %cst_134 : f32 to vector<32x256xf32>
    %215 = arith.select %213, %211, %214 : vector<32x256xi1>, vector<32x256xf32>
    %c5_135 = arith.constant 5 : index
    %c0_136 = arith.constant 0 : index
    %c0_137 = arith.constant 0 : index
    %216 = vector.load %arg7[%c5_135, %c0_136, %c0_137] : memref<9x64x32xf32, #tpu.memory_space<vmem>>, vector<1x64x32xf32>
    %217 = vector.shape_cast %216 : vector<1x64x32xf32> to vector<64x32xf32>
    %cst_138 = arith.constant dense<0.000000e+00> : vector<64x256xf32>
    %218 = tpu.matmul %217, %215, %cst_138 {dimension_numbers = #tpu.dot_dimension_numbers<[1], [0], [0], [1], [0, 0, 1, 1], [], []>} : vector<64x32xf32>, vector<32x256xf32>, vector<64x256xf32> -> vector<64x256xf32>
    %219 = arith.addf %210, %218 : vector<64x256xf32>
    %c240_i32_139 = arith.constant 240 : i32
    %220 = tpu.dynamic_rotate %171 by %c240_i32_139 dim 1 : vector<32x256xf32>, i32 -> vector<32x256xf32>
    %cst_140 = arith.constant 0.000000e+00 : f32
    %221 = vector.shape_cast %5 : vector<1x256xi1> to vector<1x256xi1>
    %222 = vector.broadcast %221 : vector<1x256xi1> to vector<32x256xi1>
    %223 = vector.broadcast %cst_140 : f32 to vector<32x256xf32>
    %224 = arith.select %222, %220, %223 : vector<32x256xi1>, vector<32x256xf32>
    %c1_i32_141 = arith.constant 1 : i32
    %225 = tpu.dynamic_rotate %224 by %c1_i32_141 dim 1 : vector<32x256xf32>, i32 -> vector<32x256xf32>
    %cst_142 = arith.constant 0.000000e+00 : f32
    %226 = vector.shape_cast %7 : vector<1x256xi1> to vector<1x256xi1>
    %227 = vector.broadcast %226 : vector<1x256xi1> to vector<32x256xi1>
    %228 = vector.broadcast %cst_142 : f32 to vector<32x256xf32>
    %229 = arith.select %227, %225, %228 : vector<32x256xi1>, vector<32x256xf32>
    %c6_143 = arith.constant 6 : index
    %c0_144 = arith.constant 0 : index
    %c0_145 = arith.constant 0 : index
    %230 = vector.load %arg7[%c6_143, %c0_144, %c0_145] : memref<9x64x32xf32, #tpu.memory_space<vmem>>, vector<1x64x32xf32>
    %231 = vector.shape_cast %230 : vector<1x64x32xf32> to vector<64x32xf32>
    %cst_146 = arith.constant dense<0.000000e+00> : vector<64x256xf32>
    %232 = tpu.matmul %231, %229, %cst_146 {dimension_numbers = #tpu.dot_dimension_numbers<[1], [0], [0], [1], [0, 0, 1, 1], [], []>} : vector<64x32xf32>, vector<32x256xf32>, vector<64x256xf32> -> vector<64x256xf32>
    %233 = arith.addf %219, %232 : vector<64x256xf32>
    %c7_147 = arith.constant 7 : index
    %c0_148 = arith.constant 0 : index
    %c0_149 = arith.constant 0 : index
    %234 = vector.load %arg7[%c7_147, %c0_148, %c0_149] : memref<9x64x32xf32, #tpu.memory_space<vmem>>, vector<1x64x32xf32>
    %235 = vector.shape_cast %234 : vector<1x64x32xf32> to vector<64x32xf32>
    %cst_150 = arith.constant dense<0.000000e+00> : vector<64x256xf32>
    %236 = tpu.matmul %235, %224, %cst_150 {dimension_numbers = #tpu.dot_dimension_numbers<[1], [0], [0], [1], [0, 0, 1, 1], [], []>} : vector<64x32xf32>, vector<32x256xf32>, vector<64x256xf32> -> vector<64x256xf32>
    %237 = arith.addf %233, %236 : vector<64x256xf32>
    %c255_i32_151 = arith.constant 255 : i32
    %238 = tpu.dynamic_rotate %224 by %c255_i32_151 dim 1 : vector<32x256xf32>, i32 -> vector<32x256xf32>
    %cst_152 = arith.constant 0.000000e+00 : f32
    %239 = vector.shape_cast %9 : vector<1x256xi1> to vector<1x256xi1>
    %240 = vector.broadcast %239 : vector<1x256xi1> to vector<32x256xi1>
    %241 = vector.broadcast %cst_152 : f32 to vector<32x256xf32>
    %242 = arith.select %240, %238, %241 : vector<32x256xi1>, vector<32x256xf32>
    %c8_153 = arith.constant 8 : index
    %c0_154 = arith.constant 0 : index
    %c0_155 = arith.constant 0 : index
    %243 = vector.load %arg7[%c8_153, %c0_154, %c0_155] : memref<9x64x32xf32, #tpu.memory_space<vmem>>, vector<1x64x32xf32>
    %244 = vector.shape_cast %243 : vector<1x64x32xf32> to vector<64x32xf32>
    %cst_156 = arith.constant dense<0.000000e+00> : vector<64x256xf32>
    %245 = tpu.matmul %244, %242, %cst_156 {dimension_numbers = #tpu.dot_dimension_numbers<[1], [0], [0], [1], [0, 0, 1, 1], [], []>} : vector<64x32xf32>, vector<32x256xf32>, vector<64x256xf32> -> vector<64x256xf32>
    %246 = arith.addf %237, %245 : vector<64x256xf32>
    %c0_157 = arith.constant 0 : index
    %c0_158 = arith.constant 0 : index
    %247 = vector.load %arg8[%c0_157, %c0_158] : memref<64x1xf32, #tpu.memory_space<vmem>>, vector<64x1xf32>
    %248 = vector.broadcast %247 : vector<64x1xf32> to vector<64x256xf32>
    %249 = arith.addf %246, %248 : vector<64x256xf32>
    %cst_159 = arith.constant dense<0xFF800000> : vector<64xf32>
    %250 = vector.multi_reduction <maximumf>, %249, %cst_159 [1] : vector<64x256xf32> to vector<64xf32>
    %251 = vector.shape_cast %250 : vector<64xf32> to vector<64x1xf32>
    %c0_160 = arith.constant 0 : index
    %c0_161 = arith.constant 0 : index
    %c0_162 = arith.constant 0 : index
    %252 = vector.load %arg9[%c0_160, %c0_161, %c0_162] : memref<1x64x1xf32, #tpu.memory_space<vmem>>, vector<1x64x1xf32>
    %253 = vector.shape_cast %252 : vector<1x64x1xf32> to vector<64x1xf32>
    %254 = vector.shape_cast %251 : vector<64x1xf32> to vector<1x64x1xf32>
    tpu.vector_store %arg9[%c0_160, %c0_161, %c0_162], %254 {strides = array<i32>} : memref<1x64x1xf32, #tpu.memory_space<vmem>>, vector<1x64x1xf32>,
    return
  }
  func.func @transform_0(%arg0: i32) -> (i32, i32, i32) {
    %c0_i32 = arith.constant 0 : i32
    %c0_i32_0 = arith.constant 0 : i32
    %c0_i32_1 = arith.constant 0 : i32
    return %arg0, %c0_i32, %c0_i32_0 : i32, i32, i32
  }
  func.func @transform_1(%arg0: i32) -> (i32, i32) {
    %c0_i32 = arith.constant 0 : i32
    %c0_i32_0 = arith.constant 0 : i32
    %c0_i32_1 = arith.constant 0 : i32
    return %c0_i32, %c0_i32_0 : i32, i32
  }
  func.func @transform_2(%arg0: i32) -> (i32, i32, i32) {
    %c0_i32 = arith.constant 0 : i32
    %c0_i32_0 = arith.constant 0 : i32
    %c0_i32_1 = arith.constant 0 : i32
    %c0_i32_2 = arith.constant 0 : i32
    return %c0_i32, %c0_i32_0, %c0_i32_1 : i32, i32, i32
  }
  func.func @transform_3(%arg0: i32) -> (i32, i32) {
    %c0_i32 = arith.constant 0 : i32
    %c0_i32_0 = arith.constant 0 : i32
    %c0_i32_1 = arith.constant 0 : i32
    return %c0_i32, %c0_i32_0 : i32, i32
  }
  func.func @transform_4(%arg0: i32) -> (i32, i32, i32) {
    %c0_i32 = arith.constant 0 : i32
    %c0_i32_0 = arith.constant 0 : i32
    %c0_i32_1 = arith.constant 0 : i32
    %c0_i32_2 = arith.constant 0 : i32
    return %c0_i32, %c0_i32_0, %c0_i32_1 : i32, i32, i32
  }
  func.func @transform_5(%arg0: i32) -> (i32, i32) {
    %c0_i32 = arith.constant 0 : i32
    %c0_i32_0 = arith.constant 0 : i32
    %c0_i32_1 = arith.constant 0 : i32
    return %c0_i32, %c0_i32_0 : i32, i32
  }
  func.func @transform_6(%arg0: i32) -> (i32, i32, i32) {
    %c0_i32 = arith.constant 0 : i32
    %c0_i32_0 = arith.constant 0 : i32
    %c0_i32_1 = arith.constant 0 : i32
    %c0_i32_2 = arith.constant 0 : i32
    return %c0_i32, %c0_i32_0, %c0_i32_1 : i32, i32, i32
  }
  func.func @transform_7(%arg0: i32) -> (i32, i32) {
    %c0_i32 = arith.constant 0 : i32
    %c0_i32_0 = arith.constant 0 : i32
    %c0_i32_1 = arith.constant 0 : i32
    return %c0_i32, %c0_i32_0 : i32, i32
  }
  func.func @transform_8(%arg0: i32) -> (i32, i32, i32) {
    %c0_i32 = arith.constant 0 : i32
    %c0_i32_0 = arith.constant 0 : i32
    %c0_i32_1 = arith.constant 0 : i32
    return %arg0, %c0_i32, %c0_i32_0 : i32, i32, i32
  }
}

</mosaic_0001>

<bundles_post_ra>
// kernel: basenet_forward.1
= control target key start
LH: loop header
LB: loop body
LE: loop exit
PB: predicated region body
PF: predicated region fallthrough
CT: control target
= control target key end

     0   :  { %s4048_s27 = smov 0   ;;  %s5957_s0 = inlined_call_operand.vmem [shape: f32[2,4,256], index: 0, kind: input, shape index: {}]   ;;  %s5958_s1 = inlined_call_operand.vmem [shape: s32[2,256], index: 1, kind: input, shape index: {}]   ;;  %s5959_s2 = inlined_call_operand.vmem [shape: f32[9,16,4], index: 2, kind: input, shape index: {}]   ;;  %s5960_s3 = inlined_call_operand.vmem [shape: f32[16,1], index: 3, kind: input, shape index: {}]   ;;  %s5961_s4 = inlined_call_operand.vmem [shape: f32[9,32,16], index: 4, kind: input, shape index: {}]   ;;  %s5962_s5 = inlined_call_operand.vmem [shape: f32[32,1], index: 5, kind: input, shape index: {}]   ;;  %s5963_s6 = inlined_call_operand.vmem [shape: f32[9,64,32], index: 6, kind: input, shape index: {}]   ;;  %s5964_s7 = inlined_call_operand.vmem [shape: f32[64,1], index: 7, kind: input, shape index: {}]   ;;  %s5965_s8 = inlined_call_operand.vmem [shape: f32[2,64,1], index: 8, kind: output, shape index: {}]  }
   0x1 LB: > { %s3478_s28 = sadd.s32 4294967295, %s3996_s27   ;;  %p3482_p0 = scmp.ge.s32.totalorder %s3996_s27, 1  ;;  %s3996_s27 = sphi %s4048_s27, %s18_s27  }
   0x2   : > { %p262_p1 = scmp.lt.s32.totalorder %s3996_s27, 3 }
   0x4   : > { %p263_p2 = pnand %p3482_p0, %p262_p1 }
   0x6   : > { %266 = sbr.rel (%p263_p2) target bundleno = 1860 (0x744), region = 52 }
   0xb   : > { %p296_p3 = scmp.lt.s32.totalorder %s3478_s28, 1  ;;  %s3998_s11 = smov 16   ;;  %v4000_v11 = vmov 0   ;;  %v306_v12 = vld [vmem:[%s5958_s1] ss:$2 sm:$0x3]  ;;  %v324_v13 = vlaneseq }
   0xc   : > { %s3999_s12 = smov 112   ;;  %3987 = vset.pattern.permute.xlu1 %v4000_v11  ;;  %3988 = vset.pattern.permute.xlu2 %v4000_v11  ;;  %vm309_vm0 = vcmp.gt.s32.totalorder %v306_v12, 0  ;;  %v5985_v19 = vmov 0  ;;  %v5988_v20 = vmov 0  ;;  %vm362_vm4 = vcmask 1043456   ;;  %s4001_s15 = smov 127  }
   0xd   : > { %s6041_s28 = smov (!%p296_p3, %s3478_s28), 1  ;;  %3989 = vset.pattern.permute.xlu0 %v4000_v11  ;;  %v329_v15 = vsel %vm309_vm0, 1, %v4000_v11  ;;  %v4077_v16 = vand.u32 127, %v324_v13  ;;  %s4002_s16 = smov 1   ;;  %vm310_vm5 = vcmp.lt.s32.totalorder %v306_v12, 15  ;;  %v5991_v30 = vmov 0 }
   0xe   : > { %s3968_s29 = sshll.u32 %s6041_s28, 3  ;;  %v330_v17 = vperm.slane %v329_v15, 0  ;;  %v331_v18 = vperm.slane %v329_v15, 1  ;;  %v786_v27 = vsel %vm310_vm5, 1, %v4000_v11  ;;  %v5994_v31 = vmov 0  ;;  %v3488_v37 = vld [vmem:[%s5959_s2 + $0x10] sm:$0xff] }
   0xf   : > { %s300_s10 = scalar_lea.vmem %s5957_s0, %s3968_s29  ;;  %5984 = vst [vmem:[#allocation2_spill] sm:$0xff] %v4077_v16  ;;  %vm326_vm1 = vcmp.lt.s32.totalorder %v4077_v16, 16  ;;  %v788_v28 = vperm.slane %v786_v27, 1  ;;  %v787_v29 = vperm.slane %v786_v27, 0  ;;  %vm783_vm6 = vcmp.lt.s32.totalorder %v4077_v16, 112  ;;  %v3489_v38 = vld [vmem:[%s5959_s2 + $0x18] sm:$0xff] }
  0x10   : > { %v313_v0 = vld [vmem:[%s300_s10] sm:$0xff]  ;;  %vm4080_vm2 = vcmp.eq.s32.totalorder %v330_v17, 1  ;;  %vm4084_vm3 = vcmp.eq.s32.totalorder %v331_v18, 1  ;;  %vm355_vm9 = vcmask 31744   ;;  %vm340_vm11 = vcmp.lt.s32.totalorder %v4077_v16, 1  ;;  %v351_v52 = vld [vmem:[%s5959_s2 + $0x8] sm:$0xff] }
  0x11   : > { %315 = vst [vmem:[#allocation1] ss:$2 sm:$0xff] %v313_v0  ;;  %v5986_v19 = vsel %vm4080_vm2, 4294967295, %v5985_v19  ;;  %v5989_v20 = vsel %vm4084_vm3, 4294967295, %v5988_v20  ;;  %vm4108_vm7 = vcmp.eq.s32.totalorder %v788_v28, 1  ;;  %vm4112_vm8 = vcmp.eq.s32.totalorder %v787_v29, 1 }
  0x12   : > { %5987 = vst [vmem:[#allocation3_spill] sm:$0xff] %v5986_v19  ;;  %v5992_v30 = vsel %vm4108_vm7, 4294967295, %v5991_v30  ;;  %v5995_v31 = vsel %vm4112_vm8, 4294967295, %v5994_v31  ;;  %v3487_v39 = vld [vmem:[%s5958_s1 + $0x1] ss:$2 sm:$0x3] }
  0x13   : > { %5990 = vst [vmem:[#allocation4_spill] sm:$0xff] %v5989_v20  ;;  %vm311_vm10 = vcmp.gt.s32.totalorder %v3487_v39, 0  ;;  %v5997_v44 = vmov 0  ;;  %v6000_v45 = vmov 0  ;;  %v350_v49 = vld [vmem:[%s5959_s2] sm:$0xff]  ;;  %vm312_vm14 = vcmp.lt.s32.totalorder %v3487_v39, 15 }
  0x14   : > { %5993 = vst [vmem:[#allocation5_spill] sm:$0xff] %v5992_v30  ;;  %v343_v40 = vsel %vm311_vm10, 1, %v4000_v11  ;;  %v480_v53 = vsel %vm312_vm14, 1, %v4000_v11  ;;  %vm477_vm15 = vcmp.lt.s32.totalorder %v4077_v16, 127  ;;  %v6003_v58 = vmov 0  ;;  %v3502_v63 = vld [vmem:[%s5959_s2 + $0x20] sm:$0xff] }
  0x15   : > { %5996 = vst [vmem:[#allocation6_spill] sm:$0xff] %v5995_v31  ;;  %v344_v42 = vperm.slane %v343_v40, 0  ;;  %v345_v43 = vperm.slane %v343_v40, 1  ;;  %v481_v54 = vperm.slane %v480_v53, 0  ;;  %v482_v55 = vperm.slane %v480_v53, 1  ;;  %v3503_v12 = vld [vmem:[%s5959_s2 + $0x28] sm:$0xff] }
  0x16   : > { %v6006_v59 = vmov 0  ;;  %v3511_v15 = vld [vmem:[%s5959_s2 + $0x38] sm:$0xff]  ;;  %v3518_v17 = vld [vmem:[%s5959_s2 + $0x40] sm:$0xff]  ;;  %v3526_v18 = vld [vmem:[%s5959_s2 + $0x50] sm:$0xff]  ;;  %s3969_s13 = sshll.u32 %s6041_s28, 6 }
  0x17   : > { %vm4151_vm12 = vcmp.eq.s32.totalorder %v344_v42, 1  ;;  %vm4155_vm13 = vcmp.eq.s32.totalorder %v345_v43, 1  ;;  %vm4181_vm0 = vcmp.eq.s32.totalorder %v481_v54, 1  ;;  %vm4185_vm5 = vcmp.eq.s32.totalorder %v482_v55, 1  ;;  %v3527_v28 = vld [vmem:[%s5959_s2 + $0x58] sm:$0xff]  ;;  %v3550_v43 = vld [vmem:[%s5959_s2 + $0x80] sm:$0xff]  ;;  %s305_s18 = scalar_lea.vmem %s5965_s8, %s3969_s13 }
  0x18   : > { %v316_v1 = vld.sshfl [vmem:[#allocation1] sm:$0xff pattern:$0x75316420]  ;;  %v317_v2 = vld.sshfl [vmem:[#allocation1 + $0x8] sm:$0xff pattern:$0x75316420] }
  0x19   : > { %320 = vrot.lane.b32.xlu0 %v316_v1, %s3998_s11  ;;  %552 = vst [vmem:[#allocation1] ss:$2 sm:$0xff] %v313_v0  ;;  %v5998_v44 = vsel %vm4151_vm12, 4294967295, %v5997_v44  ;;  %v6001_v45 = vsel %vm4155_vm13, 4294967295, %v6000_v45  ;;  %v6004_v58 = vsel %vm4181_vm0, 4294967295, %v6003_v58  ;;  %v6007_v59 = vsel %vm4185_vm5, 4294967295, %v6006_v59 }
  0x1a   : > { %5999 = vst [vmem:[#allocation7_spill] sm:$0xff] %v5998_v44  ;;  %v3543_v42 = vld [vmem:[%s5959_s2 + $0x78] sm:$0xff] }
  0x1b   : > { %6002 = vst [vmem:[#allocation8_spill] sm:$0xff] %v6001_v45 }
  0x1c   : > { %6005 = vst [vmem:[#allocation9_spill] sm:$0xff] %v6004_v58 }
  0x1d   : > { %6008 = vst [vmem:[#allocation10_spill] sm:$0xff] %v6007_v59 }
  0x20   : > { %v553_v3 = vld.sshfl [vmem:[#allocation1] sm:$0xff pattern:$0x75316420]  ;;  %v554_v4 = vld.sshfl [vmem:[#allocation1 + $0x8] sm:$0xff pattern:$0x75316420] }
  0x21   : > { %322 = vrot.lane.b32.xlu0 %v317_v2, %s3998_s11  ;;  %633 = vst [vmem:[#allocation1] ss:$2 sm:$0xff] %v313_v0 }
  0x28   : > { %v4064_v5 = vld.sshfl [vmem:[#allocation1] sm:$0xff pattern:$0x75316420]  ;;  %v4066_v6 = vld.sshfl [vmem:[#allocation1 + $0x8] sm:$0xff pattern:$0x75316420] }
  0x29   : > { %696 = vst [vmem:[#allocation1] ss:$2 sm:$0xff] %v313_v0 }
  0x30   : > { %v697_v7 = vld.sshfl [vmem:[#allocation1] sm:$0xff pattern:$0x75316420]  ;;  %v698_v8 = vld.sshfl [vmem:[#allocation1 + $0x8] sm:$0xff pattern:$0x75316420] }
  0x31   : > { %774 = vst [vmem:[#allocation1] ss:$2 sm:$0xff] %v313_v0 }
  0x38   : > { %v775_v9 = vld.sshfl [vmem:[#allocation1] sm:$0xff pattern:$0x75316420]  ;;  %v776_v10 = vld.sshfl [vmem:[#allocation1 + $0x8] sm:$0xff pattern:$0x75316420] }
  0x39   : > { %779 = vrot.lane.b32.xlu1 %v775_v9, %s3999_s12 }
  0x41   : > { %781 = vrot.lane.b32.xlu1 %v776_v10, %s3999_s12 }
  0x8b   : > { %v321_v14 = vpop.permute.xlu0 %320 }
  0x93   : > { %v323_v21 = vpop.permute.xlu0 %322 }
  0x94   : > { %v327_v22 = vsel %vm326_vm1, %v321_v14, %v323_v21  ;;  %v328_v23 = vsel %vm326_vm1, %v323_v21, %v321_v14  ;;  %v3519_v21 = vld [vmem:[%s5959_s2 + $0x48] sm:$0xff] }
  0x95   : > { %v334_v24 = vsel %vm4080_vm2, %v328_v23, 0.0  ;;  %v335_v25 = vsel %vm4084_vm3, %v327_v22, 0.0  ;;  %v1005_v22 = vld [vmem:[%s5960_s3 + $0x8] sm:$0xff]  ;;  %v1004_v23 = vld [vmem:[%s5960_s3] sm:$0xff] }
  0x96   : > { %473 = vrot.lane.b32.xlu0 %v334_v24, %s4001_s15  ;;  %336 = vrot.lane.b32.xlu2 %v334_v24, %s4002_s16 }
  0x97   : > { %3490 = vmatpush.msk.msra.mxu0 %vm362_vm4, %v334_v24  ;;  %3493 = vmatpush.msk.msra.mxu1 %vm362_vm4, %v335_v25 }
  0x98   : > { %475 = vrot.lane.b32.xlu1 %v335_v25, %s4001_s15  ;;  %3491 = vmatmul.msk.f32.vlgmr.msra.gmra.mxu0 %vm355_vm9, %v3488_v37 }
  0x99   : > { %3494 = vmatmul.msk.f32.vlgmr.msra.gmra.mxu1 %vm355_vm9, %v3488_v37 }
  0x9e   : > { %338 = vrot.lane.b32.xlu2 %v335_v25, %s4002_s16  ;;  %559 = vrot.lane.b32.xlu0 %v554_v4, %s4002_s16 }
  0xa0   : > { %701 = vrot.lane.b32.xlu1 %v697_v7, %s4001_s15  ;;  %3492 = vmatmul.msk.f32.gmra.mxu0 %vm355_vm9, %v3489_v38  ;;  %v3510_v7 = vld [vmem:[%s5959_s2 + $0x30] sm:$0xff] }
  0xa1   : > { %3495 = vmatmul.msk.f32.gmra.mxu1 %vm355_vm9, %v3489_v38  ;;  %v3542_v38 = vld [vmem:[%s5959_s2 + $0x70] sm:$0xff] }
  0xa6   : > { %557 = vrot.lane.b32.xlu2 %v553_v3, %s4002_s16 }
  0xab   : > { %v780_v26 = vpop.permute.xlu1 %779 }
  0xae   : > { %703 = vrot.lane.b32.xlu2 %v698_v8, %s4001_s15 }
  0xb3   : > { %v782_v32 = vpop.permute.xlu1 %781 }
  0xb4   : > { %v784_v33 = vsel %vm783_vm6, %v780_v26, %v782_v32  ;;  %v785_v34 = vsel %vm783_vm6, %v782_v32, %v780_v26 }
  0xb5   : > { %v4122_v35 = vsel %vm4108_vm7, %v785_v34, 0.0  ;;  %v4126_v36 = vsel %vm4112_vm8, %v784_v33, 0.0  ;;  %v3534_v33 = vld [vmem:[%s5959_s2 + $0x60] sm:$0xff] }
  0xb6   : > { %795 = vrot.lane.b32.xlu1 %v4122_v35, %s4002_s16  ;;  %931 = vrot.lane.b32.xlu2 %v4126_v36, %s4001_s15 }
  0xb7   : > { %793 = vrot.lane.b32.xlu0 %v4126_v36, %s4002_s16 }
  0xbe   : > { %1013 = vperm.xlu1 %3987, %v1005_v22   ;;  %1008 = vperm.xlu2 %3988, %v1004_v23  }
  0xbf   : > { %933 = vrot.lane.b32.xlu0 %v4122_v35, %s4001_s15 }
  0xf0   : > { %v337_v41 = vpop.permute.xlu2 %336 }
  0xf8   : > { %v339_v46 = vpop.permute.xlu2 %338 }
  0xf9   : > { %v342_v47 = vsel %vm340_vm11, %v339_v46, %v337_v41  ;;  %v341_v48 = vsel %vm340_vm11, %v337_v41, %v339_v46  ;;  %v3535_v41 = vld [vmem:[%s5959_s2 + $0x68] sm:$0xff] }
  0xfa   : > { %v348_v50 = vsel %vm4151_vm12, %v342_v47, 0.0  ;;  %v349_v51 = vsel %vm4155_vm13, %v341_v48, 0.0  ;;  %v3551_v46 = vld [vmem:[%s5959_s2 + $0x88] sm:$0xff] }
  0xfb   : > { %3496 = vmatpush.msk.msra.mxu2 %vm362_vm4, %v348_v50  ;;  %3499 = vmatpush.msk.msra.mxu3 %vm362_vm4, %v349_v51 }
  0xfc   : > { %3497 = vmatmul.msk.f32.vlgmr.msra.gmra.mxu2 %vm355_vm9, %v350_v49  ;;  %3500 = vmatmul.msk.f32.vlgmr.msra.gmra.mxu3 %vm355_vm9, %v350_v49 }
 0x100   : > { %v558_v56 = vpop.permute.xlu2 %557 }
 0x104   : > { %3498 = vmatmul.msk.f32.gmra.mxu2 %vm355_vm9, %v351_v52  ;;  %3501 = vmatmul.msk.f32.gmra.mxu3 %vm355_vm9, %v351_v52 }
 0x108   : > { %v474_v57 = vpop.permute.xlu0 %473  ;;  %v704_v8 = vpop.permute.xlu2 %703 }
 0x10a   : > { %v476_v60 = vpop.permute.xlu1 %475 }
 0x10b   : > { %v478_v61 = vsel %vm477_vm15, %v474_v57, %v476_v60  ;;  %v479_v62 = vsel %vm477_vm15, %v476_v60, %v474_v57 }
 0x10c   : > { %v485_v0 = vsel %vm4181_vm0, %v478_v61, 0.0  ;;  %v486_v1 = vsel %vm4185_vm5, %v479_v62, 0.0 }
 0x10d   : > { %3504 = vmatpush.msk.msrb.mxu0 %vm362_vm4, %v485_v0  ;;  %3507 = vmatpush.msk.msrb.mxu1 %vm362_vm4, %v486_v1 }
 0x10e   : > { %3505 = vmatmul.msk.f32.vlgmr.msrb.gmra.mxu0 %vm355_vm9, %v3502_v63  ;;  %3508 = vmatmul.msk.f32.vlgmr.msrb.gmra.mxu1 %vm355_vm9, %v3502_v63 }
 0x10f   : > { %3520 = vmatpush.msk.msra.mxu0 %vm362_vm4, %v4064_v5  ;;  %3523 = vmatpush.msk.msra.mxu1 %vm362_vm4, %v4066_v6 }
 0x110   : > { %v560_v2 = vpop.permute.xlu0 %559  ;;  %v932_v34 = vpop.permute.xlu2 %931 }
 0x111   : > { %v561_v3 = vsel %vm340_vm11, %v558_v56, %v560_v2  ;;  %v562_v4 = vsel %vm340_vm11, %v560_v2, %v558_v56 }
 0x112   : > { %v702_v9 = vpop.permute.xlu1 %701  ;;  %v563_v10 = vsel %vm4151_vm12, %v562_v4, 0.0  ;;  %v564_v5 = vsel %vm4155_vm13, %v561_v3, 0.0 }
 0x113   : > { %v705_v6 = vsel %vm477_vm15, %v702_v9, %v704_v8  ;;  %v706_v11 = vsel %vm477_vm15, %v704_v8, %v702_v9  ;;  %3512 = vmatpush.msk.msrb.mxu2 %vm362_vm4, %v563_v10  ;;  %3515 = vmatpush.msk.msrb.mxu3 %vm362_vm4, %v564_v5 }
 0x114   : > { %v707_v13 = vsel %vm4181_vm0, %v705_v6, 0.0  ;;  %v708_v14 = vsel %vm4185_vm5, %v706_v11, 0.0  ;;  %3513 = vmatmul.msk.f32.vlgmr.msrb.gmra.mxu2 %vm355_vm9, %v3510_v7  ;;  %3516 = vmatmul.msk.f32.vlgmr.msrb.gmra.mxu3 %vm355_vm9, %v3510_v7 }
 0x115   : > { %3528 = vmatpush.msk.msra.mxu2 %vm362_vm4, %v707_v13  ;;  %3531 = vmatpush.msk.msra.mxu3 %vm362_vm4, %v708_v14  ;;  %v386_v47 = vpop.f32.mrf.mxu0 }
 0x116   : > { %3506 = vmatmul.msk.f32.gmra.mxu0 %vm355_vm9, %v3503_v12  ;;  %3509 = vmatmul.msk.f32.gmra.mxu1 %vm355_vm9, %v3503_v12  ;;  %v409_v48 = vpop.f32.mrf.mxu1 }
 0x117   : > { %3544 = vmatpush.msk.msrb.mxu2 %vm362_vm4, %v4126_v36  ;;  %3547 = vmatpush.msk.msrb.mxu3 %vm362_vm4, %v4122_v35 }
 0x11c   : > { %3514 = vmatmul.msk.f32.gmra.mxu2 %vm355_vm9, %v3511_v15  ;;  %3517 = vmatmul.msk.f32.gmra.mxu3 %vm355_vm9, %v3511_v15 }
 0x11d   : > { %v389_v49 = vpop.f32.mrf.mxu0 }
 0x11e   : > { %3521 = vmatmul.msk.f32.vlgmr.msra.gmra.mxu0 %vm355_vm9, %v3518_v17  ;;  %3524 = vmatmul.msk.f32.vlgmr.msra.gmra.mxu1 %vm355_vm9, %v3518_v17  ;;  %v412_v50 = vpop.f32.mrf.mxu1 }
 0x124   : > { %3529 = vmatmul.msk.f32.vlgmr.msra.gmra.mxu2 %vm355_vm9, %v3526_v18  ;;  %3532 = vmatmul.msk.f32.vlgmr.msra.gmra.mxu3 %vm355_vm9, %v3526_v18 }
 0x126   : > { %3522 = vmatmul.msk.f32.gmra.mxu0 %vm355_vm9, %v3519_v21  ;;  %3525 = vmatmul.msk.f32.gmra.mxu1 %vm355_vm9, %v3519_v21 }
 0x128   : > { %v796_v24 = vpop.permute.xlu1 %795 }
 0x129   : > { %v794_v25 = vpop.permute.xlu0 %793 }
 0x12a   : > { %v797_v26 = vsel %vm340_vm11, %v794_v25, %v796_v24  ;;  %v798_v27 = vsel %vm340_vm11, %v796_v24, %v794_v25 }
 0x12b   : > { %v799_v29 = vsel %vm4151_vm12, %v798_v27, 0.0  ;;  %v800_v32 = vsel %vm4155_vm13, %v797_v26, 0.0 }
 0x12c   : > { %3536 = vmatpush.msk.msrb.mxu0 %vm362_vm4, %v799_v29  ;;  %3539 = vmatpush.msk.msrb.mxu1 %vm362_vm4, %v800_v32 }
 0x12d   : > { %3530 = vmatmul.msk.f32.gmra.mxu2 %vm355_vm9, %v3527_v28  ;;  %3533 = vmatmul.msk.f32.gmra.mxu3 %vm355_vm9, %v3527_v28 }
 0x12e   : > { %3537 = vmatmul.msk.f32.vlgmr.msrb.gmra.mxu0 %vm355_vm9, %v3534_v33  ;;  %3540 = vmatmul.msk.f32.vlgmr.msrb.gmra.mxu1 %vm355_vm9, %v3534_v33 }
 0x131   : > { %v934_v35 = vpop.permute.xlu0 %933 }
 0x132   : > { %v935_v36 = vsel %vm477_vm15, %v932_v34, %v934_v35  ;;  %v936_v37 = vsel %vm477_vm15, %v934_v35, %v932_v34 }
 0x133   : > { %v937_v39 = vsel %vm4181_vm0, %v935_v36, 0.0  ;;  %v938_v40 = vsel %vm4185_vm5, %v936_v37, 0.0 }
 0x134   : > { %3552 = vmatpush.msk.msra.mxu0 %vm362_vm4, %v937_v39  ;;  %3555 = vmatpush.msk.msra.mxu1 %vm362_vm4, %v938_v40  ;;  %vm1065_vm4 = vcmask 130048  }
 0x135   : > { %3545 = vmatmul.msk.f32.vlgmr.msrb.gmra.mxu2 %vm355_vm9, %v3542_v38  ;;  %3548 = vmatmul.msk.f32.vlgmr.msrb.gmra.mxu3 %vm355_vm9, %v3542_v38  ;;  %v1009_v38 = vpop.permute.xlu2 %1008 }
 0x136   : > { %3538 = vmatmul.msk.f32.gmra.mxu0 %vm355_vm9, %v3535_v41  ;;  %3541 = vmatmul.msk.f32.gmra.mxu1 %vm355_vm9, %v3535_v41 }
 0x13d   : > { %3546 = vmatmul.msk.f32.gmra.mxu2 %vm355_vm9, %v3543_v42  ;;  %3549 = vmatmul.msk.f32.gmra.mxu3 %vm355_vm9, %v3543_v42 }
 0x13e   : > { %3553 = vmatmul.msk.f32.vlgmr.msra.gmra.mxu0 %vm355_vm9, %v3550_v43  ;;  %3556 = vmatmul.msk.f32.vlgmr.msra.gmra.mxu1 %vm355_vm9, %v3550_v43 }
 0x146   : > { %3554 = vmatmul.msk.f32.gmra.mxu0 %vm355_vm9, %v3551_v46  ;;  %3557 = vmatmul.msk.f32.gmra.mxu1 %vm355_vm9, %v3551_v46 }
 0x17f   : > { %v444_v51 = vpop.f32.mrf.mxu2  ;;  %v467_v52 = vpop.f32.mrf.mxu3 }
 0x180   : > { %v445_v9 = vadd.f32 %v444_v51, %v386_v47  ;;  %v468_v25 = vadd.f32 %v467_v52, %v409_v48 }
 0x187   : > { %v447_v55 = vpop.f32.mrf.mxu2  ;;  %v470_v56 = vpop.f32.mrf.mxu3 }
 0x188   : > { %v448_v14 = vadd.f32 %v447_v55, %v389_v49  ;;  %v471_v15 = vadd.f32 %v470_v56, %v412_v50 }
 0x18b   : > { %v519_v53 = vpop.f32.mrf.mxu0  ;;  %v542_v54 = vpop.f32.mrf.mxu1 }
 0x18c   : > { %v548_v10 = vadd.f32 %v519_v53, %v445_v9  ;;  %v549_v28 = vadd.f32 %v542_v54, %v468_v25  ;;  %v3560_v25 = vld [vmem:[%s5961_s4 + $0x30] sm:$0xff] }
 0x193   : > { %v522_v57 = vpop.f32.mrf.mxu0  ;;  %v545_v60 = vpop.f32.mrf.mxu1 }
 0x194   : > { %v550_v18 = vadd.f32 %v522_v57, %v448_v14  ;;  %v551_v21 = vadd.f32 %v545_v60, %v471_v15  ;;  %v1014_v57 = vpop.permute.xlu1 %1013 }
 0x197   : > { %v597_v61 = vpop.f32.mrf.mxu2  ;;  %v620_v62 = vpop.f32.mrf.mxu3 }
 0x198   : > { %v626_v11 = vadd.f32 %v597_v61, %v548_v10  ;;  %v627_v32 = vadd.f32 %v620_v62, %v549_v28 }
 0x19b   : > { %v663_v63 = vpop.f32.mrf.mxu0  ;;  %v686_v0 = vpop.f32.mrf.mxu1 }
 0x19c   : > { %v692_v17 = vadd.f32 %v663_v63, %v626_v11  ;;  %v693_v43 = vadd.f32 %v686_v0, %v627_v32 }
 0x19f   : > { %v600_v1 = vpop.f32.mrf.mxu2  ;;  %v623_v2 = vpop.f32.mrf.mxu3 }
 0x1a0   : > { %v628_v26 = vadd.f32 %v600_v1, %v550_v18  ;;  %v629_v27 = vadd.f32 %v623_v2, %v551_v21 }
 0x1a3   : > { %v666_v3 = vpop.f32.mrf.mxu0  ;;  %v689_v4 = vpop.f32.mrf.mxu1 }
 0x1a4   : > { %v694_v35 = vadd.f32 %v666_v3, %v628_v26  ;;  %v695_v36 = vadd.f32 %v689_v4, %v629_v27  ;;  %v3561_v26 = vld [vmem:[%s5961_s4 + $0x38] sm:$0xff] }
 0x1a7   : > { %v741_v7 = vpop.f32.mrf.mxu2  ;;  %v764_v8 = vpop.f32.mrf.mxu3 }
 0x1a8   : > { %v770_v22 = vadd.f32 %v741_v7, %v692_v17  ;;  %v771_v47 = vadd.f32 %v764_v8, %v693_v43 }
 0x1ab   : > { %v833_v5 = vpop.f32.mrf.mxu0  ;;  %v856_v6 = vpop.f32.mrf.mxu1 }
 0x1ac   : > { %v862_v29 = vadd.f32 %v833_v5, %v770_v22  ;;  %v863_v56 = vadd.f32 %v856_v6, %v771_v47  ;;  %v1058_v47 = vld [vmem:[%s5961_s4 + $0x10] sm:$0xff] }
 0x1b0   : > { %v744_v12 = vpop.f32.mrf.mxu2  ;;  %v767_v13 = vpop.f32.mrf.mxu3 }
 0x1b1   : > { %v772_v39 = vadd.f32 %v744_v12, %v694_v35  ;;  %v773_v40 = vadd.f32 %v767_v13, %v695_v36 }
 0x1b3   : > { %v836_v23 = vpop.f32.mrf.mxu0  ;;  %v859_v24 = vpop.f32.mrf.mxu1 }
 0x1b4   : > { %v864_v48 = vadd.f32 %v836_v23, %v772_v39  ;;  %v865_v50 = vadd.f32 %v859_v24, %v773_v40  ;;  %v3558_v23 = vld [vmem:[%s5961_s4 + $0x20] sm:$0xff]  ;;  %v3559_v24 = vld [vmem:[%s5961_s4 + $0x28] sm:$0xff] }
 0x1b5   : > { %v1056_v39 = vld [vmem:[%s5961_s4] sm:$0xff] }
 0x1b8   : > { %v898_v33 = vpop.f32.mrf.mxu2  ;;  %v921_v34 = vpop.f32.mrf.mxu3 }
 0x1b9   : > { %v927_v37 = vadd.f32 %v898_v33, %v862_v29  ;;  %v928_v62 = vadd.f32 %v921_v34, %v863_v56 }
 0x1bb   : > { %v971_v41 = vpop.f32.mrf.mxu0  ;;  %v994_v42 = vpop.f32.mrf.mxu1 }
 0x1bc   : > { %v1000_v46 = vadd.f32 %v971_v41, %v927_v37  ;;  %v1001_v3 = vadd.f32 %v994_v42, %v928_v62 }
 0x1be   : > { %v1016_v49 = vadd.f32 %v1009_v38, %v1000_v46  ;;  %v1017_v8 = vadd.f32 %v1009_v38, %v1001_v3  ;;  %v1057_v38 = vld [vmem:[%s5961_s4 + $0x8] sm:$0xff] }
 0x1c0   : > { %v4323_v51 = vmax.f32 %v1016_v49, 0.0  ;;  %v901_v52 = vpop.f32.mrf.mxu2  ;;  %v924_v53 = vpop.f32.mrf.mxu3  ;;  %v4335_v9 = vmax.f32 %v1017_v8, 0.0 }
 0x1c1   : > { %v929_v54 = vadd.f32 %v901_v52, %v864_v48  ;;  %v930_v55 = vadd.f32 %v924_v53, %v865_v50 }
 0x1c2   : > { %1024 = vrot.lane.b32.xlu2 %v4323_v51, %s3998_s11 }
 0x1c3   : > { %v974_v60 = vpop.f32.mrf.mxu0  ;;  %v997_v61 = vpop.f32.mrf.mxu1 }
 0x1c4   : > { %v1002_v63 = vadd.f32 %v974_v60, %v929_v54  ;;  %v1003_v0 = vadd.f32 %v997_v61, %v930_v55  ;;  %v1059_v55 = vld [vmem:[%s5961_s4 + $0x18] sm:$0xff] }
 0x1c6   : > { %v1018_v1 = vadd.f32 %v1014_v57, %v1002_v63  ;;  %v1019_v2 = vadd.f32 %v1014_v57, %v1003_v0 }
 0x1c8   : > { %v4327_v4 = vmax.f32 %v1018_v1, 0.0  ;;  %v4329_v7 = vmax.f32 %v1019_v2, 0.0 }
 0x1ca   : > { %1030 = vrot.lane.b32.xlu1 %v4329_v7, %s3998_s11  ;;  %1026 = vrot.lane.b32.xlu0 %v4327_v4, %s3998_s11 }
 0x1d2   : > { %1028 = vrot.lane.b32.xlu0 %v4335_v9, %s3998_s11 }
 0x21c   : > { %v1025_v14 = vpop.permute.xlu2 %1024 }
 0x23c   : > { %v1031_v10 = vpop.permute.xlu1 %1030  ;;  %v1027_v5 = vpop.permute.xlu0 %1026 }
 0x23d   : > { %v1033_v6 = vsel %vm326_vm1, %v1027_v5, %v1031_v10  ;;  %v1035_v11 = vsel %vm326_vm1, %v1031_v10, %v1027_v5 }
 0x23e   : > { %3562 = vmatpush.msk.msra.mxu2 %vm4080_vm2, %v1035_v11  ;;  %3568 = vmatpush.msk.msra.mxu3 %vm4084_vm3, %v1033_v6  ;;  %v1038_v12 = vsel %vm4080_vm2, %v1035_v11, 0.0  ;;  %v1039_v13 = vsel %vm4084_vm3, %v1033_v6, 0.0 }
 0x23f   : > { %1042 = vrot.lane.b32.xlu1 %v1038_v12, %s4002_s16  ;;  %1046 = vrot.lane.b32.xlu2 %v1039_v13, %s4002_s16 }
 0x244   : > { %v1029_v15 = vpop.permute.xlu0 %1028 }
 0x245   : > { %v1032_v17 = vsel %vm326_vm1, %v1025_v14, %v1029_v15  ;;  %v1034_v18 = vsel %vm326_vm1, %v1029_v15, %v1025_v14  ;;  %v3588_v14 = vld [vmem:[%s5961_s4 + $0x50] sm:$0xff]  ;;  %v3589_v15 = vld [vmem:[%s5961_s4 + $0x58] sm:$0xff] }
 0x246   : > { %3563 = vmatpush.msk.msra.mxu2 %vm4080_vm2, %v1034_v18  ;;  %3569 = vmatpush.msk.msra.mxu3 %vm4084_vm3, %v1032_v17  ;;  %v1036_v21 = vsel %vm4080_vm2, %v1034_v18, 0.0  ;;  %v1037_v22 = vsel %vm4084_vm3, %v1032_v17, 0.0  ;;  %v3604_v17 = vld [vmem:[%s5961_s4 + $0x70] sm:$0xff]  ;;  %v1886_v18 = vld [vmem:[%s5962_s5 + $0x18] sm:$0xff] }
 0x247   : > { %1208 = vrot.lane.b32.xlu2 %v1038_v12, %s4001_s15  ;;  %1040 = vrot.lane.b32.xlu0 %v1036_v21, %s4002_s16  ;;  %v3587_v12 = vld [vmem:[%s5961_s4 + $0x48] sm:$0xff] }
 0x248   : > { %1044 = vrot.lane.b32.xlu1 %v1037_v22, %s4002_s16  ;;  %3564 = vmatmul.msk.f32.vlgmr.msra.gmra.mxu2 %vm1065_vm4, %v3558_v23 }
 0x249   : > { %3570 = vmatmul.msk.f32.vlgmr.msra.gmra.mxu3 %vm1065_vm4, %v3558_v23  ;;  %v1883_v23 = vld [vmem:[%s5962_s5] sm:$0xff] }
 0x24f   : > { %1212 = vrot.lane.b32.xlu0 %v1039_v13, %s4001_s15  ;;  %1210 = vrot.lane.b32.xlu2 %v1037_v22, %s4001_s15  ;;  %v3602_v13 = vld [vmem:[%s5961_s4 + $0x60] sm:$0xff]  ;;  %v3605_v22 = vld [vmem:[%s5961_s4 + $0x78] sm:$0xff] }
 0x250   : > { %1206 = vrot.lane.b32.xlu1 %v1036_v21, %s4001_s15  ;;  %3565 = vmatmul.msk.f32.gmra.mxu2 %vm1065_vm4, %v3559_v24  ;;  %v3618_v21 = vld [vmem:[%s5961_s4 + $0x80] sm:$0xff] }
 0x251   : > { %3571 = vmatmul.msk.f32.gmra.mxu3 %vm1065_vm4, %v3559_v24  ;;  %v3619_v24 = vld [vmem:[%s5961_s4 + $0x88] sm:$0xff] }
 0x257   : > { %1588 = vrot.lane.b32.xlu0 %v4327_v4, %s3999_s12  ;;  %1586 = vrot.lane.b32.xlu2 %v4323_v51, %s3999_s12 }
 0x258   : > { %1592 = vrot.lane.b32.xlu1 %v4329_v7, %s3999_s12  ;;  %3566 = vmatmul.msk.f32.gmra.mxu2 %vm1065_vm4, %v3560_v25 }
 0x259   : > { %3572 = vmatmul.msk.f32.gmra.mxu3 %vm1065_vm4, %v3560_v25  ;;  %v3620_v25 = vld [vmem:[%s5961_s4 + $0x90] sm:$0xff] }
 0x25f   : > { %1590 = vrot.lane.b32.xlu0 %v4335_v9, %s3999_s12  ;;  %1311 = vrot.lane.b32.xlu2 %v4329_v7, %s4002_s16 }
 0x260   : > { %1307 = vrot.lane.b32.xlu1 %v4327_v4, %s4002_s16  ;;  %3567 = vmatmul.msk.f32.gmra.mxu2 %vm1065_vm4, %v3561_v26 }
 0x261   : > { %3573 = vmatmul.msk.f32.gmra.mxu3 %vm1065_vm4, %v3561_v26  ;;  %v3621_v26 = vld [vmem:[%s5961_s4 + $0x98] sm:$0xff] }
 0x267   : > { %1305 = vrot.lane.b32.xlu0 %v4323_v51, %s4002_s16 }
 0x268   : > { %1309 = vrot.lane.b32.xlu1 %v4335_v9, %s4002_s16 }
 0x26f   : > { %1489 = vrot.lane.b32.xlu0 %v4327_v4, %s4001_s15 }
 0x299   : > { %v1047_v27 = vpop.permute.xlu2 %1046 }
 0x2a1   : > { %v1209_v33 = vpop.permute.xlu2 %1208 }
 0x2a9   : > { %v1211_v40 = vpop.permute.xlu2 %1210 }
 0x2b1   : > { %v1043_v28 = vpop.permute.xlu1 %1042  ;;  %v1587_v50 = vpop.permute.xlu2 %1586 }
 0x2b2   : > { %v1049_v29 = vsel %vm340_vm11, %v1043_v28, %v1047_v27  ;;  %v1051_v32 = vsel %vm340_vm11, %v1047_v27, %v1043_v28 }
 0x2b3   : > { %3574 = vmatpush.msk.msrb.mxu0 %vm4151_vm12, %v1051_v32  ;;  %3970 = vmatpush.msk.msrb.mxu2 %vm4151_vm12, %v1051_v32 }
 0x2b4   : > { %3580 = vmatpush.msk.msrb.mxu1 %vm4155_vm13, %v1049_v29  ;;  %3972 = vmatpush.msk.msrb.mxu3 %vm4155_vm13, %v1049_v29 }
 0x2b9   : > { %v1041_v34 = vpop.permute.xlu0 %1040  ;;  %v1312_v60 = vpop.permute.xlu2 %1311 }
 0x2ba   : > { %v1045_v35 = vpop.permute.xlu1 %1044 }
 0x2bb   : > { %v1048_v36 = vsel %vm340_vm11, %v1041_v34, %v1045_v35  ;;  %v1050_v37 = vsel %vm340_vm11, %v1045_v35, %v1041_v34 }
 0x2bc   : > { %3575 = vmatpush.msk.msrb.mxu0 %vm4151_vm12, %v1050_v37  ;;  %3971 = vmatpush.msk.msrb.mxu2 %vm4151_vm12, %v1050_v37 }
 0x2bd   : > { %3581 = vmatpush.msk.msrb.mxu1 %vm4155_vm13, %v1048_v36  ;;  %3973 = vmatpush.msk.msrb.mxu3 %vm4155_vm13, %v1048_v36 }
 0x2be   : > { %3577 = vmatmul.msk.f32.vlgmr.msrb.gmra.mxu2 %vm1065_vm4, %v1057_v38  ;;  %3583 = vmatmul.msk.f32.vlgmr.msrb.gmra.mxu3 %vm1065_vm4, %v1057_v38 }
 0x2bf   : > { %3576 = vmatmul.msk.f32.vlgmr.msrb.gmra.mxu0 %vm1065_vm4, %v1056_v39  ;;  %3582 = vmatmul.msk.f32.vlgmr.msrb.gmra.mxu1 %vm1065_vm4, %v1056_v39 }
 0x2c1   : > { %v1213_v41 = vpop.permute.xlu0 %1212 }
 0x2c2   : > { %v1215_v42 = vsel %vm477_vm15, %v1209_v33, %v1213_v41  ;;  %v1217_v43 = vsel %vm477_vm15, %v1213_v41, %v1209_v33  ;;  %v1207_v46 = vpop.permute.xlu1 %1206 }
 0x2c3   : > { %3590 = vmatpush.msk.msra.mxu2 %vm4181_vm0, %v1215_v42  ;;  %3596 = vmatpush.msk.msra.mxu3 %vm4185_vm5, %v1217_v43  ;;  %v1214_v49 = vsel %vm477_vm15, %v1207_v46, %v1211_v40  ;;  %v1216_v48 = vsel %vm477_vm15, %v1211_v40, %v1207_v46  ;;  %v3646_v40 = vld [vmem:[%s5961_s4 + $0xc0] sm:$0xff] }
 0x2c5   : > { %3591 = vmatpush.msk.msra.mxu2 %vm4181_vm0, %v1214_v49  ;;  %3597 = vmatpush.msk.msra.mxu3 %vm4185_vm5, %v1216_v48 }
 0x2c6   : > { %3578 = vmatmul.msk.f32.gmra.mxu2 %vm1065_vm4, %v1058_v47  ;;  %3584 = vmatmul.msk.f32.gmra.mxu3 %vm1065_vm4, %v1058_v47 }
 0x2c7   : > { %1435 = vmatpush.msrb.mxu2 %v4327_v4  ;;  %1464 = vmatpush.msrb.mxu3 %v4329_v7  ;;  %v3586_v4 = vld [vmem:[%s5961_s4 + $0x40] sm:$0xff] }
 0x2c9   : > { %1436 = vmatpush.msrb.mxu2 %v4323_v51  ;;  %1465 = vmatpush.msrb.mxu3 %v4335_v9  ;;  %v1589_v52 = vpop.permute.xlu0 %1588 }
 0x2ca   : > { %v1593_v53 = vpop.permute.xlu1 %1592 }
 0x2cb   : > { %v4470_v54 = vsel %vm783_vm6, %v1593_v53, %v1589_v52  ;;  %v4514_v8 = vsel %vm783_vm6, %v1589_v52, %v1593_v53  ;;  %v4600_v29 = vpop.f32.mrf.mxu2 }
 0x2cc   : > { %v1601_v56 = vsel %vm4108_vm7, %v4470_v54, 0.0  ;;  %v4602_v32 = vpop.f32.mrf.mxu3 }
 0x2cd   : > { %1608 = vrot.lane.b32.xlu0 %v1601_v56, %s4002_s16 }
 0x2ce   : > { %3579 = vmatmul.msk.f32.gmra.mxu2 %vm1065_vm4, %v1059_v55  ;;  %3585 = vmatmul.msk.f32.gmra.mxu3 %vm1065_vm4, %v1059_v55  ;;  %v3630_v55 = vld [vmem:[%s5961_s4 + $0xa0] sm:$0xff] }
 0x2d1   : > { %v1591_v57 = vpop.permute.xlu0 %1590 }
 0x2d2   : > { %v4483_v61 = vsel %vm783_vm6, %v1587_v50, %v1591_v57  ;;  %v4487_v62 = vsel %vm783_vm6, %v1591_v57, %v1587_v50  ;;  %v1308_v63 = vpop.permute.xlu1 %1307  ;;  %v3647_v50 = vld [vmem:[%s5961_s4 + $0xc8] sm:$0xff] }
 0x2d3   : > { %v1314_v0 = vsel %vm340_vm11, %v1308_v63, %v1312_v60  ;;  %v1316_v1 = vsel %vm340_vm11, %v1312_v60, %v1308_v63  ;;  %v1599_v2 = vsel %vm4108_vm7, %v4487_v62, 0.0  ;;  %v1598_v3 = vsel %vm4112_vm8, %v4483_v61, 0.0  ;;  %v4612_v37 = vpop.f32.mrf.mxu2 }
 0x2d4   : > { %3606 = vmatpush.msk.msra.mxu0 %vm4151_vm12, %v1316_v1  ;;  %3612 = vmatpush.msk.msra.mxu1 %vm4155_vm13, %v1314_v0  ;;  %v4614_v38 = vpop.f32.mrf.mxu3 }
 0x2d5   : > { %1606 = vrot.lane.b32.xlu2 %v1599_v2, %s4002_s16  ;;  %1602 = vrot.lane.b32.xlu1 %v1598_v3, %s4002_s16 }
 0x2d6   : > { %3592 = vmatmul.msk.f32.vlgmr.msra.gmra.mxu2 %vm1065_vm4, %v3586_v4  ;;  %3598 = vmatmul.msk.f32.vlgmr.msra.gmra.mxu3 %vm1065_vm4, %v3586_v4 }
 0x2d7   : > { %1491 = vrot.lane.b32.xlu0 %v4335_v9, %s4001_s15  ;;  %v1600_v9 = vsel %vm4112_vm8, %v4514_v8, 0.0 }
 0x2d9   : > { %v1306_v10 = vpop.permute.xlu0 %1305 }
 0x2da   : > { %v1310_v5 = vpop.permute.xlu1 %1309 }
 0x2db   : > { %v1313_v6 = vsel %vm340_vm11, %v1306_v10, %v1310_v5  ;;  %v1315_v11 = vsel %vm340_vm11, %v1310_v5, %v1306_v10  ;;  %v4629_v43 = vpop.f32.mrf.mxu2 }
 0x2dc   : > { %3607 = vmatpush.msk.msra.mxu0 %vm4151_vm12, %v1315_v11  ;;  %3613 = vmatpush.msk.msra.mxu1 %vm4155_vm13, %v1313_v6  ;;  %v4631_v46 = vpop.f32.mrf.mxu3 }
 0x2dd   : > { %1493 = vrot.lane.b32.xlu1 %v4329_v7, %s4001_s15  ;;  %1604 = vrot.lane.b32.xlu2 %v1600_v9, %s4002_s16  ;;  %v3603_v7 = vld [vmem:[%s5961_s4 + $0x68] sm:$0xff] }
 0x2de   : > { %3593 = vmatmul.msk.f32.gmra.mxu2 %vm1065_vm4, %v3587_v12  ;;  %3599 = vmatmul.msk.f32.gmra.mxu3 %vm1065_vm4, %v3587_v12  ;;  %v3632_v12 = vld [vmem:[%s5961_s4 + $0xb0] sm:$0xff] }
 0x2df   : > { %1784 = vrot.lane.b32.xlu0 %v1598_v3, %s4001_s15  ;;  %3608 = vmatmul.msk.f32.vlgmr.msra.gmra.mxu0 %vm1065_vm4, %v3602_v13 }
 0x2e0   : > { %3614 = vmatmul.msk.f32.vlgmr.msra.gmra.mxu1 %vm1065_vm4, %v3602_v13  ;;  %v3633_v13 = vld [vmem:[%s5961_s4 + $0xb8] sm:$0xff] }
 0x2e1   : > { %v1490_v28 = vpop.permute.xlu0 %1489 }
 0x2e3   : > { %v4665_v60 = vpop.f32.mrf.mxu2 }
 0x2e4   : > { %v4667_v63 = vpop.f32.mrf.mxu3 }
 0x2e5   : > { %1786 = vrot.lane.b32.xlu1 %v1600_v9, %s4001_s15  ;;  %1487 = vrot.lane.b32.xlu2 %v4323_v51, %s4001_s15  ;;  %v1884_v51 = vld [vmem:[%s5962_s5 + $0x8] sm:$0xff]  ;;  %v3678_v9 = vld [vmem:[%s5961_s4 + $0x100] sm:$0xff] }
 0x2e6   : > { %3594 = vmatmul.msk.f32.gmra.mxu2 %vm1065_vm4, %v3588_v14  ;;  %3600 = vmatmul.msk.f32.gmra.mxu3 %vm1065_vm4, %v3588_v14 }
 0x2e7   : > { %3609 = vmatmul.msk.f32.gmra.mxu0 %vm1065_vm4, %v3603_v7 }
 0x2e8   : > { %3615 = vmatmul.msk.f32.gmra.mxu1 %vm1065_vm4, %v3603_v7 }
 0x2ed   : > { %1788 = vrot.lane.b32.xlu1 %v1599_v2, %s4001_s15  ;;  %1790 = vrot.lane.b32.xlu2 %v1601_v56, %s4001_s15  ;;  %v3648_v2 = vld [vmem:[%s5961_s4 + $0xd0] sm:$0xff] }
 0x2ee   : > { %3595 = vmatmul.msk.f32.gmra.mxu2 %vm1065_vm4, %v3589_v15  ;;  %3601 = vmatmul.msk.f32.gmra.mxu3 %vm1065_vm4, %v3589_v15  ;;  %v3679_v15 = vld [vmem:[%s5961_s4 + $0x108] sm:$0xff] }
 0x2ef   : > { %3610 = vmatmul.msk.f32.gmra.mxu0 %vm1065_vm4, %v3604_v17 }
 0x2f0   : > { %3616 = vmatmul.msk.f32.gmra.mxu1 %vm1065_vm4, %v3604_v17  ;;  %v3662_v17 = vld [vmem:[%s5961_s4 + $0xe0] sm:$0xff] }
 0x2f5   : > { %1894 = vperm.xlu1 %3987, %v1884_v51   ;;  %1904 = vperm.xlu2 %3988, %v1886_v18   ;;  %v1885_v51 = vld [vmem:[%s5962_s5 + $0x10] sm:$0xff] }
 0x2f6   : > { %3622 = vmatmul.msk.f32.vlgmr.msrb.gmra.mxu2 %vm1065_vm4, %v3618_v21  ;;  %3626 = vmatmul.msk.f32.vlgmr.msrb.gmra.mxu3 %vm1065_vm4, %v3618_v21 }
 0x2f7   : > { %3611 = vmatmul.msk.f32.gmra.mxu0 %vm1065_vm4, %v3605_v22  ;;  %1899 = vperm.xlu0 %3989, %v1885_v51  }
 0x2f8   : > { %3617 = vmatmul.msk.f32.gmra.mxu1 %vm1065_vm4, %v3605_v22  ;;  %v3680_v22 = vld [vmem:[%s5961_s4 + $0x110] sm:$0xff] }
 0x2fd   : > { %1889 = vperm.xlu2 %3988, %v1883_v23   ;;  %v3663_v23 = vld [vmem:[%s5961_s4 + $0xe8] sm:$0xff] }
 0x2fe   : > { %3623 = vmatmul.msk.f32.gmra.mxu2 %vm1065_vm4, %v3619_v24  ;;  %3627 = vmatmul.msk.f32.gmra.mxu3 %vm1065_vm4, %v3619_v24 }
 0x306   : > { %3624 = vmatmul.msk.f32.gmra.mxu2 %vm1065_vm4, %v3620_v25  ;;  %3628 = vmatmul.msk.f32.gmra.mxu3 %vm1065_vm4, %v3620_v25 }
 0x30e   : > { %3625 = vmatmul.msk.f32.gmra.mxu2 %vm1065_vm4, %v3621_v26  ;;  %3629 = vmatmul.msk.f32.gmra.mxu3 %vm1065_vm4, %v3621_v26  ;;  %v3681_v26 = vld [vmem:[%s5961_s4 + $0x118] sm:$0xff] }
 0x32f   : > { %v1607_v27 = vpop.permute.xlu2 %1606 }
 0x337   : > { %v1605_v33 = vpop.permute.xlu2 %1604 }
 0x33f   : > { %v1609_v34 = vpop.permute.xlu0 %1608  ;;  %v1488_v47 = vpop.permute.xlu2 %1487 }
 0x340   : > { %v1611_v35 = vsel %vm340_vm11, %v1605_v33, %v1609_v34  ;;  %v1613_v36 = vsel %vm340_vm11, %v1609_v34, %v1605_v33  ;;  %v3665_v34 = vld [vmem:[%s5961_s4 + $0xf8] sm:$0xff] }
 0x341   : > { %3650 = vmatpush.msk.msra.mxu2 %vm4151_vm12, %v1613_v36  ;;  %3656 = vmatpush.msk.msra.mxu3 %vm4155_vm13, %v1611_v35  ;;  %v4700_v6 = vpop.f32.mrf.mxu2  ;;  %v4702_v11 = vpop.f32.mrf.mxu3 }
 0x347   : > { %v1603_v39 = vpop.permute.xlu1 %1602  ;;  %v1791_v0 = vpop.permute.xlu2 %1790 }
 0x348   : > { %v1610_v41 = vsel %vm340_vm11, %v1603_v39, %v1607_v27  ;;  %v1612_v42 = vsel %vm340_vm11, %v1607_v27, %v1603_v39  ;;  %v3664_v27 = vld [vmem:[%s5961_s4 + $0xf0] sm:$0xff] }
 0x349   : > { %3651 = vmatpush.msk.msra.mxu2 %vm4151_vm12, %v1612_v42  ;;  %3657 = vmatpush.msk.msra.mxu3 %vm4155_vm13, %v1610_v41  ;;  %v1492_v49 = vpop.permute.xlu0 %1491  ;;  %v4723_v14 = vpop.f32.mrf.mxu2 }
 0x34a   : > { %3652 = vmatmul.msk.f32.vlgmr.msra.gmra.mxu2 %vm1065_vm4, %v3646_v40  ;;  %3658 = vmatmul.msk.f32.vlgmr.msra.gmra.mxu3 %vm1065_vm4, %v3646_v40  ;;  %v1495_v56 = vsel %vm477_vm15, %v1488_v47, %v1492_v49  ;;  %v1497_v57 = vsel %vm477_vm15, %v1492_v49, %v1488_v47  ;;  %v4725_v7 = vpop.f32.mrf.mxu3  ;;  %v1165_v41 = vpop.f32.mrf.mxu0  ;;  %v1172_v44 = vadd.f32 %v4723_v14, %v4629_v43 }
 0x34b   : > { %v1194_v42 = vpop.f32.mrf.mxu1  ;;  %v1201_v20 = vadd.f32 %v4725_v7, %v4631_v46 }
 0x34f   : > { %v1494_v48 = vpop.permute.xlu1 %1493 }
 0x350   : > { %v1496_v52 = vsel %vm477_vm15, %v1490_v28, %v1494_v48  ;;  %v1498_v53 = vsel %vm477_vm15, %v1494_v48, %v1490_v28 }
 0x351   : > { %3634 = vmatpush.msk.msrb.mxu0 %vm4181_vm0, %v1496_v52  ;;  %3640 = vmatpush.msk.msrb.mxu1 %vm4185_vm5, %v1498_v53  ;;  %v4742_v18 = vpop.f32.mrf.mxu2 }
 0x352   : > { %3653 = vmatmul.msk.f32.gmra.mxu2 %vm1065_vm4, %v3647_v50  ;;  %3659 = vmatmul.msk.f32.gmra.mxu3 %vm1065_vm4, %v3647_v50  ;;  %v4744_v21 = vpop.f32.mrf.mxu3  ;;  %v1175_v43 = vadd.f32 %v4742_v18, %v4665_v60 }
 0x353   : > { %3635 = vmatpush.msk.msrb.mxu0 %vm4181_vm0, %v1495_v56  ;;  %3641 = vmatpush.msk.msrb.mxu1 %vm4185_vm5, %v1497_v57 }
 0x354   : > { %3636 = vmatmul.msk.f32.vlgmr.msrb.gmra.mxu0 %vm1065_vm4, %v3630_v55  ;;  %3642 = vmatmul.msk.f32.vlgmr.msrb.gmra.mxu1 %vm1065_vm4, %v3630_v55 }
 0x355   : > { %3666 = vmatpush.msk.msra.mxu0 %vm4112_vm8, %v4514_v8  ;;  %3672 = vmatpush.msk.msra.mxu1 %vm4108_vm7, %v4470_v54  ;;  %v3649_v8 = vld [vmem:[%s5961_s4 + $0xd8] sm:$0xff] }
 0x357   : > { %3667 = vmatpush.msk.msra.mxu0 %vm4112_vm8, %v4483_v61  ;;  %3673 = vmatpush.msk.msra.mxu1 %vm4108_vm7, %v4487_v62  ;;  %v1787_v1 = vpop.permute.xlu1 %1786  ;;  %v3631_v61 = vld [vmem:[%s5961_s4 + $0xa8] sm:$0xff]  ;;  %v1785_v62 = vpop.permute.xlu0 %1784 }
 0x358   : > { %v1793_v54 = vsel %vm477_vm15, %v1787_v1, %v1791_v0  ;;  %v1795_v3 = vsel %vm477_vm15, %v1791_v0, %v1787_v1 }
 0x359   : > { %3682 = vmatpush.msk.msrb.mxu2 %vm4181_vm0, %v1793_v54  ;;  %3688 = vmatpush.msk.msrb.mxu3 %vm4185_vm5, %v1795_v3  ;;  %v4756_v24 = vpop.f32.mrf.mxu2 }
 0x35a   : > { %3654 = vmatmul.msk.f32.gmra.mxu2 %vm1065_vm4, %v3648_v2  ;;  %3660 = vmatmul.msk.f32.gmra.mxu3 %vm1065_vm4, %v3648_v2  ;;  %v4758_v25 = vpop.f32.mrf.mxu3 }
 0x35c   : > { %3637 = vmatmul.msk.f32.gmra.mxu0 %vm1065_vm4, %v3631_v61  ;;  %3643 = vmatmul.msk.f32.gmra.mxu1 %vm1065_vm4, %v3631_v61  ;;  %v4783_v48 = vpop.f32.mrf.mxu0 }
 0x35d   : > { %v4785_v50 = vpop.f32.mrf.mxu1 }
 0x35f   : > { %v1789_v4 = vpop.permute.xlu1 %1788 }
 0x360   : > { %v1792_v10 = vsel %vm477_vm15, %v1785_v62, %v1789_v4  ;;  %v1794_v5 = vsel %vm477_vm15, %v1789_v4, %v1785_v62 }
 0x361   : > { %3683 = vmatpush.msk.msrb.mxu2 %vm4181_vm0, %v1792_v10  ;;  %3689 = vmatpush.msk.msrb.mxu3 %vm4185_vm5, %v1794_v5  ;;  %v1259_v28 = vpop.f32.mrf.mxu2 }
 0x362   : > { %3655 = vmatmul.msk.f32.gmra.mxu2 %vm1065_vm4, %v3649_v8  ;;  %3661 = vmatmul.msk.f32.gmra.mxu3 %vm1065_vm4, %v3649_v8  ;;  %v1288_v33 = vpop.f32.mrf.mxu3 }
 0x364   : > { %3638 = vmatmul.msk.f32.gmra.mxu0 %vm1065_vm4, %v3632_v12  ;;  %3644 = vmatmul.msk.f32.gmra.mxu1 %vm1065_vm4, %v3632_v12  ;;  %v1358_v55 = vpop.f32.mrf.mxu0 }
 0x365   : > { %v1387_v56 = vpop.f32.mrf.mxu1 }
 0x369   : > { %v1262_v35 = vpop.f32.mrf.mxu2 }
 0x36a   : > { %3684 = vmatmul.msk.f32.vlgmr.msrb.gmra.mxu2 %vm1065_vm4, %v3678_v9  ;;  %3690 = vmatmul.msk.f32.vlgmr.msrb.gmra.mxu3 %vm1065_vm4, %v3678_v9  ;;  %v1291_v36 = vpop.f32.mrf.mxu3 }
 0x36c   : > { %3639 = vmatmul.msk.f32.gmra.mxu0 %vm1065_vm4, %v3633_v13  ;;  %3645 = vmatmul.msk.f32.gmra.mxu1 %vm1065_vm4, %v3633_v13  ;;  %v1361_v1 = vpop.f32.mrf.mxu0 }
 0x36d   : > { %v1390_v2 = vpop.f32.mrf.mxu1 }
 0x371   : > { %v4775_v39 = vpop.f32.mrf.mxu2 }
 0x372   : > { %3685 = vmatmul.msk.f32.gmra.mxu2 %vm1065_vm4, %v3679_v15  ;;  %3691 = vmatmul.msk.f32.gmra.mxu3 %vm1065_vm4, %v3679_v15  ;;  %v4777_v40 = vpop.f32.mrf.mxu3 }
 0x374   : > { %3668 = vmatmul.msk.f32.vlgmr.msra.gmra.mxu0 %vm1065_vm4, %v3662_v17  ;;  %3674 = vmatmul.msk.f32.vlgmr.msra.gmra.mxu1 %vm1065_vm4, %v3662_v17  ;;  %v1364_v61 = vpop.f32.mrf.mxu0 }
 0x375   : > { %v1393_v62 = vpop.f32.mrf.mxu1 }
 0x379   : > { %v4779_v47 = vpop.f32.mrf.mxu2 }
 0x37a   : > { %3686 = vmatmul.msk.f32.gmra.mxu2 %vm1065_vm4, %v3680_v22  ;;  %3692 = vmatmul.msk.f32.gmra.mxu3 %vm1065_vm4, %v3680_v22  ;;  %v4781_v49 = vpop.f32.mrf.mxu3 }
 0x37c   : > { %3669 = vmatmul.msk.f32.gmra.mxu0 %vm1065_vm4, %v3663_v23  ;;  %3675 = vmatmul.msk.f32.gmra.mxu1 %vm1065_vm4, %v3663_v23 }
 0x381   : > { %v1441_v52 = vpop.f32.mrf.mxu2 }
 0x382   : > { %3687 = vmatmul.msk.f32.gmra.mxu2 %vm1065_vm4, %v3681_v26  ;;  %3693 = vmatmul.msk.f32.gmra.mxu3 %vm1065_vm4, %v3681_v26  ;;  %v1470_v53 = vpop.f32.mrf.mxu3 }
 0x384   : > { %3670 = vmatmul.msk.f32.gmra.mxu0 %vm1065_vm4, %v3664_v27  ;;  %3676 = vmatmul.msk.f32.gmra.mxu1 %vm1065_vm4, %v3664_v27 }
 0x389   : > { %v1444_v57 = vpop.f32.mrf.mxu2 }
 0x38a   : > { %v1473_v0 = vpop.f32.mrf.mxu3 }
 0x38c   : > { %3671 = vmatmul.msk.f32.gmra.mxu0 %vm1065_vm4, %v3665_v34  ;;  %3677 = vmatmul.msk.f32.gmra.mxu1 %vm1065_vm4, %v3665_v34  ;;  %v1169_v34 = vadd.f32 %v4700_v6, %v4612_v37  ;;  %v1198_v37 = vadd.f32 %v4702_v11, %v4614_v38 }
 0x38e   : > { %v1299_v59 = vadd.f32 %v1259_v28, %v1169_v34  ;;  %v1301_v28 = vadd.f32 %v1262_v35, %v1172_v44  ;;  %v1302_v34 = vadd.f32 %v1291_v36, %v1201_v20  ;;  %v1195_v35 = vadd.f32 %v1194_v42, %v4602_v32 }
 0x390   : > { %v1398_v19 = vadd.f32 %v1358_v55, %v1299_v59  ;;  %v1204_v59 = vadd.f32 %v4744_v21, %v4667_v63  ;;  %v1400_v46 = vadd.f32 %v1361_v1, %v1301_v28  ;;  %v1401_v14 = vadd.f32 %v1390_v2, %v1302_v34 }
 0x391   : > { %v4787_v54 = vpop.f32.mrf.mxu2  ;;  %v1166_v55 = vadd.f32 %v1165_v41, %v4600_v29 }
 0x392   : > { %v4789_v3 = vpop.f32.mrf.mxu3  ;;  %v1481_v6 = vadd.f32 %v1441_v52, %v1398_v19  ;;  %v1483_v44 = vadd.f32 %v1444_v57, %v1400_v46  ;;  %v1484_v20 = vadd.f32 %v1473_v0, %v1401_v14  ;;  %v1304_v60 = vadd.f32 %v4777_v40, %v1204_v59  ;;  %v1895_v52 = vpop.permute.xlu1 %1894 }
 0x393   : > { %v1298_v57 = vadd.f32 %v4758_v25, %v1195_v35 }
 0x394   : > { %v1403_v2 = vadd.f32 %v1393_v62, %v1304_v60 }
 0x395   : > { %v1397_v25 = vadd.f32 %v4785_v50, %v1298_v57 }
 0x3cd   : > { %v4791_v4 = vpop.f32.mrf.mxu2  ;;  %v4793_v8 = vpop.f32.mrf.mxu3 }
 0x3ce   : > { %6009 = vst [vmem:[#allocation11_spill] sm:$0xff] %v4791_v4 }
 0x3cf   : > { %6010 = vst [vmem:[#allocation12_spill] sm:$0xff] %v4793_v8 }
 0x3d1   : > { %v4795_v10 = vpop.f32.mrf.mxu0  ;;  %v4797_v5 = vpop.f32.mrf.mxu1 }
 0x3d5   : > { %v1655_v12 = vpop.f32.mrf.mxu2  ;;  %v4799_v9 = vpop.f32.mrf.mxu3  ;;  %v6016_v14 = vld [vmem:[#allocation11_spill] sm:$0xff] }
 0x3d9   : > { %v1540_v13 = vpop.f32.mrf.mxu0  ;;  %v1569_v15 = vpop.f32.mrf.mxu1 }
 0x3dd   : > { %v1658_v17 = vpop.f32.mrf.mxu2  ;;  %v1687_v51 = vpop.f32.mrf.mxu3 }
 0x3e1   : > { %v1543_v22 = vpop.f32.mrf.mxu0  ;;  %v1572_v23 = vpop.f32.mrf.mxu1 }
 0x3e2   : > { %v1582_v36 = vadd.f32 %v1543_v22, %v1483_v44  ;;  %v1583_v63 = vadd.f32 %v1572_v23, %v1484_v20  ;;  %v1480_v23 = vadd.f32 %v4781_v49, %v1397_v25 }
 0x3e4   : > { %v1697_v32 = vadd.f32 %v1658_v17, %v1582_v36  ;;  %v1698_v42 = vadd.f32 %v1687_v51, %v1583_v63  ;;  %v1900_v17 = vpop.permute.xlu0 %1899 }
 0x3e5   : > { %v4801_v26 = vpop.f32.mrf.mxu2  ;;  %v4803_v27 = vpop.f32.mrf.mxu3 }
 0x3e6   : > { %6011 = vst [vmem:[#allocation13_spill] sm:$0xff] %v4803_v27  ;;  %v1300_v27 = vadd.f32 %v1288_v33, %v1198_v37  ;;  %v1303_v33 = vadd.f32 %v4775_v39, %v1175_v43  ;;  %v1905_v37 = vpop.permute.xlu2 %1904 }
 0x3e8   : > { %v1399_v19 = vadd.f32 %v1387_v56, %v1300_v27  ;;  %v1402_v0 = vadd.f32 %v1364_v61, %v1303_v33 }
 0x3e9   : > { %v1546_v30 = vpop.f32.mrf.mxu0  ;;  %v1575_v31 = vpop.f32.mrf.mxu1 }
 0x3ea   : > { %v1482_v18 = vadd.f32 %v1470_v53, %v1399_v19  ;;  %v1485_v53 = vadd.f32 %v4787_v54, %v1402_v0 }
 0x3ec   : > { %v1581_v29 = vadd.f32 %v1569_v15, %v1482_v18  ;;  %v1584_v62 = vadd.f32 %v1546_v30, %v1485_v53 }
 0x3ed   : > { %v4807_v58 = vpop.f32.mrf.mxu2  ;;  %v4809_v45 = vpop.f32.mrf.mxu3  ;;  %v6015_v50 = vld [vmem:[#allocation13_spill] sm:$0xff] }
 0x3ee   : > { %6012 = vst [vmem:[#allocation14_spill] sm:$0xff] %v4807_v58  ;;  %v1580_v58 = vadd.f32 %v1540_v13, %v1481_v6  ;;  %v1579_v6 = vadd.f32 %v4797_v5, %v1480_v23  ;;  %v1699_v28 = vadd.f32 %v4801_v26, %v1584_v62  ;;  %v6017_v5 = vld [vmem:[#allocation12_spill] sm:$0xff] }
 0x3ef   : > { %6013 = vst [vmem:[#allocation15_spill] sm:$0xff] %v4809_v45 }
 0x3f0   : > { %v1695_v7 = vadd.f32 %v1655_v12, %v1580_v58  ;;  %v1297_v58 = vadd.f32 %v4756_v24, %v1166_v55  ;;  %v1486_v24 = vadd.f32 %v4789_v3, %v1403_v2  ;;  %v1696_v12 = vadd.f32 %v4799_v9, %v1581_v29 }
 0x3f1   : > { %v4815_v16 = vpop.f32.mrf.mxu0  ;;  %v4817_v8 = vpop.f32.mrf.mxu1 }
 0x3f2   : > { %6014 = vst [vmem:[#allocation16_spill] sm:$0xff] %v4817_v8  ;;  %v1396_v40 = vadd.f32 %v4783_v48, %v1297_v58  ;;  %v1585_v48 = vadd.f32 %v1575_v31, %v1486_v24 }
 0x3f4   : > { %v1479_v61 = vadd.f32 %v4779_v47, %v1396_v40  ;;  %v1700_v34 = vadd.f32 %v6015_v50, %v1585_v48  ;;  %v3695_v50 = vld [vmem:[%s5963_s6 + $0x48] sm:$0xff] }
 0x3f5   : > { %v1837_v4 = vpop.f32.mrf.mxu2  ;;  %v1866_v45 = vpop.f32.mrf.mxu3  ;;  %v6019_v60 = vld [vmem:[#allocation14_spill] sm:$0xff] }
 0x3f6   : > { %v1578_v3 = vadd.f32 %v4795_v10, %v1479_v61  ;;  %v6020_v58 = vld [vmem:[#allocation15_spill] sm:$0xff] }
 0x3f8   : > { %v1693_v10 = vadd.f32 %v6016_v14, %v1578_v3  ;;  %v3700_v14 = vld [vmem:[%s5963_s6 + $0x70] sm:$0xff] }
 0x3f9   : > { %v1738_v8 = vpop.f32.mrf.mxu0  ;;  %v1767_v38 = vpop.f32.mrf.mxu1  ;;  %v6018_v20 = vld [vmem:[#allocation16_spill] sm:$0xff] }
 0x3fa   : > { %v1778_v11 = vadd.f32 %v1738_v8, %v1695_v7  ;;  %v1779_v51 = vadd.f32 %v1767_v38, %v1696_v12  ;;  %v1776_v26 = vadd.f32 %v4815_v16, %v1693_v10  ;;  %v1890_v16 = vpop.permute.xlu2 %1889 }
 0x3fc   : > { %v1877_v21 = vadd.f32 %v1837_v4, %v1778_v11  ;;  %v1878_v47 = vadd.f32 %v1866_v45, %v1779_v51  ;;  %v1694_v45 = vadd.f32 %v6017_v5, %v1579_v6  ;;  %v1875_v18 = vadd.f32 %v6019_v60, %v1776_v26  ;;  %v3701_v5 = vld [vmem:[%s5963_s6 + $0x78] sm:$0xff] }
 0x3fd   : > { %v1840_v1 = vpop.f32.mrf.mxu2  ;;  %v1869_v56 = vpop.f32.mrf.mxu3 }
 0x3fe   : > { %v1909_v41 = vadd.f32 %v1895_v52, %v1877_v21  ;;  %v1910_v38 = vadd.f32 %v1895_v52, %v1878_v47  ;;  %v1777_v11 = vadd.f32 %v6018_v20, %v1694_v45  ;;  %v1907_v52 = vadd.f32 %v1890_v16, %v1875_v18  ;;  %v3697_v47 = vld [vmem:[%s5963_s6 + $0x58] sm:$0xff] }
 0x400   : > { %v4831_v39 = vmax.f32 %v1909_v41, 0.0  ;;  %v4859_v36 = vmax.f32 %v1910_v38, 0.0  ;;  %v1876_v29 = vadd.f32 %v6020_v58, %v1777_v11 }
 0x401   : > { %v1741_v4 = vpop.f32.mrf.mxu0  ;;  %v1770_v8 = vpop.f32.mrf.mxu1 }
 0x402   : > { %v1780_v13 = vadd.f32 %v1741_v4, %v1697_v32  ;;  %v1781_v15 = vadd.f32 %v1770_v8, %v1698_v42  ;;  %1925 = vrot.lane.b32.xlu2 %v4831_v39, %s3998_s11  ;;  %v1908_v41 = vadd.f32 %v1890_v16, %v1876_v29 }
 0x404   : > { %v1879_v54 = vadd.f32 %v1840_v1, %v1780_v13  ;;  %v1880_v22 = vadd.f32 %v1869_v56, %v1781_v15  ;;  %v4872_v1 = vmax.f32 %v1907_v52, 0.0  ;;  %v4874_v56 = vmax.f32 %v1908_v41, 0.0  ;;  %v1987_v52 = vld [vmem:[%s5963_s6] sm:$0xff] }
 0x405   : > { %v1843_v43 = vpop.f32.mrf.mxu2  ;;  %v1872_v59 = vpop.f32.mrf.mxu3 }
 0x406   : > { %v1911_v9 = vadd.f32 %v1900_v17, %v1879_v54  ;;  %v1912_v27 = vadd.f32 %v1900_v17, %v1880_v22 }
 0x408   : > { %v4846_v30 = vmax.f32 %v1911_v9, 0.0  ;;  %v4848_v31 = vmax.f32 %v1912_v27, 0.0 }
 0x409   : > { %v1744_v46 = vpop.f32.mrf.mxu0  ;;  %v1773_v49 = vpop.f32.mrf.mxu1 }
 0x40a   : > { %v1782_v7 = vadd.f32 %v1744_v46, %v1699_v28  ;;  %v1783_v55 = vadd.f32 %v1773_v49, %v1700_v34  ;;  %1935 = vrot.lane.b32.xlu1 %v4848_v31, %s3998_s11  ;;  %1927 = vrot.lane.b32.xlu0 %v4846_v30, %s3998_s11  ;;  %v3694_v28 = vld [vmem:[%s5963_s6 + $0x40] sm:$0xff]  ;;  %v3696_v34 = vld [vmem:[%s5963_s6 + $0x50] sm:$0xff] }
 0x40b   : > { %v3699_v46 = vld [vmem:[%s5963_s6 + $0x68] sm:$0xff] }
 0x40c   : > { %v1881_v19 = vadd.f32 %v1843_v43, %v1782_v7  ;;  %v1882_v44 = vadd.f32 %v1872_v59, %v1783_v55  ;;  %v3698_v43 = vld [vmem:[%s5963_s6 + $0x60] sm:$0xff] }
 0x40e   : > { %v1913_v35 = vadd.f32 %v1905_v37, %v1881_v19  ;;  %v1914_v33 = vadd.f32 %v1905_v37, %v1882_v44 }
 0x410   : > { %v4861_v63 = vmax.f32 %v1913_v35, 0.0  ;;  %v4863_v21 = vmax.f32 %v1914_v33, 0.0  ;;  %v3871_v33 = vld [vmem:[%s5963_s6 + $0x188] sm:$0xff] }
 0x412   : > { %1929 = vrot.lane.b32.xlu1 %v4861_v63, %s3998_s11  ;;  %1933 = vrot.lane.b32.xlu0 %v4859_v36, %s3998_s11 }
 0x413   : > { %1937 = vrot.lane.b32.xlu2 %v4863_v21, %s3998_s11 }
 0x41a   : > { %1923 = vrot.lane.b32.xlu1 %v4872_v1, %s3998_s11 }
 0x41b   : > { %1931 = vrot.lane.b32.xlu2 %v4874_v56, %s3998_s11 }
 0x45c   : > { %v1926_v57 = vpop.permute.xlu2 %1925 }
 0x46d   : > { %v1938_v32 = vpop.permute.xlu2 %1937 }
 0x475   : > { %v1932_v17 = vpop.permute.xlu2 %1931 }
 0x47c   : > { %v1928_v0 = vpop.permute.xlu0 %1927  ;;  %v1936_v2 = vpop.permute.xlu1 %1935 }
 0x47d   : > { %v1941_v25 = vsel %vm326_vm1, %v1928_v0, %v1936_v2  ;;  %v1945_v61 = vsel %vm326_vm1, %v1936_v2, %v1928_v0 }
 0x47e   : > { %v1951_v22 = vsel %vm4080_vm2, %v1945_v61, 0.0  ;;  %v1952_v9 = vsel %vm4084_vm3, %v1941_v25, 0.0 }
 0x484   : > { %v1934_v42 = vpop.permute.xlu0 %1933  ;;  %v1930_v40 = vpop.permute.xlu1 %1929 }
 0x485   : > { %v1940_v4 = vsel %vm326_vm1, %v1926_v57, %v1934_v42  ;;  %v1942_v8 = vsel %vm326_vm1, %v1930_v40, %v1938_v32  ;;  %v1946_v24 = vsel %vm326_vm1, %v1938_v32, %v1930_v40  ;;  %v1944_v62 = vsel %vm326_vm1, %v1934_v42, %v1926_v57  ;;  %v1988_v42 = vld [vmem:[%s5963_s6 + $0x8] sm:$0xff] }
 0x486   : > { %3702 = vmatpush.msk.msrb.mxu0 %vm4080_vm2, %v1946_v24  ;;  %3714 = vmatpush.msk.msrb.mxu1 %vm4084_vm3, %v1942_v8  ;;  %v1950_v15 = vsel %vm4084_vm3, %v1940_v4, 0.0  ;;  %v1949_v27 = vsel %vm4080_vm2, %v1944_v62, 0.0  ;;  %v1953_v37 = vsel %vm4080_vm2, %v1946_v24, 0.0  ;;  %v1954_v6 = vsel %vm4084_vm3, %v1942_v8, 0.0 }
 0x487   : > { %1965 = vrot.lane.b32.xlu2 %v1950_v15, %s4002_s16 }
 0x488   : > { %3703 = vmatpush.msk.msrb.mxu0 %vm4080_vm2, %v1945_v61  ;;  %3715 = vmatpush.msk.msrb.mxu1 %vm4084_vm3, %v1941_v25 }
 0x48a   : > { %3704 = vmatpush.msk.msrb.mxu0 %vm4080_vm2, %v1944_v62  ;;  %3716 = vmatpush.msk.msrb.mxu1 %vm4084_vm3, %v1940_v4 }
 0x48c   : > { %v1924_v48 = vpop.permute.xlu1 %1923 }
 0x48d   : > { %v1939_v51 = vsel %vm326_vm1, %v1924_v48, %v1932_v17  ;;  %v1943_v54 = vsel %vm326_vm1, %v1932_v17, %v1924_v48  ;;  %vm2004_vm1 = vcmask 261120   ;;  %v1989_v17 = vld [vmem:[%s5963_s6 + $0x10] sm:$0xff] }
 0x48e   : > { %3705 = vmatpush.msk.msrb.mxu0 %vm4080_vm2, %v1943_v54  ;;  %3717 = vmatpush.msk.msrb.mxu1 %vm4084_vm3, %v1939_v51  ;;  %v1947_v23 = vsel %vm4080_vm2, %v1943_v54, 0.0  ;;  %v1948_v3 = vsel %vm4084_vm3, %v1939_v51, 0.0  ;;  %vm3414_vm2 = vcmask 7168  }
 0x48f   : > { %1959 = vrot.lane.b32.xlu2 %v1951_v22, %s4002_s16  ;;  %1955 = vrot.lane.b32.xlu0 %v1947_v23, %s4002_s16 }
 0x490   : > { %1963 = vrot.lane.b32.xlu1 %v1948_v3, %s4002_s16  ;;  %3706 = vmatmul.msk.f32.vlgmr.msrb.gmra.mxu0 %vm2004_vm1, %v3694_v28 }
 0x491   : > { %3718 = vmatmul.msk.f32.vlgmr.msrb.gmra.mxu1 %vm2004_vm1, %v3694_v28 }
 0x497   : > { %2229 = vrot.lane.b32.xlu2 %v1952_v9, %s4001_s15  ;;  %1967 = vrot.lane.b32.xlu0 %v1952_v9, %s4002_s16 }
 0x498   : > { %1957 = vrot.lane.b32.xlu1 %v1949_v27, %s4002_s16  ;;  %3707 = vmatmul.msk.f32.gmra.mxu0 %vm2004_vm1, %v3695_v50 }
 0x499   : > { %3719 = vmatmul.msk.f32.gmra.mxu1 %vm2004_vm1, %v3695_v50 }
 0x49f   : > { %2223 = vrot.lane.b32.xlu2 %v1953_v37, %s4001_s15  ;;  %1961 = vrot.lane.b32.xlu0 %v1953_v37, %s4002_s16 }
 0x4a0   : > { %1969 = vrot.lane.b32.xlu1 %v1954_v6, %s4002_s16  ;;  %3708 = vmatmul.msk.f32.gmra.mxu0 %vm2004_vm1, %v3696_v34 }
 0x4a1   : > { %3720 = vmatmul.msk.f32.gmra.mxu1 %vm2004_vm1, %v3696_v34 }
 0x4a7   : > { %2217 = vrot.lane.b32.xlu2 %v1947_v23, %s4001_s15  ;;  %2219 = vrot.lane.b32.xlu0 %v1949_v27, %s4001_s15  ;;  %v3750_v27 = vld [vmem:[%s5963_s6 + $0x80] sm:$0xff] }
 0x4a8   : > { %2221 = vrot.lane.b32.xlu1 %v1951_v22, %s4001_s15  ;;  %3709 = vmatmul.msk.f32.gmra.mxu0 %vm2004_vm1, %v3697_v47 }
 0x4a9   : > { %3721 = vmatmul.msk.f32.gmra.mxu1 %vm2004_vm1, %v3697_v47 }
 0x4af   : > { %2394 = vrot.lane.b32.xlu2 %v4863_v21, %s4002_s16  ;;  %2231 = vrot.lane.b32.xlu0 %v1954_v6, %s4001_s15  ;;  %v1990_v6 = vld [vmem:[%s5963_s6 + $0x18] sm:$0xff] }
 0x4b0   : > { %2227 = vrot.lane.b32.xlu1 %v1950_v15, %s4001_s15  ;;  %3710 = vmatmul.msk.f32.gmra.mxu0 %vm2004_vm1, %v3698_v43 }
 0x4b1   : > { %3722 = vmatmul.msk.f32.gmra.mxu1 %vm2004_vm1, %v3698_v43  ;;  %v3752_v43 = vld [vmem:[%s5963_s6 + $0x90] sm:$0xff] }
 0x4b7   : > { %2382 = vrot.lane.b32.xlu2 %v4831_v39, %s4002_s16  ;;  %2225 = vrot.lane.b32.xlu0 %v1948_v3, %s4001_s15 }
 0x4b8   : > { %2386 = vrot.lane.b32.xlu1 %v4861_v63, %s4002_s16  ;;  %3711 = vmatmul.msk.f32.gmra.mxu0 %vm2004_vm1, %v3699_v46 }
 0x4b9   : > { %3723 = vmatmul.msk.f32.gmra.mxu1 %vm2004_vm1, %v3699_v46 }
 0x4bf   : > { %2388 = vrot.lane.b32.xlu2 %v4874_v56, %s4002_s16  ;;  %2384 = vrot.lane.b32.xlu0 %v4846_v30, %s4002_s16 }
 0x4c0   : > { %2392 = vrot.lane.b32.xlu1 %v4848_v31, %s4002_s16  ;;  %3712 = vmatmul.msk.f32.gmra.mxu0 %vm2004_vm1, %v3700_v14 }
 0x4c1   : > { %3724 = vmatmul.msk.f32.gmra.mxu1 %vm2004_vm1, %v3700_v14 }
 0x4c7   : > { %2841 = vrot.lane.b32.xlu2 %v4846_v30, %s3999_s12  ;;  %2390 = vrot.lane.b32.xlu0 %v4859_v36, %s4002_s16 }
 0x4c8   : > { %2380 = vrot.lane.b32.xlu1 %v4872_v1, %s4002_s16  ;;  %3713 = vmatmul.msk.f32.gmra.mxu0 %vm2004_vm1, %v3701_v5 }
 0x4c9   : > { %3725 = vmatmul.msk.f32.gmra.mxu1 %vm2004_vm1, %v3701_v5  ;;  %v1993_v5 = vld [vmem:[%s5963_s6 + $0x30] sm:$0xff] }
 0x4cf   : > { %2847 = vrot.lane.b32.xlu2 %v4859_v36, %s3999_s12  ;;  %2843 = vrot.lane.b32.xlu0 %v4861_v63, %s3999_s12 }
 0x4d0   : > { %2851 = vrot.lane.b32.xlu1 %v4863_v21, %s3999_s12 }
 0x4d7   : > { %2680 = vrot.lane.b32.xlu2 %v4861_v63, %s4001_s15  ;;  %2849 = vrot.lane.b32.xlu0 %v4848_v31, %s3999_s12 }
 0x4d8   : > { %2839 = vrot.lane.b32.xlu1 %v4831_v39, %s3999_s12 }
 0x4df   : > { %2686 = vrot.lane.b32.xlu2 %v4848_v31, %s4001_s15  ;;  %2837 = vrot.lane.b32.xlu0 %v4872_v1, %s3999_s12 }
 0x4e0   : > { %2845 = vrot.lane.b32.xlu1 %v4874_v56, %s3999_s12 }
 0x4e1   : > { %v1966_v59 = vpop.permute.xlu2 %1965 }
 0x4e7   : > { %2674 = vrot.lane.b32.xlu2 %v4872_v1, %s4001_s15  ;;  %2688 = vrot.lane.b32.xlu0 %v4863_v21, %s4001_s15 }
 0x4e8   : > { %2678 = vrot.lane.b32.xlu1 %v4846_v30, %s4001_s15 }
 0x4e9   : > { %v1960_v49 = vpop.permute.xlu2 %1959 }
 0x4ef   : > { %2676 = vrot.lane.b32.xlu0 %v4831_v39, %s4001_s15 }
 0x4f0   : > { %2684 = vrot.lane.b32.xlu1 %v4859_v36, %s4001_s15 }
 0x4f1   : > { %v2230_v7 = vpop.permute.xlu2 %2229 }
 0x4f7   : > { %2682 = vrot.lane.b32.xlu0 %v4874_v56, %s4001_s15 }
 0x4f9   : > { %v2224_v38 = vpop.permute.xlu2 %2223 }
 0x501   : > { %v1956_v10 = vpop.permute.xlu0 %1955  ;;  %v2218_v58 = vpop.permute.xlu2 %2217 }
 0x502   : > { %v1964_v55 = vpop.permute.xlu1 %1963 }
 0x503   : > { %v1971_v41 = vsel %vm340_vm11, %v1956_v10, %v1964_v55  ;;  %v1975_v57 = vsel %vm340_vm11, %v1964_v55, %v1956_v10  ;;  %v3753_v10 = vld [vmem:[%s5963_s6 + $0x98] sm:$0xff] }
 0x509   : > { %v1968_v45 = vpop.permute.xlu0 %1967  ;;  %v2395_v32 = vpop.permute.xlu2 %2394 }
 0x50a   : > { %v1958_v26 = vpop.permute.xlu1 %1957  ;;  %v1973_v60 = vsel %vm340_vm11, %v1960_v49, %v1968_v45  ;;  %v1977_v18 = vsel %vm340_vm11, %v1968_v45, %v1960_v49  ;;  %v1992_v49 = vld [vmem:[%s5963_s6 + $0x28] sm:$0xff] }
 0x50b   : > { %v1972_v29 = vsel %vm340_vm11, %v1958_v26, %v1966_v59  ;;  %v1976_v16 = vsel %vm340_vm11, %v1966_v59, %v1958_v26 }
 0x511   : > { %v1962_v19 = vpop.permute.xlu0 %1961  ;;  %v2383_v51 = vpop.permute.xlu2 %2382 }
 0x512   : > { %v1970_v44 = vpop.permute.xlu1 %1969 }
 0x513   : > { %v1974_v20 = vsel %vm340_vm11, %v1962_v19, %v1970_v44  ;;  %v1978_v11 = vsel %vm340_vm11, %v1970_v44, %v1962_v19  ;;  %v3787_v44 = vld [vmem:[%s5963_s6 + $0xe8] sm:$0xff] }
 0x514   : > { %3726 = vmatpush.msk.msra.mxu2 %vm4151_vm12, %v1978_v11  ;;  %3738 = vmatpush.msk.msra.mxu3 %vm4155_vm13, %v1974_v20  ;;  %v3333_v11 = vld [vmem:[%s5964_s7 + $0x38] sm:$0xff] }
 0x516   : > { %3727 = vmatpush.msk.msra.mxu2 %vm4151_vm12, %v1977_v18  ;;  %3739 = vmatpush.msk.msra.mxu3 %vm4155_vm13, %v1973_v60  ;;  %v3754_v18 = vld [vmem:[%s5963_s6 + $0xa0] sm:$0xff] }
 0x518   : > { %3728 = vmatpush.msk.msra.mxu2 %vm4151_vm12, %v1976_v16  ;;  %3740 = vmatpush.msk.msra.mxu3 %vm4155_vm13, %v1972_v29 }
 0x519   : > { %v2220_v0 = vpop.permute.xlu0 %2219 }
 0x51a   : > { %3729 = vmatpush.msk.msra.mxu2 %vm4151_vm12, %v1975_v57  ;;  %3741 = vmatpush.msk.msra.mxu3 %vm4155_vm13, %v1971_v41  ;;  %v2222_v2 = vpop.permute.xlu1 %2221  ;;  %v1994_v41 = vld [vmem:[%s5963_s6 + $0x38] sm:$0xff] }
 0x51b   : > { %3730 = vmatmul.msk.f32.vlgmr.msra.gmra.mxu2 %vm2004_vm1, %v1987_v52  ;;  %3742 = vmatmul.msk.f32.vlgmr.msra.gmra.mxu3 %vm2004_vm1, %v1987_v52  ;;  %v2235_v15 = vsel %vm477_vm15, %v2222_v2, %v2230_v7  ;;  %v2239_v25 = vsel %vm477_vm15, %v2230_v7, %v2222_v2 }
 0x521   : > { %v2232_v40 = vpop.permute.xlu0 %2231 }
 0x522   : > { %v2236_v4 = vsel %vm477_vm15, %v2224_v38, %v2232_v40  ;;  %v2240_v8 = vsel %vm477_vm15, %v2232_v40, %v2224_v38  ;;  %v2228_v24 = vpop.permute.xlu1 %2227 }
 0x523   : > { %3731 = vmatmul.msk.f32.gmra.mxu2 %vm2004_vm1, %v1988_v42  ;;  %3743 = vmatmul.msk.f32.gmra.mxu3 %vm2004_vm1, %v1988_v42  ;;  %v2234_v61 = vsel %vm477_vm15, %v2220_v0, %v2228_v24  ;;  %v2238_v62 = vsel %vm477_vm15, %v2228_v24, %v2220_v0 }
 0x524   : > { %3758 = vmatpush.msk.msra.mxu0 %vm4181_vm0, %v2236_v4  ;;  %3770 = vmatpush.msk.msra.mxu1 %vm4185_vm5, %v2240_v8 }
 0x526   : > { %3759 = vmatpush.msk.msra.mxu0 %vm4181_vm0, %v2235_v15  ;;  %3771 = vmatpush.msk.msra.mxu1 %vm4185_vm5, %v2239_v25  ;;  %v3782_v15 = vld [vmem:[%s5963_s6 + $0xc0] sm:$0xff] }
 0x528   : > { %3760 = vmatpush.msk.msra.mxu0 %vm4181_vm0, %v2234_v61  ;;  %3772 = vmatpush.msk.msra.mxu1 %vm4185_vm5, %v2238_v62 }
 0x529   : > { %v2226_v48 = vpop.permute.xlu0 %2225 }
 0x52a   : > { %v2233_v54 = vsel %vm477_vm15, %v2218_v58, %v2226_v48  ;;  %v2237_v22 = vsel %vm477_vm15, %v2226_v48, %v2218_v58  ;;  %v2387_v23 = vpop.permute.xlu1 %2386  ;;  %v5282_v48 = vpop.f32.mrf.mxu0 }
 0x52b   : > { %v2399_v3 = vsel %vm340_vm11, %v2387_v23, %v2395_v32  ;;  %v2403_v9 = vsel %vm340_vm11, %v2395_v32, %v2387_v23  ;;  %3732 = vmatmul.msk.f32.gmra.mxu2 %vm2004_vm1, %v1989_v17  ;;  %3744 = vmatmul.msk.f32.gmra.mxu3 %vm2004_vm1, %v1989_v17  ;;  %v3755_v32 = vld [vmem:[%s5963_s6 + $0xa8] sm:$0xff] }
 0x52c   : > { %3761 = vmatpush.msk.msra.mxu0 %vm4181_vm0, %v2233_v54  ;;  %3773 = vmatpush.msk.msra.mxu1 %vm4185_vm5, %v2237_v22  ;;  %v3756_v22 = vld [vmem:[%s5963_s6 + $0xb0] sm:$0xff] }
 0x52d   : > { %3790 = vmatpush.msk.msrb.mxu2 %vm4151_vm12, %v2403_v9  ;;  %3802 = vmatpush.msk.msrb.mxu3 %vm4155_vm13, %v2399_v3 }
 0x52e   : > { %3762 = vmatmul.msk.f32.vlgmr.msra.gmra.mxu0 %vm2004_vm1, %v3750_v27  ;;  %3774 = vmatmul.msk.f32.vlgmr.msra.gmra.mxu1 %vm2004_vm1, %v3750_v27 }
 0x52f   : > { %2588 = vmatpush.msrb.mxu0 %v4861_v63  ;;  %2629 = vmatpush.msrb.mxu1 %v4863_v21  ;;  %v2389_v21 = vpop.permute.xlu2 %2388 }
 0x531   : > { %2589 = vmatpush.msrb.mxu0 %v4846_v30  ;;  %2630 = vmatpush.msrb.mxu1 %v4848_v31  ;;  %v2385_v37 = vpop.permute.xlu0 %2384  ;;  %v3751_v30 = vld [vmem:[%s5963_s6 + $0x88] sm:$0xff]  ;;  %v1991_v31 = vld [vmem:[%s5963_s6 + $0x20] sm:$0xff] }
 0x532   : > { %v2393_v28 = vpop.permute.xlu1 %2392 }
 0x533   : > { %2590 = vmatpush.msrb.mxu0 %v4831_v39  ;;  %2631 = vmatpush.msrb.mxu1 %v4859_v36  ;;  %v2398_v50 = vsel %vm340_vm11, %v2385_v37, %v2393_v28  ;;  %v2402_v63 = vsel %vm340_vm11, %v2393_v28, %v2385_v37 }
 0x534   : > { %3733 = vmatmul.msk.f32.gmra.mxu2 %vm2004_vm1, %v1990_v6  ;;  %3745 = vmatmul.msk.f32.gmra.mxu3 %vm2004_vm1, %v1990_v6  ;;  %v3783_v6 = vld [vmem:[%s5963_s6 + $0xc8] sm:$0xff] }
 0x535   : > { %2591 = vmatpush.msrb.mxu0 %v4872_v1  ;;  %2632 = vmatpush.msrb.mxu1 %v4874_v56 }
 0x536   : > { %3791 = vmatpush.msk.msrb.mxu2 %vm4151_vm12, %v2402_v63  ;;  %3803 = vmatpush.msk.msrb.mxu3 %vm4155_vm13, %v2398_v50 }
 0x537   : > { %3763 = vmatmul.msk.f32.gmra.mxu0 %vm2004_vm1, %v3751_v30  ;;  %3775 = vmatmul.msk.f32.gmra.mxu1 %vm2004_vm1, %v3751_v30  ;;  %v2842_v59 = vpop.permute.xlu2 %2841  ;;  %v5326_v30 = vpop.f32.mrf.mxu0 }
 0x539   : > { %v2391_v39 = vpop.permute.xlu0 %2390 }
 0x53a   : > { %v2397_v36 = vsel %vm340_vm11, %v2383_v51, %v2391_v39  ;;  %v2401_v1 = vsel %vm340_vm11, %v2391_v39, %v2383_v51  ;;  %v2381_v56 = vpop.permute.xlu1 %2380  ;;  %v5284_v51 = vpop.f32.mrf.mxu1 }
 0x53b   : > { %3792 = vmatpush.msk.msrb.mxu2 %vm4151_vm12, %v2401_v1  ;;  %3804 = vmatpush.msk.msrb.mxu3 %vm4155_vm13, %v2397_v36  ;;  %v2396_v34 = vsel %vm340_vm11, %v2381_v56, %v2389_v21  ;;  %v2400_v47 = vsel %vm340_vm11, %v2389_v21, %v2381_v56  ;;  %v3757_v21 = vld [vmem:[%s5963_s6 + $0xb8] sm:$0xff]  ;;  %v3784_v1 = vld [vmem:[%s5963_s6 + $0xd0] sm:$0xff] }
 0x53c   : > { %3734 = vmatmul.msk.f32.gmra.mxu2 %vm2004_vm1, %v1991_v31  ;;  %3746 = vmatmul.msk.f32.gmra.mxu3 %vm2004_vm1, %v1991_v31 }
 0x53d   : > { %3793 = vmatpush.msk.msrb.mxu2 %vm4151_vm12, %v2400_v47  ;;  %3805 = vmatpush.msk.msrb.mxu3 %vm4155_vm13, %v2396_v34  ;;  %v3814_v47 = vld [vmem:[%s5963_s6 + $0x100] sm:$0xff] }
 0x53f   : > { %3764 = vmatmul.msk.f32.gmra.mxu0 %vm2004_vm1, %v3752_v43  ;;  %3776 = vmatmul.msk.f32.gmra.mxu1 %vm2004_vm1, %v3752_v43  ;;  %v2848_v7 = vpop.permute.xlu2 %2847  ;;  %v5363_v43 = vpop.f32.mrf.mxu0 }
 0x541   : > { %v2844_v46 = vpop.permute.xlu0 %2843 }
 0x542   : > { %v2852_v14 = vpop.permute.xlu1 %2851  ;;  %v5328_v39 = vpop.f32.mrf.mxu1 }
 0x543   : > { %v5228_v29 = vsel %vm783_vm6, %v2844_v46, %v2852_v14  ;;  %v5239_v0 = vsel %vm783_vm6, %v2852_v14, %v2844_v46  ;;  %v3785_v46 = vld [vmem:[%s5963_s6 + $0xd8] sm:$0xff]  ;;  %v3327_v14 = vld [vmem:[%s5964_s7 + $0x8] sm:$0xff] }
 0x544   : > { %3735 = vmatmul.msk.f32.gmra.mxu2 %vm2004_vm1, %v1992_v49  ;;  %3747 = vmatmul.msk.f32.gmra.mxu3 %vm2004_vm1, %v1992_v49  ;;  %v2867_v42 = vsel %vm4112_vm8, %v5228_v29, 0.0  ;;  %v5257_v4 = vsel %vm4108_vm7, %v5239_v0, 0.0  ;;  %v3326_v49 = vld [vmem:[%s5964_s7] sm:$0xff] }
 0x547   : > { %3765 = vmatmul.msk.f32.gmra.mxu0 %vm2004_vm1, %v3753_v10  ;;  %3777 = vmatmul.msk.f32.gmra.mxu1 %vm2004_vm1, %v3753_v10  ;;  %v2681_v57 = vpop.permute.xlu2 %2680  ;;  %v3815_v10 = vld [vmem:[%s5963_s6 + $0x108] sm:$0xff] }
 0x549   : > { %v2850_v55 = vpop.permute.xlu0 %2849 }
 0x54a   : > { %v5191_v45 = vsel %vm783_vm6, %v2842_v59, %v2850_v55  ;;  %v5195_v26 = vsel %vm783_vm6, %v2850_v55, %v2842_v59  ;;  %v2840_v38 = vpop.permute.xlu1 %2839  ;;  %v5365_v59 = vpop.f32.mrf.mxu1 }
 0x54b   : > { %v5199_v19 = vsel %vm783_vm6, %v2840_v38, %v2848_v7  ;;  %v5204_v20 = vsel %vm4112_vm8, %v5191_v45, 0.0  ;;  %v2866_v60 = vsel %vm4108_vm7, %v5195_v26, 0.0  ;;  %v5232_v16 = vsel %vm783_vm6, %v2848_v7, %v2840_v38  ;;  %v3786_v7 = vld [vmem:[%s5963_s6 + $0xe0] sm:$0xff]  ;;  %v5407_v55 = vpop.f32.mrf.mxu0  ;;  %v3816_v38 = vld [vmem:[%s5963_s6 + $0x110] sm:$0xff] }
 0x54c   : > { %3736 = vmatmul.msk.f32.gmra.mxu2 %vm2004_vm1, %v1993_v5  ;;  %3748 = vmatmul.msk.f32.gmra.mxu3 %vm2004_vm1, %v1993_v5  ;;  %v5217_v58 = vsel %vm4112_vm8, %v5199_v19, 0.0  ;;  %v2864_v40 = vsel %vm4108_vm7, %v5232_v16, 0.0 }
 0x54d   : > { %2873 = vrot.lane.b32.xlu0 %v5204_v20, %s4002_s16  ;;  %2881 = vrot.lane.b32.xlu1 %v2866_v60, %s4002_s16 }
 0x54e   : > { %2871 = vrot.lane.b32.xlu2 %v5217_v58, %s4002_s16 }
 0x54f   : > { %3766 = vmatmul.msk.f32.gmra.mxu0 %vm2004_vm1, %v3754_v18  ;;  %3778 = vmatmul.msk.f32.gmra.mxu1 %vm2004_vm1, %v3754_v18  ;;  %v2687_v54 = vpop.permute.xlu2 %2686 }
 0x551   : > { %v2838_v52 = vpop.permute.xlu0 %2837 }
 0x552   : > { %v2846_v2 = vpop.permute.xlu1 %2845  ;;  %v5409_v5 = vpop.f32.mrf.mxu1 }
 0x553   : > { %v5265_v8 = vsel %vm783_vm6, %v2838_v52, %v2846_v2  ;;  %v5272_v25 = vsel %vm783_vm6, %v2846_v2, %v2838_v52  ;;  %v3818_v52 = vld [vmem:[%s5963_s6 + $0x120] sm:$0xff]  ;;  %v3819_v2 = vld [vmem:[%s5963_s6 + $0x128] sm:$0xff] }
 0x554   : > { %3737 = vmatmul.msk.f32.gmra.mxu2 %vm2004_vm1, %v1994_v41  ;;  %3749 = vmatmul.msk.f32.gmra.mxu3 %vm2004_vm1, %v1994_v41  ;;  %v2861_v23 = vsel %vm4112_vm8, %v5265_v8, 0.0  ;;  %v2862_v9 = vsel %vm4108_vm7, %v5272_v25, 0.0 }
 0x555   : > { %2875 = vrot.lane.b32.xlu1 %v2867_v42, %s4002_s16  ;;  %2879 = vrot.lane.b32.xlu0 %v2864_v40, %s4002_s16 }
 0x556   : > { %2883 = vrot.lane.b32.xlu2 %v5257_v4, %s4002_s16 }
 0x557   : > { %3767 = vmatmul.msk.f32.gmra.mxu0 %vm2004_vm1, %v3755_v32  ;;  %3779 = vmatmul.msk.f32.gmra.mxu1 %vm2004_vm1, %v3755_v32  ;;  %v2675_v31 = vpop.permute.xlu2 %2674 }
 0x559   : > { %v2689_v24 = vpop.permute.xlu0 %2688 }
 0x55a   : > { %v2693_v61 = vsel %vm477_vm15, %v2681_v57, %v2689_v24  ;;  %v2697_v62 = vsel %vm477_vm15, %v2689_v24, %v2681_v57  ;;  %v2679_v17 = vpop.permute.xlu1 %2678  ;;  %v5438_v18 = vpop.f32.mrf.mxu1 }
 0x55b   : > { %3846 = vmatpush.msk.msra.mxu2 %vm4181_vm0, %v2693_v61  ;;  %3858 = vmatpush.msk.msra.mxu3 %vm4185_vm5, %v2697_v62  ;;  %v2692_v3 = vsel %vm477_vm15, %v2679_v17, %v2687_v54  ;;  %v2696_v27 = vsel %vm477_vm15, %v2687_v54, %v2679_v17  ;;  %v3839_v61 = vld [vmem:[%s5963_s6 + $0x148] sm:$0xff]  ;;  %v3821_v62 = vld [vmem:[%s5963_s6 + $0x138] sm:$0xff] }
 0x55c   : > { %3794 = vmatmul.msk.f32.vlgmr.msrb.gmra.mxu2 %vm2004_vm1, %v3782_v15  ;;  %3806 = vmatmul.msk.f32.vlgmr.msrb.gmra.mxu3 %vm2004_vm1, %v3782_v15 }
 0x55d   : > { %3175 = vrot.lane.b32.xlu0 %v2866_v60, %s4001_s15  ;;  %2869 = vrot.lane.b32.xlu1 %v2861_v23, %s4002_s16  ;;  %v5436_v60 = vpop.f32.mrf.mxu0 }
 0x55e   : > { %2877 = vrot.lane.b32.xlu2 %v2862_v9, %s4002_s16  ;;  %3847 = vmatpush.msk.msra.mxu2 %vm4181_vm0, %v2692_v3 }
 0x55f   : > { %3768 = vmatmul.msk.f32.gmra.mxu0 %vm2004_vm1, %v3756_v22  ;;  %3780 = vmatmul.msk.f32.gmra.mxu1 %vm2004_vm1, %v3756_v22  ;;  %v3840_v22 = vld [vmem:[%s5963_s6 + $0x150] sm:$0xff] }
 0x560   : > { %3859 = vmatpush.msk.msra.mxu3 %vm4185_vm5, %v2696_v27 }
 0x561   : > { %v2677_v37 = vpop.permute.xlu0 %2676 }
 0x562   : > { %v2685_v28 = vpop.permute.xlu1 %2684  ;;  %v5460_v57 = vpop.f32.mrf.mxu1 }
 0x563   : > { %v2691_v50 = vsel %vm477_vm15, %v2677_v37, %v2685_v28  ;;  %v2695_v63 = vsel %vm477_vm15, %v2685_v28, %v2677_v37  ;;  %v3841_v37 = vld [vmem:[%s5963_s6 + $0x158] sm:$0xff] }
 0x564   : > { %3795 = vmatmul.msk.f32.gmra.mxu2 %vm2004_vm1, %v3783_v6  ;;  %3807 = vmatmul.msk.f32.gmra.mxu3 %vm2004_vm1, %v3783_v6 }
 0x565   : > { %3848 = vmatpush.msk.msra.mxu2 %vm4181_vm0, %v2691_v50  ;;  %3860 = vmatpush.msk.msra.mxu3 %vm4185_vm5, %v2695_v63  ;;  %v5458_v41 = vpop.f32.mrf.mxu0 }
 0x566   : > { %3169 = vrot.lane.b32.xlu0 %v2867_v42, %s4001_s15  ;;  %3167 = vrot.lane.b32.xlu2 %v5204_v20, %s4001_s15  ;;  %v3332_v20 = vld [vmem:[%s5964_s7 + $0x30] sm:$0xff] }
 0x567   : > { %3769 = vmatmul.msk.f32.gmra.mxu0 %vm2004_vm1, %v3757_v21  ;;  %3781 = vmatmul.msk.f32.gmra.mxu1 %vm2004_vm1, %v3757_v21  ;;  %v3842_v21 = vld [vmem:[%s5963_s6 + $0x160] sm:$0xff] }
 0x568   : > { %3165 = vrot.lane.b32.xlu1 %v5217_v58, %s4001_s15  ;;  %v3817_v58 = vld [vmem:[%s5963_s6 + $0x118] sm:$0xff] }
 0x569   : > { %v2683_v36 = vpop.permute.xlu0 %2682 }
 0x56a   : > { %v2690_v56 = vsel %vm477_vm15, %v2675_v31, %v2683_v36  ;;  %v2694_v34 = vsel %vm477_vm15, %v2683_v36, %v2675_v31  ;;  %v5476_v42 = vpop.f32.mrf.mxu1 }
 0x56b   : > { %3849 = vmatpush.msk.msra.mxu2 %vm4181_vm0, %v2690_v56  ;;  %3861 = vmatpush.msk.msra.mxu3 %vm4185_vm5, %v2694_v34 }
 0x56c   : > { %3796 = vmatmul.msk.f32.gmra.mxu2 %vm2004_vm1, %v3784_v1  ;;  %3808 = vmatmul.msk.f32.gmra.mxu3 %vm2004_vm1, %v3784_v1 }
 0x56d   : > { %3910 = vmatpush.msk.msrb.mxu2 %vm4112_vm8, %v5228_v29  ;;  %3922 = vmatpush.msk.msrb.mxu3 %vm4108_vm7, %v5239_v0  ;;  %v3331_v29 = vld [vmem:[%s5964_s7 + $0x28] sm:$0xff]  ;;  %v3789_v0 = vld [vmem:[%s5963_s6 + $0xf8] sm:$0xff]  ;;  %v5474_v32 = vpop.f32.mrf.mxu0 }
 0x56e   : > { %3173 = vrot.lane.b32.xlu2 %v2864_v40, %s4001_s15  ;;  %3163 = vrot.lane.b32.xlu0 %v2861_v23, %s4001_s15  ;;  %v3838_v40 = vld [vmem:[%s5963_s6 + $0x140] sm:$0xff] }
 0x56f   : > { %3822 = vmatmul.msk.f32.vlgmr.msrb.gmra.mxu0 %vm2004_vm1, %v3814_v47  ;;  %3830 = vmatmul.msk.f32.vlgmr.msrb.gmra.mxu1 %vm2004_vm1, %v3814_v47 }
 0x570   : > { %3177 = vrot.lane.b32.xlu1 %v5257_v4, %s4001_s15  ;;  %3911 = vmatpush.msk.msrb.mxu2 %vm4112_vm8, %v5191_v45  ;;  %v3329_v45 = vld [vmem:[%s5964_s7 + $0x18] sm:$0xff]  ;;  %v3820_v4 = vld [vmem:[%s5963_s6 + $0x130] sm:$0xff] }
 0x571   : > { %3923 = vmatpush.msk.msrb.mxu3 %vm4108_vm7, %v5195_v26  ;;  %v3330_v26 = vld [vmem:[%s5964_s7 + $0x20] sm:$0xff] }
 0x572   : > { %3912 = vmatpush.msk.msrb.mxu2 %vm4112_vm8, %v5199_v19  ;;  %v3328_v19 = vld [vmem:[%s5964_s7 + $0x10] sm:$0xff] }
 0x573   : > { %3924 = vmatpush.msk.msrb.mxu3 %vm4108_vm7, %v5232_v16  ;;  %v3788_v16 = vld [vmem:[%s5963_s6 + $0xf0] sm:$0xff] }
 0x574   : > { %3797 = vmatmul.msk.f32.gmra.mxu2 %vm2004_vm1, %v3785_v46  ;;  %3809 = vmatmul.msk.f32.gmra.mxu3 %vm2004_vm1, %v3785_v46 }
 0x575   : > { %3913 = vmatpush.msk.msrb.mxu2 %vm4112_vm8, %v5265_v8  ;;  %3925 = vmatpush.msk.msrb.mxu3 %vm4108_vm7, %v5272_v25  ;;  %v5492_v15 = vpop.f32.mrf.mxu0  ;;  %v5494_v25 = vpop.f32.mrf.mxu1 }
 0x576   : > { %3336 = vperm.xlu2 %3988, %v3326_v49   ;;  %3341 = vperm.xlu0 %3989, %v3327_v14   ;;  %v3843_v49 = vld [vmem:[%s5963_s6 + $0x168] sm:$0xff] }
 0x577   : > { %3823 = vmatmul.msk.f32.gmra.mxu0 %vm2004_vm1, %v3815_v10  ;;  %3831 = vmatmul.msk.f32.gmra.mxu1 %vm2004_vm1, %v3815_v10 }
 0x578   : > { %3171 = vrot.lane.b32.xlu1 %v2862_v9, %s4001_s15 }
 0x57c   : > { %3798 = vmatmul.msk.f32.gmra.mxu2 %vm2004_vm1, %v3786_v7  ;;  %3810 = vmatmul.msk.f32.gmra.mxu3 %vm2004_vm1, %v3786_v7 }
 0x57e   : > { %3351 = vperm.xlu2 %3988, %v3329_v45   ;;  %3356 = vperm.xlu0 %3989, %v3330_v26  }
 0x57f   : > { %3824 = vmatmul.msk.f32.gmra.mxu0 %vm2004_vm1, %v3816_v38  ;;  %3832 = vmatmul.msk.f32.gmra.mxu1 %vm2004_vm1, %v3816_v38 }
 0x580   : > { %3346 = vperm.xlu1 %3987, %v3328_v19   ;;  %v3844_v19 = vld [vmem:[%s5963_s6 + $0x170] sm:$0xff] }
 0x584   : > { %3799 = vmatmul.msk.f32.gmra.mxu2 %vm2004_vm1, %v3787_v44  ;;  %3811 = vmatmul.msk.f32.gmra.mxu3 %vm2004_vm1, %v3787_v44 }
 0x586   : > { %3366 = vperm.xlu2 %3988, %v3332_v20   ;;  %3371 = vperm.xlu0 %3989, %v3333_v11  }
 0x587   : > { %3825 = vmatmul.msk.f32.gmra.mxu0 %vm2004_vm1, %v3817_v58  ;;  %3833 = vmatmul.msk.f32.gmra.mxu1 %vm2004_vm1, %v3817_v58 }
 0x588   : > { %3361 = vperm.xlu1 %3987, %v3331_v29  }
 0x58c   : > { %3800 = vmatmul.msk.f32.gmra.mxu2 %vm2004_vm1, %v3788_v16  ;;  %3812 = vmatmul.msk.f32.gmra.mxu3 %vm2004_vm1, %v3788_v16 }
 0x58f   : > { %3826 = vmatmul.msk.f32.gmra.mxu0 %vm2004_vm1, %v3818_v52  ;;  %3834 = vmatmul.msk.f32.gmra.mxu1 %vm2004_vm1, %v3818_v52 }
 0x594   : > { %3801 = vmatmul.msk.f32.gmra.mxu2 %vm2004_vm1, %v3789_v0  ;;  %3813 = vmatmul.msk.f32.gmra.mxu3 %vm2004_vm1, %v3789_v0 }
 0x597   : > { %3827 = vmatmul.msk.f32.gmra.mxu0 %vm2004_vm1, %v3819_v2  ;;  %3835 = vmatmul.msk.f32.gmra.mxu1 %vm2004_vm1, %v3819_v2 }
 0x59c   : > { %3850 = vmatmul.msk.f32.vlgmr.msra.gmra.mxu2 %vm2004_vm1, %v3838_v40  ;;  %3862 = vmatmul.msk.f32.vlgmr.msra.gmra.mxu3 %vm2004_vm1, %v3838_v40 }
 0x59e   : > { %v5486_v8 = vpop.f32.mrf.mxu2  ;;  %v5488_v24 = vpop.f32.mrf.mxu3 }
 0x59f   : > { %3828 = vmatmul.msk.f32.gmra.mxu0 %vm2004_vm1, %v3820_v4  ;;  %3836 = vmatmul.msk.f32.gmra.mxu1 %vm2004_vm1, %v3820_v4 }
 0x5a4   : > { %3851 = vmatmul.msk.f32.gmra.mxu2 %vm2004_vm1, %v3839_v61  ;;  %3863 = vmatmul.msk.f32.gmra.mxu3 %vm2004_vm1, %v3839_v61 }
 0x5a6   : > { %v5504_v17 = vpop.f32.mrf.mxu2  ;;  %v5506_v54 = vpop.f32.mrf.mxu3 }
 0x5a7   : > { %3829 = vmatmul.msk.f32.gmra.mxu0 %vm2004_vm1, %v3821_v62  ;;  %3837 = vmatmul.msk.f32.gmra.mxu1 %vm2004_vm1, %v3821_v62 }
 0x5a8   : > { %v2872_v31 = vpop.permute.xlu2 %2871 }
 0x5ab   : > { %v5513_v23 = vpop.f32.mrf.mxu0  ;;  %v5515_v3 = vpop.f32.mrf.mxu1 }
 0x5ac   : > { %3852 = vmatmul.msk.f32.gmra.mxu2 %vm2004_vm1, %v3840_v22  ;;  %3864 = vmatmul.msk.f32.gmra.mxu3 %vm2004_vm1, %v3840_v22  ;;  %v3870_v22 = vld [vmem:[%s5963_s6 + $0x180] sm:$0xff] }
 0x5ae   : > { %v5519_v9 = vpop.f32.mrf.mxu2  ;;  %v5521_v27 = vpop.f32.mrf.mxu3 }
 0x5b0   : > { %v2884_v7 = vpop.permute.xlu2 %2883 }
 0x5b4   : > { %v5526_v6 = vpop.f32.mrf.mxu0  ;;  %v5528_v28 = vpop.f32.mrf.mxu1  ;;  %3853 = vmatmul.msk.f32.gmra.mxu2 %vm2004_vm1, %v3841_v37  ;;  %3865 = vmatmul.msk.f32.gmra.mxu3 %vm2004_vm1, %v3841_v37 }
 0x5b7   : > { %v5532_v50 = vpop.f32.mrf.mxu2  ;;  %v5534_v63 = vpop.f32.mrf.mxu3 }
 0x5b8   : > { %v2878_v61 = vpop.permute.xlu2 %2877 }
 0x5bc   : > { %v5539_v36 = vpop.f32.mrf.mxu0  ;;  %v5541_v1 = vpop.f32.mrf.mxu1  ;;  %3854 = vmatmul.msk.f32.gmra.mxu2 %vm2004_vm1, %v3842_v21  ;;  %3866 = vmatmul.msk.f32.gmra.mxu3 %vm2004_vm1, %v3842_v21 }
 0x5bf   : > { %v5545_v56 = vpop.f32.mrf.mxu2  ;;  %v5547_v34 = vpop.f32.mrf.mxu3 }
 0x5c0   : > { %v2874_v47 = vpop.permute.xlu0 %2873  ;;  %v2882_v46 = vpop.permute.xlu1 %2881 }
 0x5c1   : > { %v2887_v58 = vsel %vm340_vm11, %v2874_v47, %v2882_v46  ;;  %v2891_v29 = vsel %vm340_vm11, %v2882_v46, %v2874_v47 }
 0x5c4   : > { %v5552_v14 = vpop.f32.mrf.mxu0  ;;  %v5554_v10 = vpop.f32.mrf.mxu1  ;;  %3855 = vmatmul.msk.f32.gmra.mxu2 %vm2004_vm1, %v3843_v49  ;;  %3867 = vmatmul.msk.f32.gmra.mxu3 %vm2004_vm1, %v3843_v49 }
 0x5c7   : > { %v5558_v45 = vpop.f32.mrf.mxu2  ;;  %v5560_v26 = vpop.f32.mrf.mxu3 }
 0x5c8   : > { %v2876_v38 = vpop.permute.xlu1 %2875  ;;  %v2880_v11 = vpop.permute.xlu0 %2879 }
 0x5c9   : > { %v2888_v44 = vsel %vm340_vm11, %v2876_v38, %v2884_v7  ;;  %v2892_v20 = vsel %vm340_vm11, %v2884_v7, %v2876_v38  ;;  %v2886_v0 = vsel %vm340_vm11, %v2872_v31, %v2880_v11  ;;  %v2890_v2 = vsel %vm340_vm11, %v2880_v11, %v2872_v31  ;;  %v3845_v31 = vld [vmem:[%s5963_s6 + $0x178] sm:$0xff] }
 0x5ca   : > { %3878 = vmatpush.msk.msra.mxu0 %vm4151_vm12, %v2892_v20  ;;  %3890 = vmatpush.msk.msra.mxu1 %vm4155_vm13, %v2888_v44  ;;  %v3168_v44 = vpop.permute.xlu2 %3167  ;;  %v2153_v20 = vadd.f32 %v5486_v8, %v5282_v48  ;;  %v2194_v11 = vadd.f32 %v5488_v24, %v5284_v51 }
 0x5cc   : > { %v5577_v16 = vpop.f32.mrf.mxu0  ;;  %v5579_v52 = vpop.f32.mrf.mxu1  ;;  %3856 = vmatmul.msk.f32.gmra.mxu2 %vm2004_vm1, %v3844_v19  ;;  %3868 = vmatmul.msk.f32.gmra.mxu3 %vm2004_vm1, %v3844_v19  ;;  %v3902_v19 = vld [vmem:[%s5963_s6 + $0x1c0] sm:$0xff] }
 0x5cd   : > { %3879 = vmatpush.msk.msra.mxu0 %vm4151_vm12, %v2891_v29  ;;  %3891 = vmatpush.msk.msra.mxu1 %vm4155_vm13, %v2887_v58 }
 0x5cf   : > { %3880 = vmatpush.msk.msra.mxu0 %vm4151_vm12, %v2890_v2  ;;  %3892 = vmatpush.msk.msra.mxu1 %vm4155_vm13, %v2886_v0  ;;  %v5595_v40 = vpop.f32.mrf.mxu2  ;;  %v5597_v4 = vpop.f32.mrf.mxu3  ;;  %v2364_v0 = vadd.f32 %v5513_v23, %v2153_v20  ;;  %v2365_v2 = vadd.f32 %v5515_v3, %v2194_v11  ;;  %v3903_v3 = vld [vmem:[%s5963_s6 + $0x1c8] sm:$0xff] }
 0x5d0   : > { %v2870_v62 = vpop.permute.xlu1 %2869  ;;  %v3176_v49 = vpop.permute.xlu0 %3175 }
 0x5d1   : > { %v2885_v37 = vsel %vm340_vm11, %v2870_v62, %v2878_v61  ;;  %v2889_v21 = vsel %vm340_vm11, %v2878_v61, %v2870_v62 }
 0x5d2   : > { %3881 = vmatpush.msk.msra.mxu0 %vm4151_vm12, %v2889_v21  ;;  %3893 = vmatpush.msk.msra.mxu1 %vm4155_vm13, %v2885_v37  ;;  %v2156_v37 = vadd.f32 %v5504_v17, %v5326_v30  ;;  %v3174_v20 = vpop.permute.xlu2 %3173 }
 0x5d3   : > { %3882 = vmatmul.msk.f32.vlgmr.msra.gmra.mxu0 %vm2004_vm1, %v3870_v22  ;;  %3894 = vmatmul.msk.f32.vlgmr.msra.gmra.mxu1 %vm2004_vm1, %v3870_v22  ;;  %v3872_v22 = vld [vmem:[%s5963_s6 + $0x190] sm:$0xff] }
 0x5d4   : > { %v5613_v47 = vpop.f32.mrf.mxu0  ;;  %v5615_v46 = vpop.f32.mrf.mxu1  ;;  %3857 = vmatmul.msk.f32.gmra.mxu2 %vm2004_vm1, %v3845_v31  ;;  %3869 = vmatmul.msk.f32.gmra.mxu3 %vm2004_vm1, %v3845_v31  ;;  %v2197_v31 = vadd.f32 %v5506_v54, %v5328_v39  ;;  %v3181_v39 = vsel %vm477_vm15, %v3168_v44, %v3176_v49  ;;  %v3185_v54 = vsel %vm477_vm15, %v3176_v49, %v3168_v44 }
 0x5d7   : > { %v5621_v7 = vpop.f32.mrf.mxu2  ;;  %v5623_v35 = vpop.f32.mrf.mxu3 }
 0x5d8   : > { %v3170_v61 = vpop.permute.xlu0 %3169 }
 0x5da   : > { %v3166_v38 = vpop.permute.xlu1 %3165 }
 0x5db   : > { %3883 = vmatmul.msk.f32.gmra.mxu0 %vm2004_vm1, %v3871_v33  ;;  %3895 = vmatmul.msk.f32.gmra.mxu1 %vm2004_vm1, %v3871_v33  ;;  %v2366_v33 = vadd.f32 %v5526_v6, %v2156_v37  ;;  %v2200_v37 = vadd.f32 %v5521_v27, %v5365_v59 }
 0x5dc   : > { %v5635_v58 = vpop.f32.mrf.mxu0  ;;  %v5637_v29 = vpop.f32.mrf.mxu1  ;;  %3914 = vmatmul.msk.f32.vlgmr.msrb.gmra.mxu2 %vm2004_vm1, %v3902_v19  ;;  %3926 = vmatmul.msk.f32.vlgmr.msrb.gmra.mxu3 %vm2004_vm1, %v3902_v19  ;;  %v2367_v19 = vadd.f32 %v5528_v28, %v2197_v31  ;;  %v3180_v28 = vsel %vm477_vm15, %v3166_v38, %v3174_v20 }
 0x5dd   : > { %v2369_v59 = vadd.f32 %v5541_v1, %v2200_v37  ;;  %v2203_v1 = vadd.f32 %v5534_v63, %v5409_v5 }
 0x5df   : > { %v2462_v48 = vpop.f32.mrf.mxu2  ;;  %v2503_v8 = vpop.f32.mrf.mxu3 }
 0x5e0   : > { %v2527_v51 = vadd.f32 %v2462_v48, %v2364_v0  ;;  %v2528_v24 = vadd.f32 %v2503_v8, %v2365_v2  ;;  %v3184_v0 = vsel %vm477_vm15, %v3174_v20, %v3166_v38  ;;  %v3164_v44 = vpop.permute.xlu0 %3163  ;;  %v3873_v8 = vld [vmem:[%s5963_s6 + $0x198] sm:$0xff] }
 0x5e2   : > { %v3178_v62 = vpop.permute.xlu1 %3177 }
 0x5e3   : > { %v3182_v21 = vsel %vm477_vm15, %v3170_v61, %v3178_v62  ;;  %v3186_v23 = vsel %vm477_vm15, %v3178_v62, %v3170_v61  ;;  %3884 = vmatmul.msk.f32.gmra.mxu0 %vm2004_vm1, %v3872_v22  ;;  %3896 = vmatmul.msk.f32.gmra.mxu1 %vm2004_vm1, %v3872_v22  ;;  %v3904_v62 = vld [vmem:[%s5963_s6 + $0x1d0] sm:$0xff]  ;;  %v2159_v22 = vadd.f32 %v5519_v9, %v5363_v43 }
 0x5e4   : > { %3942 = vmatpush.msk.msrb.mxu0 %vm4181_vm0, %v3182_v21  ;;  %3954 = vmatpush.msk.msrb.mxu1 %vm4185_vm5, %v3186_v23  ;;  %v5663_v30 = vpop.f32.mrf.mxu0  ;;  %v5665_v17 = vpop.f32.mrf.mxu1 }
 0x5e5   : > { %3915 = vmatmul.msk.f32.gmra.mxu2 %vm2004_vm1, %v3903_v3  ;;  %3927 = vmatmul.msk.f32.gmra.mxu3 %vm2004_vm1, %v3903_v3  ;;  %v2368_v43 = vadd.f32 %v5539_v36, %v2159_v22  ;;  %v2162_v36 = vadd.f32 %v5532_v50, %v5407_v55 }
 0x5e6   : > { %3943 = vmatpush.msk.msrb.mxu0 %vm4181_vm0, %v3181_v39  ;;  %3955 = vmatpush.msk.msrb.mxu1 %vm4185_vm5, %v3185_v54  ;;  %v2371_v54 = vadd.f32 %v5554_v10, %v2203_v1  ;;  %v2206_v10 = vadd.f32 %v5547_v34, %v5438_v18  ;;  %v3909_v1 = vld [vmem:[%s5963_s6 + $0x1f8] sm:$0xff] }
 0x5e7   : > { %v2465_v6 = vpop.f32.mrf.mxu2  ;;  %v2506_v11 = vpop.f32.mrf.mxu3  ;;  %v2370_v39 = vadd.f32 %v5552_v14, %v2162_v36  ;;  %v2165_v14 = vadd.f32 %v5545_v56, %v5436_v60  ;;  %v3934_v36 = vld [vmem:[%s5963_s6 + $0x200] sm:$0xff] }
 0x5e8   : > { %v2529_v2 = vadd.f32 %v2465_v6, %v2366_v33  ;;  %v2530_v49 = vadd.f32 %v2506_v11, %v2367_v19  ;;  %3944 = vmatpush.msk.msrb.mxu0 %vm4181_vm0, %v3180_v28  ;;  %3956 = vmatpush.msk.msrb.mxu1 %vm4185_vm5, %v3184_v0  ;;  %v3875_v6 = vld [vmem:[%s5963_s6 + $0x1a8] sm:$0xff]  ;;  %v3906_v11 = vld [vmem:[%s5963_s6 + $0x1e0] sm:$0xff] }
 0x5ea   : > { %v3172_v48 = vpop.permute.xlu1 %3171 }
 0x5eb   : > { %v3179_v61 = vsel %vm477_vm15, %v3164_v44, %v3172_v48  ;;  %v3183_v38 = vsel %vm477_vm15, %v3172_v48, %v3164_v44  ;;  %3885 = vmatmul.msk.f32.gmra.mxu0 %vm2004_vm1, %v3873_v8  ;;  %3897 = vmatmul.msk.f32.gmra.mxu1 %vm2004_vm1, %v3873_v8  ;;  %v2372_v44 = vadd.f32 %v5577_v16, %v2165_v14  ;;  %v3876_v8 = vld [vmem:[%s5963_s6 + $0x1b0] sm:$0xff] }
 0x5ec   : > { %3945 = vmatpush.msk.msrb.mxu0 %vm4181_vm0, %v3179_v61  ;;  %3957 = vmatpush.msk.msrb.mxu1 %vm4185_vm5, %v3183_v38  ;;  %v2593_v21 = vpop.f32.mrf.mxu0  ;;  %v2634_v23 = vpop.f32.mrf.mxu1  ;;  %v2373_v48 = vadd.f32 %v5579_v52, %v2206_v10  ;;  %v3907_v61 = vld [vmem:[%s5963_s6 + $0x1e8] sm:$0xff]  ;;  %v2168_v16 = vadd.f32 %v5558_v45, %v5458_v41  ;;  %v2209_v52 = vadd.f32 %v5560_v26, %v5460_v57 }
 0x5ed   : > { %v5707_v53 = vadd.f32 %v2593_v21, %v2527_v51  ;;  %v5709_v3 = vadd.f32 %v2634_v23, %v2528_v24  ;;  %3916 = vmatmul.msk.f32.gmra.mxu2 %vm2004_vm1, %v3904_v62  ;;  %3928 = vmatmul.msk.f32.gmra.mxu3 %vm2004_vm1, %v3904_v62  ;;  %v3874_v51 = vld [vmem:[%s5963_s6 + $0x1a0] sm:$0xff]  ;;  %v3905_v24 = vld [vmem:[%s5963_s6 + $0x1d8] sm:$0xff] }
 0x5ee   : > { %v2374_v21 = vadd.f32 %v5613_v47, %v2168_v16  ;;  %v2375_v23 = vadd.f32 %v5615_v46, %v2209_v52  ;;  %v2171_v47 = vadd.f32 %v5595_v40, %v5474_v32  ;;  %v2212_v46 = vadd.f32 %v5597_v4, %v5476_v42 }
 0x5ef   : > { %v2468_v12 = vpop.f32.mrf.mxu2  ;;  %v2509_v13 = vpop.f32.mrf.mxu3 }
 0x5f0   : > { %v2531_v9 = vadd.f32 %v2468_v12, %v2368_v43  ;;  %v2532_v27 = vadd.f32 %v2509_v13, %v2369_v59  ;;  %v3877_v43 = vld [vmem:[%s5963_s6 + $0x1b8] sm:$0xff]  ;;  %v3908_v59 = vld [vmem:[%s5963_s6 + $0x1f0] sm:$0xff] }
 0x5f3   : > { %3886 = vmatmul.msk.f32.gmra.mxu0 %vm2004_vm1, %v3874_v51  ;;  %3898 = vmatmul.msk.f32.gmra.mxu1 %vm2004_vm1, %v3874_v51  ;;  %v2376_v51 = vadd.f32 %v5635_v58, %v2171_v47  ;;  %v2174_v58 = vadd.f32 %v5621_v7, %v5492_v15 }
 0x5f4   : > { %v2596_v31 = vpop.f32.mrf.mxu0  ;;  %v2637_v33 = vpop.f32.mrf.mxu1 }
 0x5f5   : > { %v5727_v19 = vadd.f32 %v2596_v31, %v2529_v2  ;;  %v5729_v20 = vadd.f32 %v2637_v33, %v2530_v49  ;;  %3917 = vmatmul.msk.f32.gmra.mxu2 %vm2004_vm1, %v3905_v24  ;;  %3929 = vmatmul.msk.f32.gmra.mxu3 %vm2004_vm1, %v3905_v24  ;;  %v2377_v24 = vadd.f32 %v5637_v29, %v2212_v46 }
 0x5f6   : > { %v2215_v29 = vadd.f32 %v5623_v35, %v5494_v25 }
 0x5f7   : > { %v2471_v55 = vpop.f32.mrf.mxu2  ;;  %v2512_v5 = vpop.f32.mrf.mxu3 }
 0x5f8   : > { %v2533_v50 = vadd.f32 %v2471_v55, %v2370_v39  ;;  %v2534_v63 = vadd.f32 %v2512_v5, %v2371_v54  ;;  %v2378_v55 = vadd.f32 %v5663_v30, %v2174_v58  ;;  %v2379_v5 = vadd.f32 %v5665_v17, %v2215_v29  ;;  %v3936_v30 = vld [vmem:[%s5963_s6 + $0x210] sm:$0xff] }
 0x5fb   : > { %3887 = vmatmul.msk.f32.gmra.mxu0 %vm2004_vm1, %v3875_v6  ;;  %3899 = vmatmul.msk.f32.gmra.mxu1 %vm2004_vm1, %v3875_v6 }
 0x5fc   : > { %v2599_v28 = vpop.f32.mrf.mxu0  ;;  %v2640_v0 = vpop.f32.mrf.mxu1 }
 0x5fd   : > { %v5747_v2 = vadd.f32 %v2599_v28, %v2531_v9  ;;  %v5749_v49 = vadd.f32 %v2640_v0, %v2532_v27  ;;  %3918 = vmatmul.msk.f32.gmra.mxu2 %vm2004_vm1, %v3906_v11  ;;  %3930 = vmatmul.msk.f32.gmra.mxu3 %vm2004_vm1, %v3906_v11 }
 0x5ff   : > { %v2474_v60 = vpop.f32.mrf.mxu2  ;;  %v2515_v18 = vpop.f32.mrf.mxu3 }
 0x600   : > { %v2535_v56 = vadd.f32 %v2474_v60, %v2372_v44  ;;  %v2536_v34 = vadd.f32 %v2515_v18, %v2373_v48  ;;  %v3937_v44 = vld [vmem:[%s5963_s6 + $0x218] sm:$0xff]  ;;  %v3938_v18 = vld [vmem:[%s5963_s6 + $0x220] sm:$0xff] }
 0x603   : > { %3888 = vmatmul.msk.f32.gmra.mxu0 %vm2004_vm1, %v3876_v8  ;;  %3900 = vmatmul.msk.f32.gmra.mxu1 %vm2004_vm1, %v3876_v8  ;;  %v3939_v8 = vld [vmem:[%s5963_s6 + $0x228] sm:$0xff] }
 0x604   : > { %v2602_v38 = vpop.f32.mrf.mxu0  ;;  %v2643_v62 = vpop.f32.mrf.mxu1 }
 0x605   : > { %v5767_v22 = vadd.f32 %v2602_v38, %v2533_v50  ;;  %v5769_v37 = vadd.f32 %v2643_v62, %v2534_v63  ;;  %3919 = vmatmul.msk.f32.gmra.mxu2 %vm2004_vm1, %v3907_v61  ;;  %3931 = vmatmul.msk.f32.gmra.mxu3 %vm2004_vm1, %v3907_v61  ;;  %v3935_v50 = vld [vmem:[%s5963_s6 + $0x208] sm:$0xff]  ;;  %v3940_v61 = vld [vmem:[%s5963_s6 + $0x230] sm:$0xff]  ;;  %v3941_v38 = vld [vmem:[%s5963_s6 + $0x238] sm:$0xff] }
 0x607   : > { %v2477_v41 = vpop.f32.mrf.mxu2  ;;  %v2518_v57 = vpop.f32.mrf.mxu3 }
 0x608   : > { %v2537_v45 = vadd.f32 %v2477_v41, %v2374_v21  ;;  %v2538_v26 = vadd.f32 %v2518_v57, %v2375_v23 }
 0x60b   : > { %3889 = vmatmul.msk.f32.gmra.mxu0 %vm2004_vm1, %v3877_v43  ;;  %3901 = vmatmul.msk.f32.gmra.mxu1 %vm2004_vm1, %v3877_v43 }
 0x60c   : > { %v2605_v12 = vpop.f32.mrf.mxu0  ;;  %v2646_v13 = vpop.f32.mrf.mxu1 }
 0x60d   : > { %v5787_v9 = vadd.f32 %v2605_v12, %v2535_v56  ;;  %v5789_v27 = vadd.f32 %v2646_v13, %v2536_v34  ;;  %3920 = vmatmul.msk.f32.gmra.mxu2 %vm2004_vm1, %v3908_v59  ;;  %3932 = vmatmul.msk.f32.gmra.mxu3 %vm2004_vm1, %v3908_v59 }
 0x60f   : > { %v2480_v32 = vpop.f32.mrf.mxu2  ;;  %v2521_v42 = vpop.f32.mrf.mxu3 }
 0x610   : > { %v2539_v40 = vadd.f32 %v2480_v32, %v2376_v51  ;;  %v2540_v4 = vadd.f32 %v2521_v42, %v2377_v24 }
 0x613   : > { %3946 = vmatmul.msk.f32.vlgmr.msrb.gmra.mxu0 %vm2004_vm1, %v3934_v36  ;;  %3958 = vmatmul.msk.f32.vlgmr.msrb.gmra.mxu1 %vm2004_vm1, %v3934_v36 }
 0x614   : > { %v2608_v31 = vpop.f32.mrf.mxu0  ;;  %v2649_v33 = vpop.f32.mrf.mxu1 }
 0x615   : > { %v5807_v39 = vadd.f32 %v2608_v31, %v2537_v45  ;;  %v5809_v54 = vadd.f32 %v2649_v33, %v2538_v26  ;;  %3921 = vmatmul.msk.f32.gmra.mxu2 %vm2004_vm1, %v3909_v1  ;;  %3933 = vmatmul.msk.f32.gmra.mxu3 %vm2004_vm1, %v3909_v1 }
 0x617   : > { %v2483_v15 = vpop.f32.mrf.mxu2  ;;  %v2524_v25 = vpop.f32.mrf.mxu3 }
 0x618   : > { %v2541_v7 = vadd.f32 %v2483_v15, %v2378_v55  ;;  %v2542_v35 = vadd.f32 %v2524_v25, %v2379_v5 }
 0x61b   : > { %3947 = vmatmul.msk.f32.gmra.mxu0 %vm2004_vm1, %v3935_v50  ;;  %3959 = vmatmul.msk.f32.gmra.mxu1 %vm2004_vm1, %v3935_v50 }
 0x61c   : > { %v2611_v63 = vpop.f32.mrf.mxu0  ;;  %v2652_v6 = vpop.f32.mrf.mxu1 }
 0x61d   : > { %v5820_v11 = vadd.f32 %v2611_v63, %v2539_v40  ;;  %v5822_v14 = vadd.f32 %v2652_v6, %v2540_v4 }
 0x61f   : > { %v2756_v48 = vpop.f32.mrf.mxu2  ;;  %v2797_v60 = vpop.f32.mrf.mxu3 }
 0x620   : > { %v2822_v50 = vadd.f32 %v2797_v60, %v5709_v3 }
 0x623   : > { %3948 = vmatmul.msk.f32.gmra.mxu0 %vm2004_vm1, %v3936_v30  ;;  %3960 = vmatmul.msk.f32.gmra.mxu1 %vm2004_vm1, %v3936_v30 }
 0x624   : > { %v2614_v17 = vpop.f32.mrf.mxu0  ;;  %v2655_v10 = vpop.f32.mrf.mxu1 }
 0x625   : > { %v5829_v28 = vadd.f32 %v2614_v17, %v2541_v7  ;;  %v5831_v0 = vadd.f32 %v2655_v10, %v2542_v35  ;;  %v2821_v35 = vadd.f32 %v2756_v48, %v5707_v53 }
 0x627   : > { %6030 = vst [vmem:[#allocation13_spill] sm:$0xff] %v5831_v0  ;;  %v2759_v56 = vpop.f32.mrf.mxu2  ;;  %v2800_v34 = vpop.f32.mrf.mxu3 }
 0x628   : > { %v2823_v0 = vadd.f32 %v2759_v56, %v5727_v19 }
 0x62b   : > { %3949 = vmatmul.msk.f32.gmra.mxu0 %vm2004_vm1, %v3937_v44  ;;  %3961 = vmatmul.msk.f32.gmra.mxu1 %vm2004_vm1, %v3937_v44 }
 0x62f   : > { %v5853_v16 = vpop.f32.mrf.mxu2  ;;  %v5855_v52 = vpop.f32.mrf.mxu3 }
 0x630   : > { %v2826_v19 = vadd.f32 %v5855_v52, %v5749_v49 }
 0x633   : > { %3950 = vmatmul.msk.f32.gmra.mxu0 %vm2004_vm1, %v3938_v18  ;;  %3962 = vmatmul.msk.f32.gmra.mxu1 %vm2004_vm1, %v3938_v18 }
 0x637   : > { %v5862_v62 = vpop.f32.mrf.mxu2  ;;  %v5864_v21 = vpop.f32.mrf.mxu3 }
 0x638   : > { %v2828_v49 = vadd.f32 %v5864_v21, %v5769_v37 }
 0x63b   : > { %3951 = vmatmul.msk.f32.gmra.mxu0 %vm2004_vm1, %v3939_v8  ;;  %3963 = vmatmul.msk.f32.gmra.mxu1 %vm2004_vm1, %v3939_v8 }
 0x63f   : > { %v5868_v57 = vpop.f32.mrf.mxu2  ;;  %v5870_v45 = vpop.f32.mrf.mxu3 }
 0x640   : > { %v2829_v37 = vadd.f32 %v5868_v57, %v5787_v9 }
 0x643   : > { %3952 = vmatmul.msk.f32.gmra.mxu0 %vm2004_vm1, %v3940_v61  ;;  %3964 = vmatmul.msk.f32.gmra.mxu1 %vm2004_vm1, %v3940_v61 }
 0x647   : > { %v5872_v59 = vpop.f32.mrf.mxu2  ;;  %v5874_v47 = vpop.f32.mrf.mxu3 }
 0x648   : > { %v2832_v57 = vadd.f32 %v5874_v47, %v5809_v54 }
 0x64b   : > { %3953 = vmatmul.msk.f32.gmra.mxu0 %vm2004_vm1, %v3941_v38  ;;  %3965 = vmatmul.msk.f32.gmra.mxu1 %vm2004_vm1, %v3941_v38 }
 0x64f   : > { %v5880_v24 = vpop.f32.mrf.mxu2  ;;  %v5882_v32 = vpop.f32.mrf.mxu3 }
 0x650   : > { %v2951_v23 = vpop.f32.mrf.mxu0  ;;  %v2992_v41 = vpop.f32.mrf.mxu1  ;;  %v2833_v54 = vadd.f32 %v5880_v24, %v5820_v11 }
 0x651   : > { %v3016_v63 = vadd.f32 %v2951_v23, %v2821_v35  ;;  %v3017_v6 = vadd.f32 %v2992_v41, %v2822_v50  ;;  %v3342_v50 = vpop.permute.xlu0 %3341 }
 0x657   : > { %v5888_v4 = vpop.f32.mrf.mxu2  ;;  %v5890_v36 = vpop.f32.mrf.mxu3 }
 0x658   : > { %v2954_v26 = vpop.f32.mrf.mxu0  ;;  %v2995_v43 = vpop.f32.mrf.mxu1  ;;  %6031 = vst [vmem:[#allocation11_spill] sm:$0xff] %v5888_v4 }
 0x659   : > { %6032 = vst [vmem:[#allocation12_spill] sm:$0xff] %v5890_v36  ;;  %v3337_v36 = vpop.permute.xlu2 %3336  ;;  %v3018_v53 = vadd.f32 %v2954_v26, %v2823_v0  ;;  %v3357_v9 = vpop.permute.xlu0 %3356 }
 0x65f   : > { %v3082_v29 = vpop.f32.mrf.mxu2  ;;  %v3123_v31 = vpop.f32.mrf.mxu3  ;;  %v6035_v11 = vld [vmem:[#allocation11_spill] sm:$0xff] }
 0x660   : > { %v2957_v46 = vpop.f32.mrf.mxu0  ;;  %v2998_v12 = vpop.f32.mrf.mxu1  ;;  %v3147_v30 = vadd.f32 %v3082_v29, %v3016_v63  ;;  %v3148_v17 = vadd.f32 %v3123_v31, %v3017_v6  ;;  %v2825_v63 = vadd.f32 %v5853_v16, %v5747_v2  ;;  %v2827_v2 = vadd.f32 %v5862_v62, %v5767_v22 }
 0x661   : > { %v3352_v22 = vpop.permute.xlu2 %3351  ;;  %v2830_v62 = vadd.f32 %v5870_v45, %v5789_v27  ;;  %v2831_v27 = vadd.f32 %v5872_v59, %v5807_v39  ;;  %v2834_v59 = vadd.f32 %v5882_v32, %v5822_v14  ;;  %v2835_v24 = vadd.f32 %v6035_v11, %v5829_v28  ;;  %v6037_v14 = vld [vmem:[#allocation12_spill] sm:$0xff] }
 0x662   : > { %v3020_v26 = vadd.f32 %v2957_v46, %v2825_v63 }
 0x668   : > { %v5876_v13 = vpop.f32.mrf.mxu0  ;;  %v5878_v51 = vpop.f32.mrf.mxu1 }
 0x669   : > { %v3085_v5 = vpop.f32.mrf.mxu2  ;;  %v3126_v15 = vpop.f32.mrf.mxu3  ;;  %v3022_v46 = vadd.f32 %v5876_v13, %v2827_v2 }
 0x66a   : > { %v3149_v60 = vadd.f32 %v3085_v5, %v3018_v53 }
 0x670   : > { %v5884_v42 = vpop.f32.mrf.mxu0  ;;  %v5886_v40 = vpop.f32.mrf.mxu1 }
 0x671   : > { %v3088_v18 = vpop.f32.mrf.mxu2  ;;  %v3129_v8 = vpop.f32.mrf.mxu3 }
 0x678   : > { %v5892_v1 = vpop.f32.mrf.mxu0  ;;  %v5894_v58 = vpop.f32.mrf.mxu1 }
 0x679   : > { %v3132_v56 = vpop.f32.mrf.mxu3 }
 0x680   : > { %v5896_v33 = vpop.f32.mrf.mxu0  ;;  %v5898_v55 = vpop.f32.mrf.mxu1 }
 0x688   : > { %v5900_v25 = vpop.f32.mrf.mxu0  ;;  %v5902_v7 = vpop.f32.mrf.mxu1 }
 0x689   : > { %6033 = vst [vmem:[#allocation16_spill] sm:$0xff] %v5900_v25  ;;  %v2824_v25 = vadd.f32 %v2800_v34, %v5729_v20  ;;  %v3091_v20 = vpop.f32.mrf.mxu2 }
 0x68a   : > { %6034 = vst [vmem:[#allocation14_spill] sm:$0xff] %v5902_v7 }
 0x68b   : > { %v3019_v48 = vadd.f32 %v2995_v43, %v2824_v25  ;;  %v3021_v43 = vadd.f32 %v2998_v12, %v2826_v19  ;;  %v3023_v12 = vadd.f32 %v5878_v51, %v2828_v49  ;;  %v3024_v51 = vadd.f32 %v5884_v42, %v2829_v37 }
 0x68d   : > { %v3150_v23 = vadd.f32 %v3126_v15, %v3019_v48  ;;  %v3152_v5 = vadd.f32 %v3129_v8, %v3021_v43  ;;  %v3154_v8 = vadd.f32 %v3132_v56, %v3023_v12  ;;  %v6036_v12 = vld [vmem:[#allocation13_spill] sm:$0xff] }
 0x68e   : > { %v2836_v32 = vadd.f32 %v6037_v14, %v6036_v12 }
 0x690   : > { %v3245_v10 = vpop.f32.mrf.mxu0  ;;  %v3286_v44 = vpop.f32.mrf.mxu1 }
 0x691   : > { %v3310_v61 = vadd.f32 %v3245_v10, %v3147_v30  ;;  %v3311_v38 = vadd.f32 %v3286_v44, %v3148_v17  ;;  %v3347_v30 = vpop.permute.xlu1 %3346  ;;  %v3094_v17 = vpop.f32.mrf.mxu2 }
 0x692   : > { %v3135_v10 = vpop.f32.mrf.mxu3 }
 0x693   : > { %v3374_v7 = vadd.f32 %v3337_v36, %v3310_v61  ;;  %v3375_v4 = vadd.f32 %v3337_v36, %v3311_v38  ;;  %v3151_v36 = vadd.f32 %v3088_v18, %v3020_v26  ;;  %v3153_v18 = vadd.f32 %v3091_v20, %v3022_v46  ;;  %v3367_v46 = vpop.permute.xlu2 %3366 }
 0x694   : > { %v3027_v20 = vadd.f32 %v5894_v58, %v2832_v57  ;;  %v3028_v58 = vadd.f32 %v5896_v33, %v2833_v54 }
 0x695   : > { %v3390_v3 = vmax.f32 %v3374_v7, %v3375_v4 }
 0x697   : > { %3391 = vmax.xlane.f32.xlu1 %v3390_v3  ;;  %v3025_v3 = vadd.f32 %v5886_v40, %v2830_v62  ;;  %v3026_v40 = vadd.f32 %v5892_v1, %v2831_v27 }
 0x698   : > { %v3248_v41 = vpop.f32.mrf.mxu0  ;;  %v3289_v29 = vpop.f32.mrf.mxu1 }
 0x699   : > { %v3312_v31 = vadd.f32 %v3248_v41, %v3149_v60  ;;  %v3313_v35 = vadd.f32 %v3289_v29, %v3150_v23  ;;  %v3155_v23 = vadd.f32 %v3094_v17, %v3024_v51  ;;  %v3156_v41 = vadd.f32 %v3135_v10, %v3025_v3  ;;  %v3097_v29 = vpop.f32.mrf.mxu2 }
 0x69b   : > { %v3376_v34 = vadd.f32 %v3342_v50, %v3312_v31  ;;  %v3377_v0 = vadd.f32 %v3342_v50, %v3313_v35  ;;  %v3138_v31 = vpop.f32.mrf.mxu3 }
 0x69d   : > { %v3393_v4 = vmax.f32 %v3376_v34, %v3377_v0  ;;  %v3157_v34 = vadd.f32 %v3097_v29, %v3026_v40  ;;  %v3158_v0 = vadd.f32 %v3138_v31, %v3027_v20 }
 0x69f   : > { %3394 = vmax.xlane.f32.xlu2 %v3393_v4  ;;  %v3362_v4 = vpop.permute.xlu1 %3361 }
 0x6a0   : > { %v3251_v15 = vpop.f32.mrf.mxu0  ;;  %v3292_v25 = vpop.f32.mrf.mxu1 }
 0x6a1   : > { %v3314_v7 = vadd.f32 %v3251_v15, %v3151_v36  ;;  %v3315_v6 = vadd.f32 %v3292_v25, %v3152_v5  ;;  %v3100_v15 = vpop.f32.mrf.mxu2  ;;  %v3029_v25 = vadd.f32 %v5898_v55, %v2834_v59  ;;  %v6038_v55 = vld [vmem:[#allocation16_spill] sm:$0xff] }
 0x6a3   : > { %v3378_v16 = vadd.f32 %v3347_v30, %v3314_v7  ;;  %v3379_v52 = vadd.f32 %v3347_v30, %v3315_v6  ;;  %v3141_v39 = vpop.f32.mrf.mxu3  ;;  %v3159_v6 = vadd.f32 %v3100_v15, %v3028_v58 }
 0x6a4   : > { %v3160_v30 = vadd.f32 %v3141_v39, %v3029_v25 }
 0x6a5   : > { %v3396_v44 = vmax.f32 %v3378_v16, %v3379_v52 }
 0x6a7   : > { %3397 = vmax.xlane.f32.xlu0 %v3396_v44 }
 0x6a8   : > { %v3254_v61 = vpop.f32.mrf.mxu0  ;;  %v3295_v38 = vpop.f32.mrf.mxu1 }
 0x6a9   : > { %v3316_v53 = vadd.f32 %v3254_v61, %v3153_v18  ;;  %v3317_v48 = vadd.f32 %v3295_v38, %v3154_v8  ;;  %v3103_v33 = vpop.f32.mrf.mxu2  ;;  %v3030_v18 = vadd.f32 %v6038_v55, %v2835_v24  ;;  %v6039_v8 = vld [vmem:[#allocation14_spill] sm:$0xff] }
 0x6aa   : > { %v3031_v61 = vadd.f32 %v6039_v8, %v2836_v32 }
 0x6ab   : > { %v3380_v21 = vadd.f32 %v3352_v22, %v3316_v53  ;;  %v3381_v13 = vadd.f32 %v3352_v22, %v3317_v48  ;;  %v3144_v44 = vpop.f32.mrf.mxu3  ;;  %v3161_v53 = vadd.f32 %v3103_v33, %v3030_v18 }
 0x6ac   : > { %v3162_v48 = vadd.f32 %v3144_v44, %v3031_v61 }
 0x6ad   : > { %v3399_v60 = vmax.f32 %v3380_v21, %v3381_v13  ;;  %v3372_v21 = vpop.permute.xlu0 %3371 }
 0x6af   : > { %3400 = vmax.xlane.f32.xlu2 %v3399_v60 }
 0x6b0   : > { %v3257_v35 = vpop.f32.mrf.mxu0  ;;  %v3298_v50 = vpop.f32.mrf.mxu1 }
 0x6b1   : > { %v3318_v63 = vadd.f32 %v3257_v35, %v3155_v23  ;;  %v3319_v19 = vadd.f32 %v3298_v50, %v3156_v41 }
 0x6b3   : > { %v3382_v45 = vadd.f32 %v3357_v9, %v3318_v63  ;;  %v3383_v42 = vadd.f32 %v3357_v9, %v3319_v19 }
 0x6b5   : > { %v3402_v56 = vmax.f32 %v3382_v45, %v3383_v42 }
 0x6b7   : > { %3403 = vmax.xlane.f32.xlu1 %v3402_v56 }
 0x6b8   : > { %v3260_v26 = vpop.f32.mrf.mxu0  ;;  %v3301_v43 = vpop.f32.mrf.mxu1 }
 0x6b9   : > { %v3320_v36 = vadd.f32 %v3260_v26, %v3157_v34  ;;  %v3321_v5 = vadd.f32 %v3301_v43, %v3158_v0 }
 0x6bb   : > { %v3384_v47 = vadd.f32 %v3362_v4, %v3320_v36  ;;  %v3385_v1 = vadd.f32 %v3362_v4, %v3321_v5 }
 0x6bd   : > { %v3405_v7 = vmax.f32 %v3384_v47, %v3385_v1 }
 0x6bf   : > { %3406 = vmax.xlane.f32.xlu2 %v3405_v7 }
 0x6c0   : > { %v3263_v2 = vpop.f32.mrf.mxu0  ;;  %v3304_v49 = vpop.f32.mrf.mxu1 }
 0x6c1   : > { %v3322_v16 = vadd.f32 %v3263_v2, %v3159_v6  ;;  %v3323_v52 = vadd.f32 %v3304_v49, %v3160_v30 }
 0x6c3   : > { %v3386_v17 = vadd.f32 %v3367_v46, %v3322_v16  ;;  %v3387_v10 = vadd.f32 %v3367_v46, %v3323_v52 }
 0x6c5   : > { %v3408_v38 = vmax.f32 %v3386_v17, %v3387_v10 }
 0x6c7   : > { %3409 = vmax.xlane.f32.xlu0 %v3408_v38 }
 0x6c8   : > { %v3266_v22 = vpop.f32.mrf.mxu0  ;;  %v3307_v37 = vpop.f32.mrf.mxu1 }
 0x6c9   : > { %v3324_v62 = vadd.f32 %v3266_v22, %v3161_v53  ;;  %v3325_v28 = vadd.f32 %v3307_v37, %v3162_v48 }
 0x6cb   : > { %v3388_v13 = vadd.f32 %v3372_v21, %v3324_v62  ;;  %v3389_v51 = vadd.f32 %v3372_v21, %v3325_v28 }
 0x6cd   : > { %v3411_v3 = vmax.f32 %v3388_v13, %v3389_v51 }
 0x6cf   : > { %3412 = vmax.xlane.f32.xlu1 %v3411_v3 }
 0x70a   : > { %v3392_v60 = vpop.xlane.xlu1 %3391 }
 0x70b   : > { %3415 = vst.msk [vmem:[%s305_s18] sm:$0xff] %vm3414_vm2, %v3392_v60 }
 0x712   : > { %v3395_v23 = vpop.xlane.xlu2 %3394 }
 0x713   : > { %3416 = vst.msk [vmem:[%s305_s18 + $0x8] sm:$0xff] %vm3414_vm2, %v3395_v23 }
 0x71a   : > { %v3398_v41 = vpop.xlane.xlu0 %3397 }
 0x71b   : > { %3417 = vst.msk [vmem:[%s305_s18 + $0x10] sm:$0xff] %vm3414_vm2, %v3398_v41 }
 0x722   : > { %v3401_v29 = vpop.xlane.xlu2 %3400 }
 0x723   : > { %3418 = vst.msk [vmem:[%s305_s18 + $0x18] sm:$0xff] %vm3414_vm2, %v3401_v29 }
 0x72a   : > { %v3404_v31 = vpop.xlane.xlu1 %3403 }
 0x72b   : > { %3419 = vst.msk [vmem:[%s305_s18 + $0x20] sm:$0xff] %vm3414_vm2, %v3404_v31 }
 0x732   : > { %v3407_v35 = vpop.xlane.xlu2 %3406 }
 0x733   : > { %3420 = vst.msk [vmem:[%s305_s18 + $0x28] sm:$0xff] %vm3414_vm2, %v3407_v35 }
 0x73a   : > { %v3410_v50 = vpop.xlane.xlu0 %3409 }
 0x73b   : > { %3421 = vst.msk [vmem:[%s305_s18 + $0x30] sm:$0xff] %vm3414_vm2, %v3410_v50 }
 0x742   : > { %v3413_v63 = vpop.xlane.xlu1 %3412 }
 0x743   : > { %3422 = vst.msk [vmem:[%s305_s18 + $0x38] sm:$0xff] %vm3414_vm2, %v3413_v63 }
 0x744 PF: > { %s18_s27 = sadd.s32 1, %s3996_s27  }
 0x745   : > { %p15_p4 = scmp.ge.s32.totalorder %s18_s27, 4  }
 0x747   :  { %17 = sbr.rel (!%p15_p4) target bundleno = 1 (0x1), region = 107 }

</bundles_post_ra>
